<compile_context>
chip_gen: v6e
topology: v6e:2x2x1
jax: 0.10.0
libtpu: 0.0.40
codegen_flags: <defaults>
</compile_context>

<pallas_src>
import jax
import jax.numpy as jnp
from jax.experimental import pallas as pl
from jax.experimental.pallas import tpu as pltpu


TILE_M = 512
VMEM_LIMIT = 48 * 1024 * 1024   # safe on v5e/v6e (128 MiB) and v7x (64 MiB)


def _round_up(x, m):
    return (x + m - 1) // m * m


# ----------------------------- Pallas kernels ------------------------------

def conv_stats_kernel(x_ref, w_ref, y_ref, sum_ref, ssq_ref):
    """Pass 1 of conv+BN: tiled matmul (bf16 operands, f32 acc) writing the conv
    output tile, plus per-channel sum / sum-of-squares accumulation.

    x_ref : (TILE_M, K)    bf16 im2col patches
    w_ref : (K, Cpad)      bf16 weights (Cout zero-padded to 128 lanes)
    y_ref : (TILE_M, Cpad) f32 conv output tile
    sum_ref, ssq_ref : (1, Cpad) f32 accumulators (same block every grid step)
    """
    acc = jnp.dot(x_ref[...], w_ref[...], preferred_element_type=jnp.float32)
    y_ref[...] = acc

    @pl.when(pl.program_id(0) == 0)
    def _():
        sum_ref[...] = jnp.zeros_like(sum_ref)
        ssq_ref[...] = jnp.zeros_like(ssq_ref)

    sum_ref[...] += jnp.sum(acc, axis=0, keepdims=True)
    ssq_ref[...] += jnp.sum(acc * acc, axis=0, keepdims=True)


def bn_relu_kernel(y_ref, scale_ref, shift_ref, o_ref):
    """Pass 2 of conv+BN: y * scale + shift, ReLU (all f32, tiled over M)."""
    o_ref[...] = jnp.maximum(y_ref[...] * scale_ref[...] + shift_ref[...], 0.0)


def conv_tanh_kernel(x_ref, w_ref, b_ref, o_ref):
    """Final conv: tiled matmul + bias + (tanh(x)+1)/2."""
    acc = jnp.dot(x_ref[...], w_ref[...], preferred_element_type=jnp.float32)
    acc = acc + b_ref[...]
    o_ref[...] = (jnp.tanh(acc) + 1.0) * 0.5


# ------------------------------- JAX glue -----------------------------------

def upsample2x_align_corners(x):
    """nn.UpsamplingBilinear2d(scale_factor=2) == bilinear, align_corners=True.
    x: NHWC."""
    N, H, W, C = x.shape
    Ho, Wo = 2 * H, 2 * W

    def coords(n_in, n_out):
        if n_in == 1:
            src = jnp.zeros((n_out,), jnp.float32)
        else:
            src = jnp.arange(n_out, dtype=jnp.float32) * (n_in - 1) / (n_out - 1)
        i0 = jnp.clip(jnp.floor(src).astype(jnp.int32), 0, n_in - 1)
        i1 = jnp.clip(i0 + 1, 0, n_in - 1)
        t = src - i0.astype(jnp.float32)
        return i0, i1, t

    h0, h1, th = coords(H, Ho)
    w0, w1, tw = coords(W, Wo)
    xh = (x[:, h0, :, :] * (1.0 - th)[None, :, None, None]
          + x[:, h1, :, :] * th[None, :, None, None])
    out = (xh[:, :, w0, :] * (1.0 - tw)[None, None, :, None]
           + xh[:, :, w1, :] * tw[None, None, :, None])
    return out


def reflect_pad1(x):
    """nn.ReflectionPad2d(1) on NHWC."""
    return jnp.pad(x, ((0, 0), (1, 1), (1, 1), (0, 0)), mode="reflect")


def im2col3x3(xp):
    """xp: (N, H+2, W+2, Cin) padded input -> bf16 (N*H*W, 9*Cin) patches."""
    xp = xp.astype(jnp.bfloat16)          # halve HBM traffic of the 9x patches
    N, Hp, Wp, C = xp.shape
    H, W = Hp - 2, Wp - 2
    cols = [xp[:, dy:dy + H, dx:dx + W, :] for dy in range(3) for dx in range(3)]
    patches = jnp.concatenate(cols, axis=-1)          # (N, H, W, 9*Cin)
    return patches.reshape(N * H * W, 9 * C), (N, H, W)


def _prep_patches_weights(x_nhwc, w, tile_m):
    patches, (N, H, W) = im2col3x3(reflect_pad1(x_nhwc))
    M, K = patches.shape
    cout = w.shape[-1]
    cpad = _round_up(cout, 128)
    tile_m = min(tile_m, _round_up(M, 8))
    mp = _round_up(M, tile_m)
    if mp != M:
        patches = jnp.pad(patches, ((0, mp - M), (0, 0)))  # zero rows: no effect on stats
    w2d = w.reshape(9 * w.shape[2], cout).astype(jnp.bfloat16)
    w2d = jnp.pad(w2d, ((0, 0), (0, cpad - cout)))
    return patches, w2d, (N, H, W, M, K, cout, cpad, mp, tile_m)


def stage_conv_bn_relu(x_nhwc, w, gamma, beta, *, eps=1e-5, tile_m=TILE_M):
    """ReflectionPad -> Conv3x3 (bias folded into BN) -> BatchNorm(batch stats) -> ReLU."""
    patches, w2d, (N, H, W, M, K, cout, cpad, mp, tile_m) = _prep_patches_weights(
        x_nhwc, w, tile_m)
    num_tiles = mp // tile_m

    y, s, ss = pl.pallas_call(
        conv_stats_kernel,
        grid=(num_tiles,),
        in_specs=[
            pl.BlockSpec((tile_m, K), lambda i: (i, 0)),
            pl.BlockSpec((K, cpad), lambda i: (0, 0)),      # weights stay VMEM-resident
        ],
        out_specs=(
            pl.BlockSpec((tile_m, cpad), lambda i: (i, 0)),
            pl.BlockSpec((1, cpad), lambda i: (0, 0)),      # revisited accumulator
            pl.BlockSpec((1, cpad), lambda i: (0, 0)),
        ),
        out_shape=(
            jax.ShapeDtypeStruct((mp, cpad), jnp.float32),
            jax.ShapeDtypeStruct((1, cpad), jnp.float32),
            jax.ShapeDtypeStruct((1, cpad), jnp.float32),
        ),
        compiler_params=pltpu.CompilerParams(
            dimension_semantics=("arbitrary",),             # accumulator axis
            vmem_limit_bytes=VMEM_LIMIT),
    )(patches, w2d)

    # Tiny per-channel math (O(Cpad)) in plain JAX. Biased variance = training BN.
    mean = s / M
    var = ss / M - mean * mean
    inv = jax.lax.rsqrt(var + eps)
    g = jnp.pad(gamma.astype(jnp.float32), (0, cpad - cout)).reshape(1, cpad)
    b = jnp.pad(beta.astype(jnp.float32), (0, cpad - cout)).reshape(1, cpad)
    scale = g * inv
    shift = b - mean * scale

    out = pl.pallas_call(
        bn_relu_kernel,
        grid=(num_tiles,),
        in_specs=[
            pl.BlockSpec((tile_m, cpad), lambda i: (i, 0)),
            pl.BlockSpec((1, cpad), lambda i: (0, 0)),
            pl.BlockSpec((1, cpad), lambda i: (0, 0)),
        ],
        out_specs=pl.BlockSpec((tile_m, cpad), lambda i: (i, 0)),
        out_shape=jax.ShapeDtypeStruct((mp, cpad), jnp.float32),
        compiler_params=pltpu.CompilerParams(
            dimension_semantics=("parallel",),              # megacore on v7x
            vmem_limit_bytes=VMEM_LIMIT),
    )(y, scale, shift)

    return out[:M, :cout].reshape(N, H, W, cout)


def stage_conv_tanh(x_nhwc, w, bias, *, tile_m=TILE_M):
    """ReflectionPad -> Conv3x3 -> (tanh + 1)/2."""
    patches, w2d, (N, H, W, M, K, cout, cpad, mp, tile_m) = _prep_patches_weights(
        x_nhwc, w, tile_m)
    bpad = jnp.pad(bias.astype(jnp.float32), (0, cpad - cout)).reshape(1, cpad)
    num_tiles = mp // tile_m

    out = pl.pallas_call(
        conv_tanh_kernel,
        grid=(num_tiles,),
        in_specs=[
            pl.BlockSpec((tile_m, K), lambda i: (i, 0)),
            pl.BlockSpec((K, cpad), lambda i: (0, 0)),
            pl.BlockSpec((1, cpad), lambda i: (0, 0)),
        ],
        out_specs=pl.BlockSpec((tile_m, cpad), lambda i: (i, 0)),
        out_shape=jax.ShapeDtypeStruct((mp, cpad), jnp.float32),
        compiler_params=pltpu.CompilerParams(
            dimension_semantics=("parallel",),
            vmem_limit_bytes=VMEM_LIMIT),
    )(patches, w2d, bpad)

    return out[:M, :cout].reshape(N, H, W, cout)


# ------------------------------- Decoder ------------------------------------

def init_decoder_params(key, base_c, out_channels=3):
    """Deterministic synthetic params (kaiming-normal conv, BN gamma~N(1,.02))."""
    def conv_w(k, cin, cout):
        std = (2.0 / (cin * 9)) ** 0.5            # kaiming fan_in, gain=sqrt(2)
        return jax.random.normal(k, (3, 3, cin, cout), jnp.float32) * std

    ks = jax.random.split(key, 8)
    c4, c2, c1 = 4 * base_c, 2 * base_c, base_c
    p = {}
    # up1: Conv(4C -> 2C), BN(2C).  Conv bias is zero-init and mathematically
    # cancelled by BN mean-subtraction -> folded away (not passed to kernels).
    p["w1"] = conv_w(ks[0], c4, c2); p["b1"] = jnp.zeros((c2,), jnp.float32)
    p["g1"] = 1.0 + 0.02 * jax.random.normal(ks[1], (c2,), jnp.float32)
    p["be1"] = jnp.zeros((c2,), jnp.float32)
    # conv1: Conv(2C -> 2C), BN(2C)
    p["w2"] = conv_w(ks[2], c2, c2); p["b2"] = jnp.zeros((c2,), jnp.float32)
    p["g2"] = 1.0 + 0.02 * jax.random.normal(ks[3], (c2,), jnp.float32)
    p["be2"] = jnp.zeros((c2,), jnp.float32)
    # up2: Conv(2C -> C), BN(C)
    p["w3"] = conv_w(ks[4], c2, c1); p["b3"] = jnp.zeros((c1,), jnp.float32)
    p["g3"] = 1.0 + 0.02 * jax.random.normal(ks[5], (c1,), jnp.float32)
    p["be3"] = jnp.zeros((c1,), jnp.float32)
    # conv2: Conv(C -> out_channels)  (bias kept, no BN)
    p["w4"] = conv_w(ks[6], c1, out_channels)
    p["b4"] = jnp.zeros((out_channels,), jnp.float32)
    return p


def decoder_forward(x_nchw, p):
    """Returns (result, [deconv1, deconv2]) all in NCHW, matching PyTorch."""
    x = jnp.transpose(x_nchw, (0, 2, 3, 1)).astype(jnp.float32)   # -> NHWC

    # up1: upsample -> pad -> conv -> BN -> ReLU
    u1 = upsample2x_align_corners(x)
    deconv1 = stage_conv_bn_relu(u1, p["w1"], p["g1"], p["be1"])

    # conv1: pad -> conv -> BN -> ReLU
    c1 = stage_conv_bn_relu(deconv1, p["w2"], p["g2"], p["be2"])

    # up2: upsample -> pad -> conv -> BN -> ReLU
    u2 = upsample2x_align_corners(c1)
    deconv2 = stage_conv_bn_relu(u2, p["w3"], p["g3"], p["be3"])

    # conv2: pad -> conv ; then (tanh + 1)/2
    result = stage_conv_tanh(deconv2, p["w4"], p["b4"])

    to_nchw = lambda t: jnp.transpose(t, (0, 3, 1, 2))
    return to_nchw(result), [to_nchw(deconv1), to_nchw(deconv2)]


# --------------------------------- main --------------------------------------

if __name__ == "__main__":
    base_c = 4                      # base_channel_nums
    N, H, W = 2, 16, 16
    cin = 4 * base_c                # decoder input channels = 4 * base

    key = jax.random.PRNGKey(0)
    kx, kp = jax.random.split(key)
    x = jax.random.normal(kx, (N, cin, H, W), jnp.float32)   # NCHW input
    params = init_decoder_params(kp, base_c, out_channels=3)

    fwd = jax.jit(decoder_forward)
    result, (deconv1, deconv2) = fwd(x, params)
    jax.block_until_ready(result)
    jax.block_until_ready(deconv1)
    jax.block_until_ready(deconv2)

    assert result.shape == (N, 3, 4 * H, 4 * W), result.shape
    assert deconv1.shape == (N, 2 * base_c, 2 * H, 2 * W), deconv1.shape
    assert deconv2.shape == (N, base_c, 4 * H, 4 * W), deconv2.shape
    assert bool(jnp.all(jnp.isfinite(result)))
    assert bool(jnp.all((result >= 0.0) & (result <= 1.0)))
    assert bool(jnp.all(deconv1 >= 0.0)) and bool(jnp.all(deconv2 >= 0.0))

    print("KERNEL_OK")
</pallas_src>

<mosaic_0001>
module attributes {stable_mosaic.version = 11 : i64} {
  func.func @conv_stats_kernel(%arg0: i32, %arg1: memref<512x144xbf16, #tpu.memory_space<vmem>>, %arg2: memref<144x128xbf16, #tpu.memory_space<vmem>>, %arg3: memref<512x128xf32, #tpu.memory_space<vmem>>, %arg4: memref<1x128xf32, #tpu.memory_space<vmem>>, %arg5: memref<1x128xf32, #tpu.memory_space<vmem>>) attributes {dimension_semantics = [#tpu.dimension_semantics<arbitrary>], iteration_bounds = array<i64: 4>, scalar_prefetch = 0 : i64, scratch_operands = 0 : i64, tpu.core_type = #tpu.core_type<tc>, window_params = [{transform_indices = @transform_0, window_bounds = array<i64: 512, 144>}, {pipeline_mode = #tpu.pipeline_mode<synchronous>, transform_indices = @transform_1, window_bounds = array<i64: 144, 128>}, {transform_indices = @transform_2, window_bounds = array<i64: 512, 128>}, {pipeline_mode = #tpu.pipeline_mode<synchronous>, transform_indices = @transform_3, window_bounds = array<i64: 1, 128>}, {pipeline_mode = #tpu.pipeline_mode<synchronous>, transform_indices = @transform_4, window_bounds = array<i64: 1, 128>}]} {
    %c0 = arith.constant 0 : index
    %c0_0 = arith.constant 0 : index
    %0 = vector.load %arg1[%c0, %c0_0] : memref<512x144xbf16, #tpu.memory_space<vmem>>, vector<512x144xbf16>
    %c0_1 = arith.constant 0 : index
    %c0_2 = arith.constant 0 : index
    %1 = vector.load %arg2[%c0_1, %c0_2] : memref<144x128xbf16, #tpu.memory_space<vmem>>, vector<144x128xbf16>
    %cst = arith.constant dense<0.000000e+00> : vector<512x128xf32>
    %2 = tpu.matmul %0, %1, %cst {dimension_numbers = #tpu.dot_dimension_numbers<[1], [0], [0], [1], [0, 0, 1, 1], [], []>} : vector<512x144xbf16>, vector<144x128xbf16>, vector<512x128xf32> -> vector<512x128xf32>
    %c0_3 = arith.constant 0 : index
    %c0_4 = arith.constant 0 : index
    %3 = vector.load %arg3[%c0_3, %c0_4] : memref<512x128xf32, #tpu.memory_space<vmem>>, vector<512x128xf32>
    tpu.vector_store %arg3[%c0_3, %c0_4], %2 {strides = array<i32>} : memref<512x128xf32, #tpu.memory_space<vmem>>, vector<512x128xf32>,
    %c0_i32 = arith.constant 0 : i32
    %4 = arith.cmpi eq, %arg0, %c0_i32 : i32
    %5 = arith.extui %4 : i1 to i32
    %c0_i32_5 = arith.constant 0 : i32
    %6 = arith.cmpi ne, %5, %c0_i32_5 : i32
    scf.if %6 {
      %cst_16 = arith.constant 0.000000e+00 : f32
      %18 = vector.broadcast %cst_16 : f32 to vector<1x128xf32>
      %c0_17 = arith.constant 0 : index
      %c0_18 = arith.constant 0 : index
      %19 = vector.load %arg4[%c0_17, %c0_18] : memref<1x128xf32, #tpu.memory_space<vmem>>, vector<1x128xf32>
      tpu.vector_store %arg4[%c0_17, %c0_18], %18 {strides = array<i32>} : memref<1x128xf32, #tpu.memory_space<vmem>>, vector<1x128xf32>,
      %cst_19 = arith.constant 0.000000e+00 : f32
      %20 = vector.broadcast %cst_19 : f32 to vector<1x128xf32>
      %c0_20 = arith.constant 0 : index
      %c0_21 = arith.constant 0 : index
      %21 = vector.load %arg5[%c0_20, %c0_21] : memref<1x128xf32, #tpu.memory_space<vmem>>, vector<1x128xf32>
      tpu.vector_store %arg5[%c0_20, %c0_21], %20 {strides = array<i32>} : memref<1x128xf32, #tpu.memory_space<vmem>>, vector<1x128xf32>,
    } else {
    }
    %c0_6 = arith.constant 0 : index
    %c0_7 = arith.constant 0 : index
    %7 = vector.load %arg4[%c0_6, %c0_7] : memref<1x128xf32, #tpu.memory_space<vmem>>, vector<1x128xf32>
    %cst_8 = arith.constant dense<0.000000e+00> : vector<128xf32>
    %8 = vector.multi_reduction <add>, %2, %cst_8 [0] : vector<512x128xf32> to vector<128xf32>
    %9 = vector.shape_cast %8 : vector<128xf32> to vector<1x128xf32>
    %10 = arith.addf %7, %9 : vector<1x128xf32>
    %c0_9 = arith.constant 0 : index
    %c0_10 = arith.constant 0 : index
    %11 = vector.load %arg4[%c0_9, %c0_10] : memref<1x128xf32, #tpu.memory_space<vmem>>, vector<1x128xf32>
    tpu.vector_store %arg4[%c0_9, %c0_10], %10 {strides = array<i32>} : memref<1x128xf32, #tpu.memory_space<vmem>>, vector<1x128xf32>,
    %c0_11 = arith.constant 0 : index
    %c0_12 = arith.constant 0 : index
    %12 = vector.load %arg5[%c0_11, %c0_12] : memref<1x128xf32, #tpu.memory_space<vmem>>, vector<1x128xf32>
    %13 = arith.mulf %2, %2 : vector<512x128xf32>
    %cst_13 = arith.constant dense<0.000000e+00> : vector<128xf32>
    %14 = vector.multi_reduction <add>, %13, %cst_13 [0] : vector<512x128xf32> to vector<128xf32>
    %15 = vector.shape_cast %14 : vector<128xf32> to vector<1x128xf32>
    %16 = arith.addf %12, %15 : vector<1x128xf32>
    %c0_14 = arith.constant 0 : index
    %c0_15 = arith.constant 0 : index
    %17 = vector.load %arg5[%c0_14, %c0_15] : memref<1x128xf32, #tpu.memory_space<vmem>>, vector<1x128xf32>
    tpu.vector_store %arg5[%c0_14, %c0_15], %16 {strides = array<i32>} : memref<1x128xf32, #tpu.memory_space<vmem>>, vector<1x128xf32>,
    return
  }
  func.func @transform_0(%arg0: i32) -> (i32, i32) {
    %c0_i32 = arith.constant 0 : i32
    %c0_i32_0 = arith.constant 0 : i32
    return %arg0, %c0_i32 : i32, i32
  }
  func.func @transform_1(%arg0: i32) -> (i32, i32) {
    %c0_i32 = arith.constant 0 : i32
    %c0_i32_0 = arith.constant 0 : i32
    %c0_i32_1 = arith.constant 0 : i32
    return %c0_i32, %c0_i32_0 : i32, i32
  }
  func.func @transform_2(%arg0: i32) -> (i32, i32) {
    %c0_i32 = arith.constant 0 : i32
    %c0_i32_0 = arith.constant 0 : i32
    return %arg0, %c0_i32 : i32, i32
  }
  func.func @transform_3(%arg0: i32) -> (i32, i32) {
    %c0_i32 = arith.constant 0 : i32
    %c0_i32_0 = arith.constant 0 : i32
    %c0_i32_1 = arith.constant 0 : i32
    return %c0_i32, %c0_i32_0 : i32, i32
  }
  func.func @transform_4(%arg0: i32) -> (i32, i32) {
    %c0_i32 = arith.constant 0 : i32
    %c0_i32_0 = arith.constant 0 : i32
    %c0_i32_1 = arith.constant 0 : i32
    return %c0_i32, %c0_i32_0 : i32, i32
  }
}

module attributes {stable_mosaic.version = 11 : i64} {
  func.func @bn_relu_kernel(%arg0: i32, %arg1: memref<512x128xf32, #tpu.memory_space<vmem>>, %arg2: memref<1x128xf32, #tpu.memory_space<vmem>>, %arg3: memref<1x128xf32, #tpu.memory_space<vmem>>, %arg4: memref<512x128xf32, #tpu.memory_space<vmem>>) attributes {dimension_semantics = [#tpu.dimension_semantics<parallel>], iteration_bounds = array<i64: 4>, scalar_prefetch = 0 : i64, scratch_operands = 0 : i64, tpu.core_type = #tpu.core_type<tc>, window_params = [{transform_indices = @transform_0, window_bounds = array<i64: 512, 128>}, {pipeline_mode = #tpu.pipeline_mode<synchronous>, transform_indices = @transform_1, window_bounds = array<i64: 1, 128>}, {pipeline_mode = #tpu.pipeline_mode<synchronous>, transform_indices = @transform_2, window_bounds = array<i64: 1, 128>}, {transform_indices = @transform_3, window_bounds = array<i64: 512, 128>}]} {
    %c0 = arith.constant 0 : index
    %c0_0 = arith.constant 0 : index
    %0 = vector.load %arg1[%c0, %c0_0] : memref<512x128xf32, #tpu.memory_space<vmem>>, vector<512x128xf32>
    %c0_1 = arith.constant 0 : index
    %c0_2 = arith.constant 0 : index
    %1 = vector.load %arg2[%c0_1, %c0_2] : memref<1x128xf32, #tpu.memory_space<vmem>>, vector<1x128xf32>
    %2 = vector.broadcast %1 : vector<1x128xf32> to vector<512x128xf32>
    %3 = arith.mulf %0, %2 : vector<512x128xf32>
    %c0_3 = arith.constant 0 : index
    %c0_4 = arith.constant 0 : index
    %4 = vector.load %arg3[%c0_3, %c0_4] : memref<1x128xf32, #tpu.memory_space<vmem>>, vector<1x128xf32>
    %5 = vector.broadcast %4 : vector<1x128xf32> to vector<512x128xf32>
    %6 = arith.addf %3, %5 : vector<512x128xf32>
    %cst = arith.constant 0.000000e+00 : f32
    %7 = vector.broadcast %cst : f32 to vector<512x128xf32>
    %8 = arith.maximumf %6, %7 : vector<512x128xf32>
    %c0_5 = arith.constant 0 : index
    %c0_6 = arith.constant 0 : index
    %9 = vector.load %arg4[%c0_5, %c0_6] : memref<512x128xf32, #tpu.memory_space<vmem>>, vector<512x128xf32>
    tpu.vector_store %arg4[%c0_5, %c0_6], %8 {strides = array<i32>} : memref<512x128xf32, #tpu.memory_space<vmem>>, vector<512x128xf32>,
    return
  }
  func.func @transform_0(%arg0: i32) -> (i32, i32) {
    %c0_i32 = arith.constant 0 : i32
    %c0_i32_0 = arith.constant 0 : i32
    return %arg0, %c0_i32 : i32, i32
  }
  func.func @transform_1(%arg0: i32) -> (i32, i32) {
    %c0_i32 = arith.constant 0 : i32
    %c0_i32_0 = arith.constant 0 : i32
    %c0_i32_1 = arith.constant 0 : i32
    return %c0_i32, %c0_i32_0 : i32, i32
  }
  func.func @transform_2(%arg0: i32) -> (i32, i32) {
    %c0_i32 = arith.constant 0 : i32
    %c0_i32_0 = arith.constant 0 : i32
    %c0_i32_1 = arith.constant 0 : i32
    return %c0_i32, %c0_i32_0 : i32, i32
  }
  func.func @transform_3(%arg0: i32) -> (i32, i32) {
    %c0_i32 = arith.constant 0 : i32
    %c0_i32_0 = arith.constant 0 : i32
    return %arg0, %c0_i32 : i32, i32
  }
}

module attributes {stable_mosaic.version = 11 : i64} {
  func.func @conv_stats_kernel(%arg0: i32, %arg1: memref<512x72xbf16, #tpu.memory_space<vmem>>, %arg2: memref<72x128xbf16, #tpu.memory_space<vmem>>, %arg3: memref<512x128xf32, #tpu.memory_space<vmem>>, %arg4: memref<1x128xf32, #tpu.memory_space<vmem>>, %arg5: memref<1x128xf32, #tpu.memory_space<vmem>>) attributes {dimension_semantics = [#tpu.dimension_semantics<arbitrary>], iteration_bounds = array<i64: 4>, scalar_prefetch = 0 : i64, scratch_operands = 0 : i64, tpu.core_type = #tpu.core_type<tc>, window_params = [{transform_indices = @transform_0, window_bounds = array<i64: 512, 72>}, {pipeline_mode = #tpu.pipeline_mode<synchronous>, transform_indices = @transform_1, window_bounds = array<i64: 72, 128>}, {transform_indices = @transform_2, window_bounds = array<i64: 512, 128>}, {pipeline_mode = #tpu.pipeline_mode<synchronous>, transform_indices = @transform_3, window_bounds = array<i64: 1, 128>}, {pipeline_mode = #tpu.pipeline_mode<synchronous>, transform_indices = @transform_4, window_bounds = array<i64: 1, 128>}]} {
    %c0 = arith.constant 0 : index
    %c0_0 = arith.constant 0 : index
    %0 = vector.load %arg1[%c0, %c0_0] : memref<512x72xbf16, #tpu.memory_space<vmem>>, vector<512x72xbf16>
    %c0_1 = arith.constant 0 : index
    %c0_2 = arith.constant 0 : index
    %1 = vector.load %arg2[%c0_1, %c0_2] : memref<72x128xbf16, #tpu.memory_space<vmem>>, vector<72x128xbf16>
    %cst = arith.constant dense<0.000000e+00> : vector<512x128xf32>
    %2 = tpu.matmul %0, %1, %cst {dimension_numbers = #tpu.dot_dimension_numbers<[1], [0], [0], [1], [0, 0, 1, 1], [], []>} : vector<512x72xbf16>, vector<72x128xbf16>, vector<512x128xf32> -> vector<512x128xf32>
    %c0_3 = arith.constant 0 : index
    %c0_4 = arith.constant 0 : index
    %3 = vector.load %arg3[%c0_3, %c0_4] : memref<512x128xf32, #tpu.memory_space<vmem>>, vector<512x128xf32>
    tpu.vector_store %arg3[%c0_3, %c0_4], %2 {strides = array<i32>} : memref<512x128xf32, #tpu.memory_space<vmem>>, vector<512x128xf32>,
    %c0_i32 = arith.constant 0 : i32
    %4 = arith.cmpi eq, %arg0, %c0_i32 : i32
    %5 = arith.extui %4 : i1 to i32
    %c0_i32_5 = arith.constant 0 : i32
    %6 = arith.cmpi ne, %5, %c0_i32_5 : i32
    scf.if %6 {
      %cst_16 = arith.constant 0.000000e+00 : f32
      %18 = vector.broadcast %cst_16 : f32 to vector<1x128xf32>
      %c0_17 = arith.constant 0 : index
      %c0_18 = arith.constant 0 : index
      %19 = vector.load %arg4[%c0_17, %c0_18] : memref<1x128xf32, #tpu.memory_space<vmem>>, vector<1x128xf32>
      tpu.vector_store %arg4[%c0_17, %c0_18], %18 {strides = array<i32>} : memref<1x128xf32, #tpu.memory_space<vmem>>, vector<1x128xf32>,
      %cst_19 = arith.constant 0.000000e+00 : f32
      %20 = vector.broadcast %cst_19 : f32 to vector<1x128xf32>
      %c0_20 = arith.constant 0 : index
      %c0_21 = arith.constant 0 : index
      %21 = vector.load %arg5[%c0_20, %c0_21] : memref<1x128xf32, #tpu.memory_space<vmem>>, vector<1x128xf32>
      tpu.vector_store %arg5[%c0_20, %c0_21], %20 {strides = array<i32>} : memref<1x128xf32, #tpu.memory_space<vmem>>, vector<1x128xf32>,
    } else {
    }
    %c0_6 = arith.constant 0 : index
    %c0_7 = arith.constant 0 : index
    %7 = vector.load %arg4[%c0_6, %c0_7] : memref<1x128xf32, #tpu.memory_space<vmem>>, vector<1x128xf32>
    %cst_8 = arith.constant dense<0.000000e+00> : vector<128xf32>
    %8 = vector.multi_reduction <add>, %2, %cst_8 [0] : vector<512x128xf32> to vector<128xf32>
    %9 = vector.shape_cast %8 : vector<128xf32> to vector<1x128xf32>
    %10 = arith.addf %7, %9 : vector<1x128xf32>
    %c0_9 = arith.constant 0 : index
    %c0_10 = arith.constant 0 : index
    %11 = vector.load %arg4[%c0_9, %c0_10] : memref<1x128xf32, #tpu.memory_space<vmem>>, vector<1x128xf32>
    tpu.vector_store %arg4[%c0_9, %c0_10], %10 {strides = array<i32>} : memref<1x128xf32, #tpu.memory_space<vmem>>, vector<1x128xf32>,
    %c0_11 = arith.constant 0 : index
    %c0_12 = arith.constant 0 : index
    %12 = vector.load %arg5[%c0_11, %c0_12] : memref<1x128xf32, #tpu.memory_space<vmem>>, vector<1x128xf32>
    %13 = arith.mulf %2, %2 : vector<512x128xf32>
    %cst_13 = arith.constant dense<0.000000e+00> : vector<128xf32>
    %14 = vector.multi_reduction <add>, %13, %cst_13 [0] : vector<512x128xf32> to vector<128xf32>
    %15 = vector.shape_cast %14 : vector<128xf32> to vector<1x128xf32>
    %16 = arith.addf %12, %15 : vector<1x128xf32>
    %c0_14 = arith.constant 0 : index
    %c0_15 = arith.constant 0 : index
    %17 = vector.load %arg5[%c0_14, %c0_15] : memref<1x128xf32, #tpu.memory_space<vmem>>, vector<1x128xf32>
    tpu.vector_store %arg5[%c0_14, %c0_15], %16 {strides = array<i32>} : memref<1x128xf32, #tpu.memory_space<vmem>>, vector<1x128xf32>,
    return
  }
  func.func @transform_0(%arg0: i32) -> (i32, i32) {
    %c0_i32 = arith.constant 0 : i32
    %c0_i32_0 = arith.constant 0 : i32
    return %arg0, %c0_i32 : i32, i32
  }
  func.func @transform_1(%arg0: i32) -> (i32, i32) {
    %c0_i32 = arith.constant 0 : i32
    %c0_i32_0 = arith.constant 0 : i32
    %c0_i32_1 = arith.constant 0 : i32
    return %c0_i32, %c0_i32_0 : i32, i32
  }
  func.func @transform_2(%arg0: i32) -> (i32, i32) {
    %c0_i32 = arith.constant 0 : i32
    %c0_i32_0 = arith.constant 0 : i32
    return %arg0, %c0_i32 : i32, i32
  }
  func.func @transform_3(%arg0: i32) -> (i32, i32) {
    %c0_i32 = arith.constant 0 : i32
    %c0_i32_0 = arith.constant 0 : i32
    %c0_i32_1 = arith.constant 0 : i32
    return %c0_i32, %c0_i32_0 : i32, i32
  }
  func.func @transform_4(%arg0: i32) -> (i32, i32) {
    %c0_i32 = arith.constant 0 : i32
    %c0_i32_0 = arith.constant 0 : i32
    %c0_i32_1 = arith.constant 0 : i32
    return %c0_i32, %c0_i32_0 : i32, i32
  }
}

module attributes {stable_mosaic.version = 11 : i64} {
  func.func @conv_stats_kernel(%arg0: i32, %arg1: memref<512x72xbf16, #tpu.memory_space<vmem>>, %arg2: memref<72x128xbf16, #tpu.memory_space<vmem>>, %arg3: memref<512x128xf32, #tpu.memory_space<vmem>>, %arg4: memref<1x128xf32, #tpu.memory_space<vmem>>, %arg5: memref<1x128xf32, #tpu.memory_space<vmem>>) attributes {dimension_semantics = [#tpu.dimension_semantics<arbitrary>], iteration_bounds = array<i64: 16>, scalar_prefetch = 0 : i64, scratch_operands = 0 : i64, tpu.core_type = #tpu.core_type<tc>, window_params = [{transform_indices = @transform_0, window_bounds = array<i64: 512, 72>}, {pipeline_mode = #tpu.pipeline_mode<synchronous>, transform_indices = @transform_1, window_bounds = array<i64: 72, 128>}, {transform_indices = @transform_2, window_bounds = array<i64: 512, 128>}, {pipeline_mode = #tpu.pipeline_mode<synchronous>, transform_indices = @transform_3, window_bounds = array<i64: 1, 128>}, {pipeline_mode = #tpu.pipeline_mode<synchronous>, transform_indices = @transform_4, window_bounds = array<i64: 1, 128>}]} {
    %c0 = arith.constant 0 : index
    %c0_0 = arith.constant 0 : index
    %0 = vector.load %arg1[%c0, %c0_0] : memref<512x72xbf16, #tpu.memory_space<vmem>>, vector<512x72xbf16>
    %c0_1 = arith.constant 0 : index
    %c0_2 = arith.constant 0 : index
    %1 = vector.load %arg2[%c0_1, %c0_2] : memref<72x128xbf16, #tpu.memory_space<vmem>>, vector<72x128xbf16>
    %cst = arith.constant dense<0.000000e+00> : vector<512x128xf32>
    %2 = tpu.matmul %0, %1, %cst {dimension_numbers = #tpu.dot_dimension_numbers<[1], [0], [0], [1], [0, 0, 1, 1], [], []>} : vector<512x72xbf16>, vector<72x128xbf16>, vector<512x128xf32> -> vector<512x128xf32>
    %c0_3 = arith.constant 0 : index
    %c0_4 = arith.constant 0 : index
    %3 = vector.load %arg3[%c0_3, %c0_4] : memref<512x128xf32, #tpu.memory_space<vmem>>, vector<512x128xf32>
    tpu.vector_store %arg3[%c0_3, %c0_4], %2 {strides = array<i32>} : memref<512x128xf32, #tpu.memory_space<vmem>>, vector<512x128xf32>,
    %c0_i32 = arith.constant 0 : i32
    %4 = arith.cmpi eq, %arg0, %c0_i32 : i32
    %5 = arith.extui %4 : i1 to i32
    %c0_i32_5 = arith.constant 0 : i32
    %6 = arith.cmpi ne, %5, %c0_i32_5 : i32
    scf.if %6 {
      %cst_16 = arith.constant 0.000000e+00 : f32
      %18 = vector.broadcast %cst_16 : f32 to vector<1x128xf32>
      %c0_17 = arith.constant 0 : index
      %c0_18 = arith.constant 0 : index
      %19 = vector.load %arg4[%c0_17, %c0_18] : memref<1x128xf32, #tpu.memory_space<vmem>>, vector<1x128xf32>
      tpu.vector_store %arg4[%c0_17, %c0_18], %18 {strides = array<i32>} : memref<1x128xf32, #tpu.memory_space<vmem>>, vector<1x128xf32>,
      %cst_19 = arith.constant 0.000000e+00 : f32
      %20 = vector.broadcast %cst_19 : f32 to vector<1x128xf32>
      %c0_20 = arith.constant 0 : index
      %c0_21 = arith.constant 0 : index
      %21 = vector.load %arg5[%c0_20, %c0_21] : memref<1x128xf32, #tpu.memory_space<vmem>>, vector<1x128xf32>
      tpu.vector_store %arg5[%c0_20, %c0_21], %20 {strides = array<i32>} : memref<1x128xf32, #tpu.memory_space<vmem>>, vector<1x128xf32>,
    } else {
    }
    %c0_6 = arith.constant 0 : index
    %c0_7 = arith.constant 0 : index
    %7 = vector.load %arg4[%c0_6, %c0_7] : memref<1x128xf32, #tpu.memory_space<vmem>>, vector<1x128xf32>
    %cst_8 = arith.constant dense<0.000000e+00> : vector<128xf32>
    %8 = vector.multi_reduction <add>, %2, %cst_8 [0] : vector<512x128xf32> to vector<128xf32>
    %9 = vector.shape_cast %8 : vector<128xf32> to vector<1x128xf32>
    %10 = arith.addf %7, %9 : vector<1x128xf32>
    %c0_9 = arith.constant 0 : index
    %c0_10 = arith.constant 0 : index
    %11 = vector.load %arg4[%c0_9, %c0_10] : memref<1x128xf32, #tpu.memory_space<vmem>>, vector<1x128xf32>
    tpu.vector_store %arg4[%c0_9, %c0_10], %10 {strides = array<i32>} : memref<1x128xf32, #tpu.memory_space<vmem>>, vector<1x128xf32>,
    %c0_11 = arith.constant 0 : index
    %c0_12 = arith.constant 0 : index
    %12 = vector.load %arg5[%c0_11, %c0_12] : memref<1x128xf32, #tpu.memory_space<vmem>>, vector<1x128xf32>
    %13 = arith.mulf %2, %2 : vector<512x128xf32>
    %cst_13 = arith.constant dense<0.000000e+00> : vector<128xf32>
    %14 = vector.multi_reduction <add>, %13, %cst_13 [0] : vector<512x128xf32> to vector<128xf32>
    %15 = vector.shape_cast %14 : vector<128xf32> to vector<1x128xf32>
    %16 = arith.addf %12, %15 : vector<1x128xf32>
    %c0_14 = arith.constant 0 : index
    %c0_15 = arith.constant 0 : index
    %17 = vector.load %arg5[%c0_14, %c0_15] : memref<1x128xf32, #tpu.memory_space<vmem>>, vector<1x128xf32>
    tpu.vector_store %arg5[%c0_14, %c0_15], %16 {strides = array<i32>} : memref<1x128xf32, #tpu.memory_space<vmem>>, vector<1x128xf32>,
    return
  }
  func.func @transform_0(%arg0: i32) -> (i32, i32) {
    %c0_i32 = arith.constant 0 : i32
    %c0_i32_0 = arith.constant 0 : i32
    return %arg0, %c0_i32 : i32, i32
  }
  func.func @transform_1(%arg0: i32) -> (i32, i32) {
    %c0_i32 = arith.constant 0 : i32
    %c0_i32_0 = arith.constant 0 : i32
    %c0_i32_1 = arith.constant 0 : i32
    return %c0_i32, %c0_i32_0 : i32, i32
  }
  func.func @transform_2(%arg0: i32) -> (i32, i32) {
    %c0_i32 = arith.constant 0 : i32
    %c0_i32_0 = arith.constant 0 : i32
    return %arg0, %c0_i32 : i32, i32
  }
  func.func @transform_3(%arg0: i32) -> (i32, i32) {
    %c0_i32 = arith.constant 0 : i32
    %c0_i32_0 = arith.constant 0 : i32
    %c0_i32_1 = arith.constant 0 : i32
    return %c0_i32, %c0_i32_0 : i32, i32
  }
  func.func @transform_4(%arg0: i32) -> (i32, i32) {
    %c0_i32 = arith.constant 0 : i32
    %c0_i32_0 = arith.constant 0 : i32
    %c0_i32_1 = arith.constant 0 : i32
    return %c0_i32, %c0_i32_0 : i32, i32
  }
}

module attributes {stable_mosaic.version = 11 : i64} {
  func.func @bn_relu_kernel(%arg0: i32, %arg1: memref<512x128xf32, #tpu.memory_space<vmem>>, %arg2: memref<1x128xf32, #tpu.memory_space<vmem>>, %arg3: memref<1x128xf32, #tpu.memory_space<vmem>>, %arg4: memref<512x128xf32, #tpu.memory_space<vmem>>) attributes {dimension_semantics = [#tpu.dimension_semantics<parallel>], iteration_bounds = array<i64: 16>, scalar_prefetch = 0 : i64, scratch_operands = 0 : i64, tpu.core_type = #tpu.core_type<tc>, window_params = [{transform_indices = @transform_0, window_bounds = array<i64: 512, 128>}, {pipeline_mode = #tpu.pipeline_mode<synchronous>, transform_indices = @transform_1, window_bounds = array<i64: 1, 128>}, {pipeline_mode = #tpu.pipeline_mode<synchronous>, transform_indices = @transform_2, window_bounds = array<i64: 1, 128>}, {transform_indices = @transform_3, window_bounds = array<i64: 512, 128>}]} {
    %c0 = arith.constant 0 : index
    %c0_0 = arith.constant 0 : index
    %0 = vector.load %arg1[%c0, %c0_0] : memref<512x128xf32, #tpu.memory_space<vmem>>, vector<512x128xf32>
    %c0_1 = arith.constant 0 : index
    %c0_2 = arith.constant 0 : index
    %1 = vector.load %arg2[%c0_1, %c0_2] : memref<1x128xf32, #tpu.memory_space<vmem>>, vector<1x128xf32>
    %2 = vector.broadcast %1 : vector<1x128xf32> to vector<512x128xf32>
    %3 = arith.mulf %0, %2 : vector<512x128xf32>
    %c0_3 = arith.constant 0 : index
    %c0_4 = arith.constant 0 : index
    %4 = vector.load %arg3[%c0_3, %c0_4] : memref<1x128xf32, #tpu.memory_space<vmem>>, vector<1x128xf32>
    %5 = vector.broadcast %4 : vector<1x128xf32> to vector<512x128xf32>
    %6 = arith.addf %3, %5 : vector<512x128xf32>
    %cst = arith.constant 0.000000e+00 : f32
    %7 = vector.broadcast %cst : f32 to vector<512x128xf32>
    %8 = arith.maximumf %6, %7 : vector<512x128xf32>
    %c0_5 = arith.constant 0 : index
    %c0_6 = arith.constant 0 : index
    %9 = vector.load %arg4[%c0_5, %c0_6] : memref<512x128xf32, #tpu.memory_space<vmem>>, vector<512x128xf32>
    tpu.vector_store %arg4[%c0_5, %c0_6], %8 {strides = array<i32>} : memref<512x128xf32, #tpu.memory_space<vmem>>, vector<512x128xf32>,
    return
  }
  func.func @transform_0(%arg0: i32) -> (i32, i32) {
    %c0_i32 = arith.constant 0 : i32
    %c0_i32_0 = arith.constant 0 : i32
    return %arg0, %c0_i32 : i32, i32
  }
  func.func @transform_1(%arg0: i32) -> (i32, i32) {
    %c0_i32 = arith.constant 0 : i32
    %c0_i32_0 = arith.constant 0 : i32
    %c0_i32_1 = arith.constant 0 : i32
    return %c0_i32, %c0_i32_0 : i32, i32
  }
  func.func @transform_2(%arg0: i32) -> (i32, i32) {
    %c0_i32 = arith.constant 0 : i32
    %c0_i32_0 = arith.constant 0 : i32
    %c0_i32_1 = arith.constant 0 : i32
    return %c0_i32, %c0_i32_0 : i32, i32
  }
  func.func @transform_3(%arg0: i32) -> (i32, i32) {
    %c0_i32 = arith.constant 0 : i32
    %c0_i32_0 = arith.constant 0 : i32
    return %arg0, %c0_i32 : i32, i32
  }
}

module attributes {stable_mosaic.version = 11 : i64} {
  func.func @conv_tanh_kernel(%arg0: i32, %arg1: memref<512x36xbf16, #tpu.memory_space<vmem>>, %arg2: memref<36x128xbf16, #tpu.memory_space<vmem>>, %arg3: memref<1x128xf32, #tpu.memory_space<vmem>>, %arg4: memref<512x128xf32, #tpu.memory_space<vmem>>) attributes {dimension_semantics = [#tpu.dimension_semantics<parallel>], iteration_bounds = array<i64: 16>, scalar_prefetch = 0 : i64, scratch_operands = 0 : i64, tpu.core_type = #tpu.core_type<tc>, window_params = [{transform_indices = @transform_0, window_bounds = array<i64: 512, 36>}, {pipeline_mode = #tpu.pipeline_mode<synchronous>, transform_indices = @transform_1, window_bounds = array<i64: 36, 128>}, {pipeline_mode = #tpu.pipeline_mode<synchronous>, transform_indices = @transform_2, window_bounds = array<i64: 1, 128>}, {transform_indices = @transform_3, window_bounds = array<i64: 512, 128>}]} {
    %c0 = arith.constant 0 : index
    %c0_0 = arith.constant 0 : index
    %0 = vector.load %arg1[%c0, %c0_0] : memref<512x36xbf16, #tpu.memory_space<vmem>>, vector<512x36xbf16>
    %c0_1 = arith.constant 0 : index
    %c0_2 = arith.constant 0 : index
    %1 = vector.load %arg2[%c0_1, %c0_2] : memref<36x128xbf16, #tpu.memory_space<vmem>>, vector<36x128xbf16>
    %cst = arith.constant dense<0.000000e+00> : vector<512x128xf32>
    %2 = tpu.matmul %0, %1, %cst {dimension_numbers = #tpu.dot_dimension_numbers<[1], [0], [0], [1], [0, 0, 1, 1], [], []>} : vector<512x36xbf16>, vector<36x128xbf16>, vector<512x128xf32> -> vector<512x128xf32>
    %c0_3 = arith.constant 0 : index
    %c0_4 = arith.constant 0 : index
    %3 = vector.load %arg3[%c0_3, %c0_4] : memref<1x128xf32, #tpu.memory_space<vmem>>, vector<1x128xf32>
    %4 = vector.broadcast %3 : vector<1x128xf32> to vector<512x128xf32>
    %5 = arith.addf %2, %4 : vector<512x128xf32>
    %6 = math.tanh %5 : vector<512x128xf32>
    %cst_5 = arith.constant 1.000000e+00 : f32
    %7 = vector.broadcast %cst_5 : f32 to vector<512x128xf32>
    %8 = arith.addf %6, %7 : vector<512x128xf32>
    %cst_6 = arith.constant 5.000000e-01 : f32
    %9 = vector.broadcast %cst_6 : f32 to vector<512x128xf32>
    %10 = arith.mulf %8, %9 : vector<512x128xf32>
    %c0_7 = arith.constant 0 : index
    %c0_8 = arith.constant 0 : index
    %11 = vector.load %arg4[%c0_7, %c0_8] : memref<512x128xf32, #tpu.memory_space<vmem>>, vector<512x128xf32>
    tpu.vector_store %arg4[%c0_7, %c0_8], %10 {strides = array<i32>} : memref<512x128xf32, #tpu.memory_space<vmem>>, vector<512x128xf32>,
    return
  }
  func.func @transform_0(%arg0: i32) -> (i32, i32) {
    %c0_i32 = arith.constant 0 : i32
    %c0_i32_0 = arith.constant 0 : i32
    return %arg0, %c0_i32 : i32, i32
  }
  func.func @transform_1(%arg0: i32) -> (i32, i32) {
    %c0_i32 = arith.constant 0 : i32
    %c0_i32_0 = arith.constant 0 : i32
    %c0_i32_1 = arith.constant 0 : i32
    return %c0_i32, %c0_i32_0 : i32, i32
  }
  func.func @transform_2(%arg0: i32) -> (i32, i32) {
    %c0_i32 = arith.constant 0 : i32
    %c0_i32_0 = arith.constant 0 : i32
    %c0_i32_1 = arith.constant 0 : i32
    return %c0_i32, %c0_i32_0 : i32, i32
  }
  func.func @transform_3(%arg0: i32) -> (i32, i32) {
    %c0_i32 = arith.constant 0 : i32
    %c0_i32_0 = arith.constant 0 : i32
    return %arg0, %c0_i32 : i32, i32
  }
}

</mosaic_0001>

<bundles_post_ra>
// kernel: decoder_forward.7
= control target key start
LH: loop header
LB: loop body
LE: loop exit
PB: predicated region body
PF: predicated region fallthrough
CT: control target
= control target key end

     0   :  { %s1643_s15 = smov 0   ;;  %s2264_s0 = inlined_call_operand.vmem [shape: bf16[2048,144], index: 0, kind: input, shape index: {}]   ;;  %s2265_s1 = inlined_call_operand.vmem [shape: bf16[144,128], index: 1, kind: input, shape index: {}]   ;;  %s2266_s2 = inlined_call_operand.vmem [shape: f32[2048,128], index: 2, kind: output, shape index: {0}]   ;;  %s2267_s3 = inlined_call_operand.vmem [shape: f32[1,128], index: 3, kind: output, shape index: {1}]   ;;  %s2268_s4 = inlined_call_operand.vmem [shape: f32[1,128], index: 4, kind: output, shape index: {2}]  }
   0x1 LB: > { %s1356_s16 = sadd.s32 4294967295, %s1614_s15   ;;  %p1360_p0 = scmp.ge.s32.totalorder %s1614_s15, 1  ;;  %s1614_s15 = sphi %s1643_s15, %s15_s15  }
   0x2   : > { %p159_p1 = scmp.lt.s32.totalorder %s1614_s15, 5 }
   0x4   : > { %p160_p2 = pnand %p1360_p0, %p159_p1 }
   0x6   : > { %163 = sbr.rel (%p160_p2) target bundleno = 522 (0x20a), region = 28 }
   0xb   : > { %v1503_v0 = vld [vmem:[%s2265_s1 + $0x38] sm:$0xff]   ;;  %v1616_v1 = vmov 0   ;;  %s1361_s19 = sshll.u32 %s1356_s16, 6  ;;  %v1504_v2 = vld [vmem:[%s2265_s1 + $0x30] sm:$0xff]   ;;  %v1505_v3 = vld [vmem:[%s2265_s1 + $0x28] sm:$0xff]   ;;  %vm624_vm0 = vcmask 130048  }
   0xc   : > { %721 = vmatprep.subr.bf16.mxu0 %v1616_v1  ;;  %1475 = vmatprep.subr.bf16.mxu1 %v1616_v1  ;;  %p187_p3 = scmp.lt.s32.totalorder %s1361_s19, 255  ;;  %v1506_v4 = vld [vmem:[%s2265_s1 + $0x20] sm:$0xff]   ;;  %v1507_v7 = vld [vmem:[%s2265_s1 + $0x18] sm:$0xff]   ;;  %v1508_v8 = vld [vmem:[%s2265_s1 + $0x10] sm:$0xff]   ;;  %p1471_p4 = scmp.ne.s32.totalorder %s1356_s16, 0 }
   0xd   : > { %722 = vmatpush1.bf16.msra.mxu0 %v1503_v0  ;;  %1484 = vmatpush1.bf16.msra.mxu1 %v1503_v0  ;;  %v1509_v9 = vld [vmem:[%s2265_s1 + $0x8] sm:$0xff]   ;;  %v1510_v10 = vld [vmem:[%s2265_s1] sm:$0xff]  }
   0xe   : > { %723 = vmatprep.subr.bf16.mxu0 %v1616_v1  ;;  %1476 = vmatprep.subr.bf16.mxu1 %v1616_v1  ;;  %s2318_s19 = smov (!%p187_p3, %s1361_s19), 255  ;;  %v1511_v11 = vld [vmem:[%s2265_s1 + $0x40] sm:$0xff]  }
   0xf   : > { %s1474_s24 = sshll.u32 %s2318_s19, 3 }
  0x10   : > { %s1670_s27 = scalar_lea.vmem %s2264_s0, %s1474_s24  ;;  %s1791_s18 = scalar_lea.vmem %s2266_s2, %s1474_s24 }
  0x11   : > { %724 = vmatpush1.bf16.msra.mxu0 %v1504_v2  ;;  %1485 = vmatpush1.bf16.msra.mxu1 %v1504_v2  ;;  %v1514_v5 = vld [vmem:[%s1670_s27 + $0x4] ss:$8 sps:$4 sm:$0xff]   ;;  %v1512_v12 = vld [vmem:[%s1670_s27] ss:$8 sps:$4 sm:$0xff]   ;;  %v1518_v14 = vld [vmem:[%s1670_s27 + $0x14] ss:$8 sps:$4 sm:$0xff]  }
  0x12   : > { %725 = vmatprep.subr.bf16.mxu0 %v1616_v1  ;;  %1477 = vmatprep.subr.bf16.mxu1 %v1616_v1  ;;  %v1517_v6 = vld [vmem:[%s1670_s27 + $0x104] ss:$8 sps:$4 sm:$0xff]   ;;  %v1515_v13 = vld [vmem:[%s1670_s27 + $0x100] ss:$8 sps:$4 sm:$0xff]   ;;  %v1520_v15 = vld [vmem:[%s1670_s27 + $0x114] ss:$8 sps:$4 sm:$0xff]  }
  0x13   : > { %1439 = vmatprep.mubr.msk.bf16.mxu0 %vm624_vm0, %v1514_v5  ;;  %1455 = vmatprep.mubr.msk.bf16.mxu1 %vm624_vm0, %v1517_v6  ;;  %v1522_v16 = vld [vmem:[%s1670_s27 + $0x10] ss:$8 sps:$4 sm:$0xff]   ;;  %v1524_v18 = vld [vmem:[%s1670_s27 + $0x24] ss:$8 sps:$4 sm:$0xff]   ;;  %v1528_v20 = vld [vmem:[%s1670_s27 + $0x20] ss:$8 sps:$4 sm:$0xff]  }
  0x14   : > { %v1523_v17 = vld [vmem:[%s1670_s27 + $0x110] ss:$8 sps:$4 sm:$0xff]   ;;  %v1526_v19 = vld [vmem:[%s1670_s27 + $0x124] ss:$8 sps:$4 sm:$0xff]   ;;  %v1529_v21 = vld [vmem:[%s1670_s27 + $0x120] ss:$8 sps:$4 sm:$0xff]  }
  0x15   : > { %726 = vmatpush1.bf16.msra.mxu0 %v1505_v3  ;;  %1486 = vmatpush1.bf16.msra.mxu1 %v1505_v3  ;;  %v1530_v22 = vld [vmem:[%s1670_s27 + $0x34] ss:$8 sps:$4 sm:$0xff]   ;;  %v1534_v24 = vld [vmem:[%s1670_s27 + $0x30] ss:$8 sps:$4 sm:$0xff]   ;;  %v1536_v26 = vld [vmem:[%s1670_s27 + $0x44] ss:$8 sps:$4 sm:$0xff]  }
  0x16   : > { %727 = vmatprep.subr.bf16.mxu0 %v1616_v1  ;;  %1478 = vmatprep.subr.bf16.mxu1 %v1616_v1  ;;  %v1532_v23 = vld [vmem:[%s1670_s27 + $0x134] ss:$8 sps:$4 sm:$0xff]   ;;  %v1535_v25 = vld [vmem:[%s1670_s27 + $0x130] ss:$8 sps:$4 sm:$0xff]   ;;  %v1538_v27 = vld [vmem:[%s1670_s27 + $0x144] ss:$8 sps:$4 sm:$0xff]  }
  0x17   : > { %v1540_v28 = vld [vmem:[%s1670_s27 + $0x40] ss:$8 sps:$4 sm:$0xff]   ;;  %v1542_v30 = vld [vmem:[%s1670_s27 + $0x54] ss:$8 sps:$4 sm:$0xff]   ;;  %v1546_v32 = vld [vmem:[%s1670_s27 + $0x50] ss:$8 sps:$4 sm:$0xff]  }
  0x18   : > { %v1541_v29 = vld [vmem:[%s1670_s27 + $0x140] ss:$8 sps:$4 sm:$0xff]   ;;  %v1544_v31 = vld [vmem:[%s1670_s27 + $0x154] ss:$8 sps:$4 sm:$0xff]   ;;  %v1547_v33 = vld [vmem:[%s1670_s27 + $0x150] ss:$8 sps:$4 sm:$0xff]  }
  0x19   : > { %728 = vmatpush1.bf16.msra.mxu0 %v1506_v4  ;;  %1487 = vmatpush1.bf16.msra.mxu1 %v1506_v4  ;;  %v1548_v34 = vld [vmem:[%s1670_s27 + $0x64] ss:$8 sps:$4 sm:$0xff]   ;;  %v1552_v36 = vld [vmem:[%s1670_s27 + $0x60] ss:$8 sps:$4 sm:$0xff]   ;;  %v1554_v38 = vld [vmem:[%s1670_s27 + $0x74] ss:$8 sps:$4 sm:$0xff]  }
  0x1a   : > { %729 = vmatprep.subr.bf16.mxu0 %v1616_v1  ;;  %1479 = vmatprep.subr.bf16.mxu1 %v1616_v1  ;;  %v1550_v35 = vld [vmem:[%s1670_s27 + $0x164] ss:$8 sps:$4 sm:$0xff]   ;;  %v1553_v37 = vld [vmem:[%s1670_s27 + $0x160] ss:$8 sps:$4 sm:$0xff]   ;;  %v1556_v39 = vld [vmem:[%s1670_s27 + $0x174] ss:$8 sps:$4 sm:$0xff]  }
  0x1b   : > { %v1558_v40 = vld [vmem:[%s1670_s27 + $0x70] ss:$8 sps:$4 sm:$0xff]   ;;  %v1560_v42 = vld [vmem:[%s1670_s27 + $0x84] ss:$8 sps:$4 sm:$0xff]   ;;  %v1564_v44 = vld [vmem:[%s1670_s27 + $0x80] ss:$8 sps:$4 sm:$0xff]  }
  0x1c   : > { %v1559_v41 = vld [vmem:[%s1670_s27 + $0x170] ss:$8 sps:$4 sm:$0xff]   ;;  %v1562_v43 = vld [vmem:[%s1670_s27 + $0x184] ss:$8 sps:$4 sm:$0xff]   ;;  %v1565_v45 = vld [vmem:[%s1670_s27 + $0x180] ss:$8 sps:$4 sm:$0xff]  }
  0x1d   : > { %730 = vmatpush1.bf16.msra.mxu0 %v1507_v7  ;;  %1488 = vmatpush1.bf16.msra.mxu1 %v1507_v7  ;;  %v1566_v46 = vld [vmem:[%s1670_s27 + $0x94] ss:$8 sps:$4 sm:$0xff]   ;;  %v1570_v48 = vld [vmem:[%s1670_s27 + $0x90] ss:$8 sps:$4 sm:$0xff]   ;;  %v1572_v50 = vld [vmem:[%s1670_s27 + $0xa4] ss:$8 sps:$4 sm:$0xff]  }
  0x1e   : > { %731 = vmatprep.subr.bf16.mxu0 %v1616_v1  ;;  %1480 = vmatprep.subr.bf16.mxu1 %v1616_v1  ;;  %v1568_v47 = vld [vmem:[%s1670_s27 + $0x194] ss:$8 sps:$4 sm:$0xff]   ;;  %v1571_v49 = vld [vmem:[%s1670_s27 + $0x190] ss:$8 sps:$4 sm:$0xff]   ;;  %v1574_v51 = vld [vmem:[%s1670_s27 + $0x1a4] ss:$8 sps:$4 sm:$0xff]  }
  0x1f   : > { %v1576_v52 = vld [vmem:[%s1670_s27 + $0xa0] ss:$8 sps:$4 sm:$0xff]   ;;  %v1578_v54 = vld [vmem:[%s1670_s27 + $0xb4] ss:$8 sps:$4 sm:$0xff]   ;;  %v1582_v56 = vld [vmem:[%s1670_s27 + $0xb0] ss:$8 sps:$4 sm:$0xff]  }
  0x20   : > { %v1577_v53 = vld [vmem:[%s1670_s27 + $0x1a0] ss:$8 sps:$4 sm:$0xff]   ;;  %v1580_v55 = vld [vmem:[%s1670_s27 + $0x1b4] ss:$8 sps:$4 sm:$0xff]   ;;  %v1583_v57 = vld [vmem:[%s1670_s27 + $0x1b0] ss:$8 sps:$4 sm:$0xff]  }
  0x21   : > { %732 = vmatpush1.bf16.msra.mxu0 %v1508_v8  ;;  %1489 = vmatpush1.bf16.msra.mxu1 %v1508_v8  ;;  %v1584_v58 = vld [vmem:[%s1670_s27 + $0xc4] ss:$8 sps:$4 sm:$0xff]   ;;  %v1588_v60 = vld [vmem:[%s1670_s27 + $0xc0] ss:$8 sps:$4 sm:$0xff]   ;;  %v1590_v62 = vld [vmem:[%s1670_s27 + $0xd4] ss:$8 sps:$4 sm:$0xff]  }
  0x22   : > { %733 = vmatprep.subr.bf16.mxu0 %v1616_v1  ;;  %1481 = vmatprep.subr.bf16.mxu1 %v1616_v1  ;;  %v1586_v59 = vld [vmem:[%s1670_s27 + $0x1c4] ss:$8 sps:$4 sm:$0xff]   ;;  %v1589_v61 = vld [vmem:[%s1670_s27 + $0x1c0] ss:$8 sps:$4 sm:$0xff]   ;;  %v1592_v63 = vld [vmem:[%s1670_s27 + $0x1d4] ss:$8 sps:$4 sm:$0xff]  }
  0x23   : > { %v1594_v0 = vld [vmem:[%s1670_s27 + $0xd0] ss:$8 sps:$4 sm:$0xff]   ;;  %v1596_v2 = vld [vmem:[%s1670_s27 + $0xe4] ss:$8 sps:$4 sm:$0xff]   ;;  %v1600_v4 = vld [vmem:[%s1670_s27 + $0xe0] ss:$8 sps:$4 sm:$0xff]  }
  0x24   : > { %v1598_v3 = vld [vmem:[%s1670_s27 + $0x1e4] ss:$8 sps:$4 sm:$0xff]   ;;  %v1601_v5 = vld [vmem:[%s1670_s27 + $0x1e0] ss:$8 sps:$4 sm:$0xff]   ;;  %v1602_v6 = vld [vmem:[%s1670_s27 + $0xf4] ss:$8 sps:$4 sm:$0xff]  }
  0x25   : > { %734 = vmatpush1.bf16.msra.mxu0 %v1509_v9  ;;  %1490 = vmatpush1.bf16.msra.mxu1 %v1509_v9  ;;  %v1604_v7 = vld [vmem:[%s1670_s27 + $0x1f4] ss:$8 sps:$4 sm:$0xff]   ;;  %v1606_v8 = vld [vmem:[%s1670_s27 + $0xf0] ss:$8 sps:$4 sm:$0xff]  }
  0x26   : > { %735 = vmatprep.subr.bf16.mxu0 %v1616_v1  ;;  %1482 = vmatprep.subr.bf16.mxu1 %v1616_v1  ;;  %v1607_v9 = vld [vmem:[%s1670_s27 + $0x1f0] ss:$8 sps:$4 sm:$0xff]  }
  0x29   : > { %736 = vmatpush1.bf16.msra.mxu0 %v1510_v10  ;;  %1491 = vmatpush1.bf16.msra.mxu1 %v1510_v10 }
  0x2a   : > { %751 = vmatprep.subr.bf16.mxu0 %v1616_v1  ;;  %1483 = vmatprep.subr.bf16.mxu1 %v1616_v1  ;;  %v1595_v1 = vld [vmem:[%s1670_s27 + $0x1d0] ss:$8 sps:$4 sm:$0xff]  }
  0x2d   : > { %752 = vmatpush2.bf16.msra.mxu0 %v1511_v11  ;;  %1492 = vmatpush2.bf16.msra.mxu1 %v1511_v11 }
  0x30   : > { %754 = vmatmul.mubr.bf16.vlgmr.msra.gmra.mxu0 %v1512_v12  ;;  %882 = vmatmul.mubr.bf16.vlgmr.msra.gmra.mxu1 %v1515_v13 }
  0x31   : > { %1440 = vmatprep.mubr.msk.bf16.mxu0 %vm624_vm0, %v1518_v14  ;;  %1456 = vmatprep.mubr.msk.bf16.mxu1 %vm624_vm0, %v1520_v15 }
  0x38   : > { %762 = vmatmul.mubr.bf16.gmra.mxu0 %v1522_v16  ;;  %890 = vmatmul.mubr.bf16.gmra.mxu1 %v1523_v17 }
  0x39   : > { %1441 = vmatprep.mubr.msk.bf16.mxu0 %vm624_vm0, %v1524_v18  ;;  %1457 = vmatprep.mubr.msk.bf16.mxu1 %vm624_vm0, %v1526_v19 }
  0x40   : > { %770 = vmatmul.mubr.bf16.gmra.mxu0 %v1528_v20  ;;  %898 = vmatmul.mubr.bf16.gmra.mxu1 %v1529_v21 }
  0x41   : > { %1442 = vmatprep.mubr.msk.bf16.mxu0 %vm624_vm0, %v1530_v22  ;;  %1458 = vmatprep.mubr.msk.bf16.mxu1 %vm624_vm0, %v1532_v23 }
  0x48   : > { %778 = vmatmul.mubr.bf16.gmra.mxu0 %v1534_v24  ;;  %906 = vmatmul.mubr.bf16.gmra.mxu1 %v1535_v25 }
  0x49   : > { %1443 = vmatprep.mubr.msk.bf16.mxu0 %vm624_vm0, %v1536_v26  ;;  %1459 = vmatprep.mubr.msk.bf16.mxu1 %vm624_vm0, %v1538_v27 }
  0x50   : > { %786 = vmatmul.mubr.bf16.gmra.mxu0 %v1540_v28  ;;  %914 = vmatmul.mubr.bf16.gmra.mxu1 %v1541_v29 }
  0x51   : > { %1444 = vmatprep.mubr.msk.bf16.mxu0 %vm624_vm0, %v1542_v30  ;;  %1460 = vmatprep.mubr.msk.bf16.mxu1 %vm624_vm0, %v1544_v31 }
  0x58   : > { %794 = vmatmul.mubr.bf16.gmra.mxu0 %v1546_v32  ;;  %922 = vmatmul.mubr.bf16.gmra.mxu1 %v1547_v33 }
  0x59   : > { %1445 = vmatprep.mubr.msk.bf16.mxu0 %vm624_vm0, %v1548_v34  ;;  %1461 = vmatprep.mubr.msk.bf16.mxu1 %vm624_vm0, %v1550_v35 }
  0x60   : > { %802 = vmatmul.mubr.bf16.gmra.mxu0 %v1552_v36  ;;  %930 = vmatmul.mubr.bf16.gmra.mxu1 %v1553_v37 }
  0x61   : > { %1446 = vmatprep.mubr.msk.bf16.mxu0 %vm624_vm0, %v1554_v38  ;;  %1462 = vmatprep.mubr.msk.bf16.mxu1 %vm624_vm0, %v1556_v39 }
  0x68   : > { %810 = vmatmul.mubr.bf16.gmra.mxu0 %v1558_v40  ;;  %938 = vmatmul.mubr.bf16.gmra.mxu1 %v1559_v41 }
  0x69   : > { %1447 = vmatprep.mubr.msk.bf16.mxu0 %vm624_vm0, %v1560_v42  ;;  %1463 = vmatprep.mubr.msk.bf16.mxu1 %vm624_vm0, %v1562_v43 }
  0x70   : > { %818 = vmatmul.mubr.bf16.gmra.mxu0 %v1564_v44  ;;  %946 = vmatmul.mubr.bf16.gmra.mxu1 %v1565_v45 }
  0x71   : > { %1448 = vmatprep.mubr.msk.bf16.mxu0 %vm624_vm0, %v1566_v46  ;;  %1464 = vmatprep.mubr.msk.bf16.mxu1 %vm624_vm0, %v1568_v47 }
  0x78   : > { %826 = vmatmul.mubr.bf16.gmra.mxu0 %v1570_v48  ;;  %954 = vmatmul.mubr.bf16.gmra.mxu1 %v1571_v49 }
  0x79   : > { %1449 = vmatprep.mubr.msk.bf16.mxu0 %vm624_vm0, %v1572_v50  ;;  %1465 = vmatprep.mubr.msk.bf16.mxu1 %vm624_vm0, %v1574_v51 }
  0x80   : > { %834 = vmatmul.mubr.bf16.gmra.mxu0 %v1576_v52  ;;  %962 = vmatmul.mubr.bf16.gmra.mxu1 %v1577_v53 }
  0x81   : > { %1450 = vmatprep.mubr.msk.bf16.mxu0 %vm624_vm0, %v1578_v54  ;;  %1466 = vmatprep.mubr.msk.bf16.mxu1 %vm624_vm0, %v1580_v55 }
  0x88   : > { %842 = vmatmul.mubr.bf16.gmra.mxu0 %v1582_v56  ;;  %970 = vmatmul.mubr.bf16.gmra.mxu1 %v1583_v57 }
  0x89   : > { %1451 = vmatprep.mubr.msk.bf16.mxu0 %vm624_vm0, %v1584_v58  ;;  %1467 = vmatprep.mubr.msk.bf16.mxu1 %vm624_vm0, %v1586_v59 }
  0x90   : > { %850 = vmatmul.mubr.bf16.gmra.mxu0 %v1588_v60  ;;  %978 = vmatmul.mubr.bf16.gmra.mxu1 %v1589_v61 }
  0x91   : > { %1452 = vmatprep.mubr.msk.bf16.mxu0 %vm624_vm0, %v1590_v62  ;;  %1468 = vmatprep.mubr.msk.bf16.mxu1 %vm624_vm0, %v1592_v63 }
  0x98   : > { %858 = vmatmul.mubr.bf16.gmra.mxu0 %v1594_v0  ;;  %986 = vmatmul.mubr.bf16.gmra.mxu1 %v1595_v1 }
  0x99   : > { %1453 = vmatprep.mubr.msk.bf16.mxu0 %vm624_vm0, %v1596_v2  ;;  %1469 = vmatprep.mubr.msk.bf16.mxu1 %vm624_vm0, %v1598_v3 }
  0xa0   : > { %866 = vmatmul.mubr.bf16.gmra.mxu0 %v1600_v4  ;;  %994 = vmatmul.mubr.bf16.gmra.mxu1 %v1601_v5 }
  0xa1   : > { %1454 = vmatprep.mubr.msk.bf16.mxu0 %vm624_vm0, %v1602_v6  ;;  %1470 = vmatprep.mubr.msk.bf16.mxu1 %vm624_vm0, %v1604_v7 }
  0xa8   : > { %874 = vmatmul.mubr.bf16.gmra.mxu0 %v1606_v8  ;;  %1002 = vmatmul.mubr.bf16.gmra.mxu1 %v1607_v9 }
  0xf0   : > { %v1793_v10 = vpop.f32.mrf.mxu0  ;;  %v1795_v11 = vpop.f32.mrf.mxu1 }
  0xf1   : > { %1010 = vst [vmem:[%s1791_s18] sm:$0xff] %v1793_v10  ;;  %1042 = vst [vmem:[%s1791_s18 + $0x100] sm:$0xff] %v1795_v11 }
  0xf2   : > { %v757_v12 = vpop.f32.mrf.mxu0  ;;  %v885_v13 = vpop.f32.mrf.mxu1 }
  0xf4   : > { %v1801_v14 = vpop.f32.mrf.mxu0  ;;  %v1803_v15 = vpop.f32.mrf.mxu1 }
  0xf5   : > { %1011 = vst [vmem:[%s1791_s18 + $0x8] sm:$0xff] %v1801_v14  ;;  %1043 = vst [vmem:[%s1791_s18 + $0x108] sm:$0xff] %v1803_v15 }
  0xf6   : > { %v760_v16 = vpop.f32.mrf.mxu0  ;;  %v888_v17 = vpop.f32.mrf.mxu1 }
  0xf8   : > { %v1809_v18 = vpop.f32.mrf.mxu0  ;;  %v1811_v19 = vpop.f32.mrf.mxu1 }
  0xf9   : > { %1012 = vst [vmem:[%s1791_s18 + $0x10] sm:$0xff] %v1809_v18  ;;  %1044 = vst [vmem:[%s1791_s18 + $0x110] sm:$0xff] %v1811_v19 }
  0xfa   : > { %v765_v20 = vpop.f32.mrf.mxu0  ;;  %v893_v21 = vpop.f32.mrf.mxu1 }
  0xfc   : > { %v1817_v22 = vpop.f32.mrf.mxu0  ;;  %v1819_v23 = vpop.f32.mrf.mxu1 }
  0xfd   : > { %1013 = vst [vmem:[%s1791_s18 + $0x18] sm:$0xff] %v1817_v22  ;;  %1045 = vst [vmem:[%s1791_s18 + $0x118] sm:$0xff] %v1819_v23 }
  0xfe   : > { %v768_v24 = vpop.f32.mrf.mxu0  ;;  %v896_v25 = vpop.f32.mrf.mxu1 }
 0x100   : > { %v1825_v26 = vpop.f32.mrf.mxu0  ;;  %v1827_v27 = vpop.f32.mrf.mxu1 }
 0x101   : > { %1014 = vst [vmem:[%s1791_s18 + $0x20] sm:$0xff] %v1825_v26  ;;  %1046 = vst [vmem:[%s1791_s18 + $0x120] sm:$0xff] %v1827_v27 }
 0x102   : > { %v773_v28 = vpop.f32.mrf.mxu0  ;;  %v901_v29 = vpop.f32.mrf.mxu1 }
 0x104   : > { %v1833_v30 = vpop.f32.mrf.mxu0  ;;  %v1835_v31 = vpop.f32.mrf.mxu1 }
 0x105   : > { %1015 = vst [vmem:[%s1791_s18 + $0x28] sm:$0xff] %v1833_v30  ;;  %1047 = vst [vmem:[%s1791_s18 + $0x128] sm:$0xff] %v1835_v31 }
 0x106   : > { %v776_v32 = vpop.f32.mrf.mxu0  ;;  %v904_v33 = vpop.f32.mrf.mxu1 }
 0x108   : > { %v1841_v34 = vpop.f32.mrf.mxu0  ;;  %v1843_v35 = vpop.f32.mrf.mxu1 }
 0x109   : > { %1016 = vst [vmem:[%s1791_s18 + $0x30] sm:$0xff] %v1841_v34  ;;  %1048 = vst [vmem:[%s1791_s18 + $0x130] sm:$0xff] %v1843_v35 }
 0x10a   : > { %v781_v36 = vpop.f32.mrf.mxu0  ;;  %v909_v37 = vpop.f32.mrf.mxu1 }
 0x10c   : > { %v1849_v38 = vpop.f32.mrf.mxu0  ;;  %v1851_v39 = vpop.f32.mrf.mxu1 }
 0x10d   : > { %1017 = vst [vmem:[%s1791_s18 + $0x38] sm:$0xff] %v1849_v38  ;;  %1049 = vst [vmem:[%s1791_s18 + $0x138] sm:$0xff] %v1851_v39 }
 0x10e   : > { %v784_v40 = vpop.f32.mrf.mxu0  ;;  %v912_v41 = vpop.f32.mrf.mxu1 }
 0x110   : > { %v1857_v42 = vpop.f32.mrf.mxu0  ;;  %v1859_v43 = vpop.f32.mrf.mxu1 }
 0x111   : > { %1018 = vst [vmem:[%s1791_s18 + $0x40] sm:$0xff] %v1857_v42  ;;  %1050 = vst [vmem:[%s1791_s18 + $0x140] sm:$0xff] %v1859_v43 }
 0x112   : > { %v789_v44 = vpop.f32.mrf.mxu0  ;;  %v917_v45 = vpop.f32.mrf.mxu1 }
 0x114   : > { %v1865_v46 = vpop.f32.mrf.mxu0  ;;  %v1867_v47 = vpop.f32.mrf.mxu1 }
 0x115   : > { %1019 = vst [vmem:[%s1791_s18 + $0x48] sm:$0xff] %v1865_v46  ;;  %1051 = vst [vmem:[%s1791_s18 + $0x148] sm:$0xff] %v1867_v47 }
 0x116   : > { %v792_v48 = vpop.f32.mrf.mxu0  ;;  %v920_v49 = vpop.f32.mrf.mxu1 }
 0x118   : > { %v1873_v50 = vpop.f32.mrf.mxu0  ;;  %v1875_v51 = vpop.f32.mrf.mxu1 }
 0x119   : > { %1020 = vst [vmem:[%s1791_s18 + $0x50] sm:$0xff] %v1873_v50  ;;  %1052 = vst [vmem:[%s1791_s18 + $0x150] sm:$0xff] %v1875_v51 }
 0x11a   : > { %v797_v52 = vpop.f32.mrf.mxu0  ;;  %v925_v53 = vpop.f32.mrf.mxu1 }
 0x11c   : > { %v1881_v54 = vpop.f32.mrf.mxu0  ;;  %v1883_v55 = vpop.f32.mrf.mxu1 }
 0x11d   : > { %1021 = vst [vmem:[%s1791_s18 + $0x58] sm:$0xff] %v1881_v54  ;;  %1053 = vst [vmem:[%s1791_s18 + $0x158] sm:$0xff] %v1883_v55 }
 0x11e   : > { %v800_v56 = vpop.f32.mrf.mxu0  ;;  %v928_v57 = vpop.f32.mrf.mxu1 }
 0x120   : > { %v1889_v58 = vpop.f32.mrf.mxu0  ;;  %v1891_v59 = vpop.f32.mrf.mxu1 }
 0x121   : > { %1022 = vst [vmem:[%s1791_s18 + $0x60] sm:$0xff] %v1889_v58  ;;  %1054 = vst [vmem:[%s1791_s18 + $0x160] sm:$0xff] %v1891_v59 }
 0x122   : > { %v805_v60 = vpop.f32.mrf.mxu0  ;;  %v933_v61 = vpop.f32.mrf.mxu1 }
 0x124   : > { %v1897_v62 = vpop.f32.mrf.mxu0  ;;  %v1899_v63 = vpop.f32.mrf.mxu1 }
 0x125   : > { %1023 = vst [vmem:[%s1791_s18 + $0x68] sm:$0xff] %v1897_v62  ;;  %1055 = vst [vmem:[%s1791_s18 + $0x168] sm:$0xff] %v1899_v63 }
 0x126   : > { %v808_v0 = vpop.f32.mrf.mxu0  ;;  %v936_v1 = vpop.f32.mrf.mxu1 }
 0x128   : > { %v1905_v2 = vpop.f32.mrf.mxu0  ;;  %v1907_v3 = vpop.f32.mrf.mxu1 }
 0x129   : > { %1024 = vst [vmem:[%s1791_s18 + $0x70] sm:$0xff] %v1905_v2  ;;  %1056 = vst [vmem:[%s1791_s18 + $0x170] sm:$0xff] %v1907_v3 }
 0x12a   : > { %v813_v4 = vpop.f32.mrf.mxu0  ;;  %v941_v5 = vpop.f32.mrf.mxu1 }
 0x12c   : > { %v1913_v6 = vpop.f32.mrf.mxu0  ;;  %v1915_v7 = vpop.f32.mrf.mxu1 }
 0x12d   : > { %1025 = vst [vmem:[%s1791_s18 + $0x78] sm:$0xff] %v1913_v6  ;;  %1057 = vst [vmem:[%s1791_s18 + $0x178] sm:$0xff] %v1915_v7 }
 0x12e   : > { %v816_v8 = vpop.f32.mrf.mxu0  ;;  %v944_v9 = vpop.f32.mrf.mxu1 }
 0x130   : > { %v1921_v12 = vpop.f32.mrf.mxu0  ;;  %v1923_v13 = vpop.f32.mrf.mxu1 }
 0x131   : > { %1026 = vst [vmem:[%s1791_s18 + $0x80] sm:$0xff] %v1921_v12  ;;  %1058 = vst [vmem:[%s1791_s18 + $0x180] sm:$0xff] %v1923_v13 }
 0x132   : > { %v821_v16 = vpop.f32.mrf.mxu0  ;;  %v949_v17 = vpop.f32.mrf.mxu1 }
 0x134   : > { %v1929_v20 = vpop.f32.mrf.mxu0  ;;  %v1931_v21 = vpop.f32.mrf.mxu1 }
 0x135   : > { %1027 = vst [vmem:[%s1791_s18 + $0x88] sm:$0xff] %v1929_v20  ;;  %1059 = vst [vmem:[%s1791_s18 + $0x188] sm:$0xff] %v1931_v21 }
 0x136   : > { %v824_v24 = vpop.f32.mrf.mxu0  ;;  %v952_v25 = vpop.f32.mrf.mxu1 }
 0x138   : > { %v1937_v28 = vpop.f32.mrf.mxu0  ;;  %v1939_v29 = vpop.f32.mrf.mxu1 }
 0x139   : > { %1028 = vst [vmem:[%s1791_s18 + $0x90] sm:$0xff] %v1937_v28  ;;  %1060 = vst [vmem:[%s1791_s18 + $0x190] sm:$0xff] %v1939_v29 }
 0x13a   : > { %v829_v32 = vpop.f32.mrf.mxu0  ;;  %v957_v33 = vpop.f32.mrf.mxu1 }
 0x13c   : > { %v1945_v36 = vpop.f32.mrf.mxu0  ;;  %v1947_v37 = vpop.f32.mrf.mxu1 }
 0x13d   : > { %1029 = vst [vmem:[%s1791_s18 + $0x98] sm:$0xff] %v1945_v36  ;;  %1061 = vst [vmem:[%s1791_s18 + $0x198] sm:$0xff] %v1947_v37 }
 0x13e   : > { %v832_v40 = vpop.f32.mrf.mxu0  ;;  %v960_v41 = vpop.f32.mrf.mxu1 }
 0x140   : > { %v1953_v44 = vpop.f32.mrf.mxu0  ;;  %v1955_v45 = vpop.f32.mrf.mxu1 }
 0x141   : > { %2293 = vst [vmem:[#allocation2_spill] sm:$0xff] %v1955_v45  ;;  %1030 = vst [vmem:[%s1791_s18 + $0xa0] sm:$0xff] %v1953_v44 }
 0x142   : > { %1062 = vst [vmem:[%s1791_s18 + $0x1a0] sm:$0xff] %v1955_v45  ;;  %v837_v48 = vpop.f32.mrf.mxu0  ;;  %v965_v49 = vpop.f32.mrf.mxu1 }
 0x144   : > { %v1961_v52 = vpop.f32.mrf.mxu0  ;;  %v1963_v53 = vpop.f32.mrf.mxu1 }
 0x145   : > { %2294 = vst [vmem:[#allocation3_spill] sm:$0xff] %v1963_v53  ;;  %1031 = vst [vmem:[%s1791_s18 + $0xa8] sm:$0xff] %v1961_v52 }
 0x146   : > { %1063 = vst [vmem:[%s1791_s18 + $0x1a8] sm:$0xff] %v1963_v53  ;;  %v840_v56 = vpop.f32.mrf.mxu0  ;;  %v968_v57 = vpop.f32.mrf.mxu1 }
 0x148   : > { %v1969_v60 = vpop.f32.mrf.mxu0  ;;  %v1971_v61 = vpop.f32.mrf.mxu1 }
 0x149   : > { %2295 = vst [vmem:[#allocation4_spill] sm:$0xff] %v1971_v61  ;;  %1032 = vst [vmem:[%s1791_s18 + $0xb0] sm:$0xff] %v1969_v60 }
 0x14a   : > { %1064 = vst [vmem:[%s1791_s18 + $0x1b0] sm:$0xff] %v1971_v61  ;;  %v845_v0 = vpop.f32.mrf.mxu0  ;;  %v973_v1 = vpop.f32.mrf.mxu1 }
 0x14c   : > { %v1977_v4 = vpop.f32.mrf.mxu0  ;;  %v1979_v5 = vpop.f32.mrf.mxu1 }
 0x14d   : > { %2296 = vst [vmem:[#allocation5_spill] sm:$0xff] %v1979_v5  ;;  %1033 = vst [vmem:[%s1791_s18 + $0xb8] sm:$0xff] %v1977_v4 }
 0x14e   : > { %1065 = vst [vmem:[%s1791_s18 + $0x1b8] sm:$0xff] %v1979_v5  ;;  %v848_v8 = vpop.f32.mrf.mxu0  ;;  %v976_v9 = vpop.f32.mrf.mxu1 }
 0x150   : > { %v1985_v16 = vpop.f32.mrf.mxu0  ;;  %v1987_v17 = vpop.f32.mrf.mxu1 }
 0x151   : > { %2297 = vst [vmem:[#allocation6_spill] sm:$0xff] %v1987_v17  ;;  %1034 = vst [vmem:[%s1791_s18 + $0xc0] sm:$0xff] %v1985_v16 }
 0x152   : > { %1066 = vst [vmem:[%s1791_s18 + $0x1c0] sm:$0xff] %v1987_v17  ;;  %v853_v24 = vpop.f32.mrf.mxu0  ;;  %v981_v25 = vpop.f32.mrf.mxu1 }
 0x154   : > { %v1993_v32 = vpop.f32.mrf.mxu0  ;;  %v1995_v33 = vpop.f32.mrf.mxu1 }
 0x155   : > { %2298 = vst [vmem:[#allocation7_spill] sm:$0xff] %v1995_v33  ;;  %1035 = vst [vmem:[%s1791_s18 + $0xc8] sm:$0xff] %v1993_v32 }
 0x156   : > { %1067 = vst [vmem:[%s1791_s18 + $0x1c8] sm:$0xff] %v1995_v33  ;;  %v856_v40 = vpop.f32.mrf.mxu0  ;;  %v984_v41 = vpop.f32.mrf.mxu1 }
 0x158   : > { %v2001_v48 = vpop.f32.mrf.mxu0  ;;  %v2003_v49 = vpop.f32.mrf.mxu1 }
 0x159   : > { %2299 = vst [vmem:[#allocation8_spill] sm:$0xff] %v2003_v49  ;;  %1036 = vst [vmem:[%s1791_s18 + $0xd0] sm:$0xff] %v2001_v48 }
 0x15a   : > { %1068 = vst [vmem:[%s1791_s18 + $0x1d0] sm:$0xff] %v2003_v49  ;;  %v861_v56 = vpop.f32.mrf.mxu0  ;;  %v989_v57 = vpop.f32.mrf.mxu1 }
 0x15c   : > { %v2009_v0 = vpop.f32.mrf.mxu0  ;;  %v2011_v1 = vpop.f32.mrf.mxu1 }
 0x15d   : > { %2300 = vst [vmem:[#allocation9_spill] sm:$0xff] %v2011_v1  ;;  %1037 = vst [vmem:[%s1791_s18 + $0xd8] sm:$0xff] %v2009_v0 }
 0x15e   : > { %1069 = vst [vmem:[%s1791_s18 + $0x1d8] sm:$0xff] %v2011_v1  ;;  %v864_v8 = vpop.f32.mrf.mxu0  ;;  %v992_v9 = vpop.f32.mrf.mxu1 }
 0x160   : > { %v2017_v24 = vpop.f32.mrf.mxu0  ;;  %v2019_v25 = vpop.f32.mrf.mxu1 }
 0x161   : > { %2301 = vst [vmem:[#allocation10_spill] sm:$0xff] %v2019_v25  ;;  %1038 = vst [vmem:[%s1791_s18 + $0xe0] sm:$0xff] %v2017_v24 }
 0x162   : > { %1070 = vst [vmem:[%s1791_s18 + $0x1e0] sm:$0xff] %v2019_v25  ;;  %v869_v40 = vpop.f32.mrf.mxu0  ;;  %v997_v41 = vpop.f32.mrf.mxu1 }
 0x164   : > { %v2025_v56 = vpop.f32.mrf.mxu0  ;;  %v2027_v57 = vpop.f32.mrf.mxu1 }
 0x165   : > { %2302 = vst [vmem:[#allocation11_spill] sm:$0xff] %v2027_v57  ;;  %1039 = vst [vmem:[%s1791_s18 + $0xe8] sm:$0xff] %v2025_v56 }
 0x166   : > { %1071 = vst [vmem:[%s1791_s18 + $0x1e8] sm:$0xff] %v2027_v57  ;;  %v872_v8 = vpop.f32.mrf.mxu0  ;;  %v1000_v9 = vpop.f32.mrf.mxu1 }
 0x168   : > { %v2033_v1 = vpop.f32.mrf.mxu0  ;;  %v2035_v49 = vpop.f32.mrf.mxu1 }
 0x169   : > { %2303 = vst [vmem:[#allocation12_spill] sm:$0xff] %v2035_v49  ;;  %1040 = vst [vmem:[%s1791_s18 + $0xf0] sm:$0xff] %v2033_v1 }
 0x16a   : > { %1072 = vst [vmem:[%s1791_s18 + $0x1f0] sm:$0xff] %v2035_v49  ;;  %v877_v40 = vpop.f32.mrf.mxu0  ;;  %v1005_v41 = vpop.f32.mrf.mxu1  ;;  %1077 = sbr.rel (%p1471_p4) target bundleno = 369 (0x171), region = 32 }
 0x16c   : > { %v2041_v25 = vpop.f32.mrf.mxu0  ;;  %v2043_v33 = vpop.f32.mrf.mxu1 }
 0x16d   : > { %2304 = vst [vmem:[#allocation13_spill] sm:$0xff] %v2043_v33  ;;  %1041 = vst [vmem:[%s1791_s18 + $0xf8] sm:$0xff] %v2041_v25 }
 0x16e   : > { %1073 = vst [vmem:[%s1791_s18 + $0x1f8] sm:$0xff] %v2043_v33  ;;  %v880_v8 = vpop.f32.mrf.mxu0  ;;  %v1008_v9 = vpop.f32.mrf.mxu1 }
 0x16f   : > { %v1617_v57 = vmov 0.0  }
 0x170   : > { %1078 = vst [vmem:[%s2267_s3] sm:$0x1] %v1617_v57  ;;  %1079 = vst [vmem:[%s2268_s4] sm:$0x1] %v1617_v57 }
 0x171 PF: > { %v1081_v40 = vadd.f32 %v1801_v14, %v1793_v10  ;;  %v1153_v57 = vmul.f32 %v1793_v10, %v1793_v10  ;;  %v1154_v61 = vmul.f32 %v1801_v14, %v1801_v14  ;;  %v1158_v14 = vmul.f32 %v1833_v30, %v1833_v30 }
 0x173   : > { %v1082_v41 = vadd.f32 %v1081_v40, %v1809_v18 }
 0x175   : > { %v1083_v8 = vadd.f32 %v1082_v41, %v1817_v22  ;;  %v1155_v41 = vmul.f32 %v1809_v18, %v1809_v18 }
 0x177   : > { %v1084_v9 = vadd.f32 %v1083_v8, %v1825_v26 }
 0x179   : > { %v1085_v33 = vadd.f32 %v1084_v9, %v1833_v30  ;;  %v1217_v9 = vadd.f32 %v1154_v61, %v1153_v57  ;;  %v1160_v61 = vmul.f32 %v1849_v38, %v1849_v38 }
 0x17b   : > { %v1086_v49 = vadd.f32 %v1085_v33, %v1841_v34  ;;  %v1156_v33 = vmul.f32 %v1817_v22, %v1817_v22  ;;  %v1218_v10 = vadd.f32 %v1217_v9, %v1155_v41  ;;  %v1161_v41 = vmul.f32 %v1857_v42, %v1857_v42 }
 0x17c   : > { %v1163_v9 = vmul.f32 %v1873_v50, %v1873_v50 }
 0x17d   : > { %v1087_v17 = vadd.f32 %v1086_v49, %v1849_v38 }
 0x17f   : > { %v1088_v5 = vadd.f32 %v1087_v17, %v1857_v42  ;;  %v1157_v17 = vmul.f32 %v1825_v26, %v1825_v26 }
 0x181   : > { %v1089_v40 = vadd.f32 %v1088_v5, %v1865_v46  ;;  %v1219_v5 = vadd.f32 %v1218_v10, %v1156_v33  ;;  %v1165_v10 = vmul.f32 %v1889_v58, %v1889_v58 }
 0x183   : > { %v1090_v8 = vadd.f32 %v1089_v40, %v1873_v50  ;;  %v1159_v40 = vmul.f32 %v1841_v34, %v1841_v34  ;;  %v1220_v45 = vadd.f32 %v1219_v5, %v1157_v17  ;;  %v1166_v5 = vmul.f32 %v1897_v62, %v1897_v62 }
 0x185   : > { %v1091_v49 = vadd.f32 %v1090_v8, %v1881_v54  ;;  %v1221_v57 = vadd.f32 %v1220_v45, %v1158_v14  ;;  %v1164_v45 = vmul.f32 %v1881_v54, %v1881_v54 }
 0x187   : > { %v1092_v53 = vadd.f32 %v1091_v49, %v1889_v58  ;;  %v1222_v8 = vadd.f32 %v1221_v57, %v1159_v40  ;;  %v1167_v40 = vmul.f32 %v1905_v2, %v1905_v2 }
 0x189   : > { %v1093_v18 = vadd.f32 %v1092_v53, %v1897_v62  ;;  %v1162_v53 = vmul.f32 %v1865_v46, %v1865_v46  ;;  %v1223_v33 = vadd.f32 %v1222_v8, %v1160_v61  ;;  %v1168_v61 = vmul.f32 %v1913_v6, %v1913_v6 }
 0x18a   : > { %v1170_v8 = vmul.f32 %v1929_v20, %v1929_v20 }
 0x18b   : > { %v1094_v22 = vadd.f32 %v1093_v18, %v1905_v2  ;;  %v1224_v49 = vadd.f32 %v1223_v33, %v1161_v41 }
 0x18d   : > { %v1095_v26 = vadd.f32 %v1094_v22, %v1913_v6  ;;  %v1225_v17 = vadd.f32 %v1224_v49, %v1162_v53  ;;  %v1171_v53 = vmul.f32 %v1937_v28, %v1937_v28  ;;  %v1173_v49 = vmul.f32 %v1953_v44, %v1953_v44 }
 0x18f   : > { %v1096_v30 = vadd.f32 %v1095_v26, %v1921_v12  ;;  %v1226_v14 = vadd.f32 %v1225_v17, %v1163_v9  ;;  %v1169_v26 = vmul.f32 %v1921_v12, %v1921_v12 }
 0x191   : > { %v1097_v34 = vadd.f32 %v1096_v30, %v1929_v20  ;;  %v1227_v18 = vadd.f32 %v1226_v14, %v1164_v45  ;;  %v1174_v45 = vmul.f32 %v1961_v52, %v1961_v52  ;;  %v1176_v14 = vmul.f32 %v1977_v4, %v1977_v4 }
 0x193   : > { %v1098_v38 = vadd.f32 %v1097_v34, %v1937_v28  ;;  %v1228_v22 = vadd.f32 %v1227_v18, %v1165_v10  ;;  %v1172_v34 = vmul.f32 %v1945_v36, %v1945_v36 }
 0x195   : > { %v1099_v42 = vadd.f32 %v1098_v38, %v1945_v36  ;;  %v1229_v57 = vadd.f32 %v1228_v22, %v1166_v5  ;;  %v1177_v5 = vmul.f32 %v1985_v16, %v1985_v16  ;;  %v1179_v22 = vmul.f32 %v2001_v48, %v2001_v48 }
 0x197   : > { %v1100_v46 = vadd.f32 %v1099_v42, %v1953_v44  ;;  %v1230_v41 = vadd.f32 %v1229_v57, %v1167_v40  ;;  %v1175_v42 = vmul.f32 %v1969_v60, %v1969_v60 }
 0x199   : > { %v1101_v50 = vadd.f32 %v1100_v46, %v1961_v52  ;;  %v1231_v30 = vadd.f32 %v1230_v41, %v1168_v61  ;;  %v1180_v61 = vmul.f32 %v2009_v0, %v2009_v0  ;;  %v1182_v41 = vmul.f32 %v2025_v56, %v2025_v56 }
 0x19b   : > { %v1102_v54 = vadd.f32 %v1101_v50, %v1969_v60  ;;  %v1232_v33 = vadd.f32 %v1231_v30, %v1169_v26  ;;  %v1178_v50 = vmul.f32 %v1993_v32, %v1993_v32 }
 0x19d   : > { %v1103_v58 = vadd.f32 %v1102_v54, %v1977_v4  ;;  %v1233_v9 = vadd.f32 %v1232_v33, %v1170_v8  ;;  %v1183_v8 = vmul.f32 %v2033_v1, %v2033_v1  ;;  %v1185_v33 = vmul.f32 %v1795_v11, %v1795_v11 }
 0x19f   : > { %v1104_v62 = vadd.f32 %v1103_v58, %v1985_v16  ;;  %v1234_v38 = vadd.f32 %v1233_v9, %v1171_v53  ;;  %v1181_v58 = vmul.f32 %v2017_v24, %v2017_v24 }
 0x1a1   : > { %v1105_v2 = vadd.f32 %v1104_v62, %v1993_v32  ;;  %v1235_v17 = vadd.f32 %v1234_v38, %v1172_v34  ;;  %v1186_v34 = vmul.f32 %v1803_v15, %v1803_v15  ;;  %v1188_v38 = vmul.f32 %v1819_v23, %v1819_v23 }
 0x1a3   : > { %v1106_v6 = vadd.f32 %v1105_v2, %v2001_v48  ;;  %v1236_v10 = vadd.f32 %v1235_v17, %v1173_v49  ;;  %v1184_v2 = vmul.f32 %v2041_v25, %v2041_v25 }
 0x1a5   : > { %v1107_v12 = vadd.f32 %v1106_v6, %v2009_v0  ;;  %v1237_v46 = vadd.f32 %v1236_v10, %v1174_v45  ;;  %v1189_v45 = vmul.f32 %v1827_v27, %v1827_v27  ;;  %v1191_v10 = vmul.f32 %v1843_v35, %v1843_v35 }
 0x1a7   : > { %v1108_v20 = vadd.f32 %v1107_v12, %v2017_v24  ;;  %v1238_v18 = vadd.f32 %v1237_v46, %v1175_v42  ;;  %v1187_v12 = vmul.f32 %v1811_v19, %v1811_v19 }
 0x1a9   : > { %v1109_v28 = vadd.f32 %v1108_v20, %v2025_v56  ;;  %v1239_v40 = vadd.f32 %v1238_v18, %v1176_v14  ;;  %v1192_v14 = vmul.f32 %v1851_v39, %v1851_v39  ;;  %v1194_v18 = vmul.f32 %v1867_v47, %v1867_v47 }
 0x1ab   : > { %v1110_v36 = vadd.f32 %v1109_v28, %v2033_v1  ;;  %v1240_v54 = vadd.f32 %v1239_v40, %v1177_v5  ;;  %v1190_v28 = vmul.f32 %v1835_v31, %v1835_v31 }
 0x1ad   : > { %v1111_v44 = vadd.f32 %v1110_v36, %v2041_v25  ;;  %v1241_v57 = vadd.f32 %v1240_v54, %v1178_v50  ;;  %v1195_v50 = vmul.f32 %v1875_v51, %v1875_v51  ;;  %v1197_v54 = vmul.f32 %v1891_v59, %v1891_v59 }
 0x1af   : > { %v1112_v52 = vadd.f32 %v1111_v44, %v1795_v11  ;;  %v1242_v26 = vadd.f32 %v1241_v57, %v1179_v22  ;;  %v1193_v44 = vmul.f32 %v1859_v43, %v1859_v43  ;;  %v1198_v57 = vmul.f32 %v1899_v63, %v1899_v63 }
 0x1b1   : > { %v1113_v60 = vadd.f32 %v1112_v52, %v1803_v15  ;;  %v1243_v62 = vadd.f32 %v1242_v26, %v1180_v61  ;;  %v1199_v26 = vmul.f32 %v1907_v3, %v1907_v3 }
 0x1b3   : > { %v1114_v4 = vadd.f32 %v1113_v60, %v1811_v19  ;;  %v1244_v30 = vadd.f32 %v1243_v62, %v1181_v58  ;;  %v1196_v60 = vmul.f32 %v1883_v55, %v1883_v55  ;;  %v1200_v62 = vmul.f32 %v1915_v7, %v1915_v7 }
 0x1b5   : > { %v1115_v16 = vadd.f32 %v1114_v4, %v1819_v23  ;;  %v1245_v53 = vadd.f32 %v1244_v30, %v1182_v41  ;;  %v1201_v30 = vmul.f32 %v1923_v13, %v1923_v13 }
 0x1b7   : > { %v1116_v32 = vadd.f32 %v1115_v16, %v1827_v27  ;;  %v1246_v6 = vadd.f32 %v1245_v53, %v1183_v8  ;;  %v1202_v53 = vmul.f32 %v1931_v21, %v1931_v21 }
 0x1b9   : > { %v1117_v48 = vadd.f32 %v1116_v32, %v1835_v31  ;;  %v1247_v9 = vadd.f32 %v1246_v6, %v1184_v2  ;;  %v1203_v6 = vmul.f32 %v1939_v29, %v1939_v29 }
 0x1bb   : > { %v1118_v0 = vadd.f32 %v1117_v48, %v1843_v35  ;;  %v1248_v49 = vadd.f32 %v1247_v9, %v1185_v33  ;;  %v1204_v9 = vmul.f32 %v1947_v37, %v1947_v37 }
 0x1bd   : > { %v1119_v24 = vadd.f32 %v1118_v0, %v1851_v39  ;;  %v1249_v20 = vadd.f32 %v1248_v49, %v1186_v34 }
 0x1bf   : > { %v1120_v56 = vadd.f32 %v1119_v24, %v1859_v43  ;;  %v1250_v17 = vadd.f32 %v1249_v20, %v1187_v12 }
 0x1c1   : > { %v1121_v1 = vadd.f32 %v1120_v56, %v1867_v47  ;;  %v1251_v42 = vadd.f32 %v1250_v17, %v1188_v38  ;;  %v2305_v47 = vld [vmem:[#allocation2_spill] sm:$0xff] }
 0x1c2   : > { %v1205_v49 = vmul.f32 %v2305_v47, %v2305_v47 }
 0x1c3   : > { %v1122_v25 = vadd.f32 %v1121_v1, %v1875_v51  ;;  %v1252_v36 = vadd.f32 %v1251_v42, %v1189_v45  ;;  %v2306_v51 = vld [vmem:[#allocation3_spill] sm:$0xff] }
 0x1c4   : > { %v1206_v20 = vmul.f32 %v2306_v51, %v2306_v51 }
 0x1c5   : > { %v1123_v11 = vadd.f32 %v1122_v25, %v1883_v55  ;;  %v1253_v46 = vadd.f32 %v1252_v36, %v1190_v28  ;;  %v2307_v55 = vld [vmem:[#allocation4_spill] sm:$0xff] }
 0x1c6   : > { %v1207_v17 = vmul.f32 %v2307_v55, %v2307_v55 }
 0x1c7   : > { %v1124_v15 = vadd.f32 %v1123_v11, %v1891_v59  ;;  %v1254_v5 = vadd.f32 %v1253_v46, %v1191_v10  ;;  %v2308_v59 = vld [vmem:[#allocation5_spill] sm:$0xff] }
 0x1c8   : > { %v1208_v42 = vmul.f32 %v2308_v59, %v2308_v59  ;;  %v2316_v10 = vld [vmem:[#allocation13_spill] sm:$0xff] }
 0x1c9   : > { %v1125_v19 = vadd.f32 %v1124_v15, %v1899_v63  ;;  %v1255_v52 = vadd.f32 %v1254_v5, %v1192_v14  ;;  %v2309_v63 = vld [vmem:[#allocation6_spill] sm:$0xff] }
 0x1cb   : > { %v1126_v23 = vadd.f32 %v1125_v19, %v1907_v3  ;;  %v1256_v40 = vadd.f32 %v1255_v52, %v1193_v44  ;;  %v2310_v3 = vld [vmem:[#allocation7_spill] sm:$0xff] }
 0x1cd   : > { %v1127_v27 = vadd.f32 %v1126_v23, %v1915_v7  ;;  %v1257_v22 = vadd.f32 %v1256_v40, %v1194_v18  ;;  %v2311_v7 = vld [vmem:[#allocation8_spill] sm:$0xff]  ;;  %v1209_v23 = vmul.f32 %v2309_v63, %v2309_v63 }
 0x1cf   : > { %v1128_v31 = vadd.f32 %v1127_v27, %v1923_v13  ;;  %v1258_v4 = vadd.f32 %v1257_v22, %v1195_v50  ;;  %v2312_v13 = vld [vmem:[#allocation9_spill] sm:$0xff]  ;;  %v1210_v27 = vmul.f32 %v2310_v3, %v2310_v3 }
 0x1d1   : > { %v1129_v35 = vadd.f32 %v1128_v31, %v1931_v21  ;;  %v1259_v16 = vadd.f32 %v1258_v4, %v1196_v60  ;;  %v2313_v21 = vld [vmem:[#allocation10_spill] sm:$0xff]  ;;  %v1211_v31 = vmul.f32 %v2311_v7, %v2311_v7 }
 0x1d2   : > { %v1080_v4 = vld [vmem:[%s2267_s3] sm:$0x1] }
 0x1d3   : > { %v1130_v39 = vadd.f32 %v1129_v35, %v1939_v29  ;;  %v1260_v32 = vadd.f32 %v1259_v16, %v1197_v54  ;;  %v2314_v29 = vld [vmem:[#allocation11_spill] sm:$0xff]  ;;  %v1212_v35 = vmul.f32 %v2312_v13, %v2312_v13 }
 0x1d5   : > { %v1131_v43 = vadd.f32 %v1130_v39, %v1947_v37  ;;  %v1261_v48 = vadd.f32 %v1260_v32, %v1198_v57  ;;  %v2315_v37 = vld [vmem:[#allocation12_spill] sm:$0xff]  ;;  %v1213_v39 = vmul.f32 %v2313_v21, %v2313_v21 }
 0x1d7   : > { %v1132_v61 = vadd.f32 %v1131_v43, %v2305_v47  ;;  %v1262_v0 = vadd.f32 %v1261_v48, %v1199_v26  ;;  %v1214_v43 = vmul.f32 %v2314_v29, %v2314_v29 }
 0x1d9   : > { %v1133_v58 = vadd.f32 %v1132_v61, %v2306_v51  ;;  %v1263_v24 = vadd.f32 %v1262_v0, %v1200_v62  ;;  %v1215_v61 = vmul.f32 %v2315_v37, %v2315_v37  ;;  %v1216_v51 = vmul.f32 %v2316_v10, %v2316_v10 }
 0x1db   : > { %v1134_v41 = vadd.f32 %v1133_v58, %v2307_v55  ;;  %v1264_v56 = vadd.f32 %v1263_v24, %v1201_v30 }
 0x1dd   : > { %v1135_v8 = vadd.f32 %v1134_v41, %v2308_v59  ;;  %v1265_v1 = vadd.f32 %v1264_v56, %v1202_v53 }
 0x1df   : > { %v1136_v2 = vadd.f32 %v1135_v8, %v2309_v63  ;;  %v1266_v25 = vadd.f32 %v1265_v1, %v1203_v6  ;;  %v1152_v8 = vld [vmem:[%s2268_s4] sm:$0x1] }
 0x1e1   : > { %v1137_v33 = vadd.f32 %v1136_v2, %v2310_v3  ;;  %v1267_v11 = vadd.f32 %v1266_v25, %v1204_v9 }
 0x1e3   : > { %v1138_v34 = vadd.f32 %v1137_v33, %v2311_v7  ;;  %v1268_v15 = vadd.f32 %v1267_v11, %v1205_v49 }
 0x1e5   : > { %v1139_v12 = vadd.f32 %v1138_v34, %v2312_v13  ;;  %v1269_v19 = vadd.f32 %v1268_v15, %v1206_v20 }
 0x1e7   : > { %v1140_v38 = vadd.f32 %v1139_v12, %v2313_v21  ;;  %v1270_v14 = vadd.f32 %v1269_v19, %v1207_v17 }
 0x1e9   : > { %v1141_v45 = vadd.f32 %v1140_v38, %v2314_v29  ;;  %v1271_v44 = vadd.f32 %v1270_v14, %v1208_v42 }
 0x1eb   : > { %v1142_v28 = vadd.f32 %v1141_v45, %v2315_v37  ;;  %v1272_v18 = vadd.f32 %v1271_v44, %v1209_v23 }
 0x1ed   : > { %v1143_v36 = vadd.f32 %v1142_v28, %v2316_v10  ;;  %v1273_v50 = vadd.f32 %v1272_v18, %v1210_v27 }
 0x1ef   : > { %v1144_v46 = vrot.slane %v1143_v36, 4  ;;  %v1274_v60 = vadd.f32 %v1273_v50, %v1211_v31 }
 0x1f1   : > { %v1145_v5 = vadd.f32 %v1144_v46, %v1143_v36  ;;  %v1275_v54 = vadd.f32 %v1274_v60, %v1212_v35 }
 0x1f3   : > { %v1146_v52 = vrot.slane %v1145_v5, 2  ;;  %v1276_v57 = vadd.f32 %v1275_v54, %v1213_v39 }
 0x1f5   : > { %v1147_v40 = vadd.f32 %v1146_v52, %v1145_v5  ;;  %v1277_v58 = vadd.f32 %v1276_v57, %v1214_v43 }
 0x1f7   : > { %v1148_v22 = vrot.slane %v1147_v40, 1  ;;  %v1278_v26 = vadd.f32 %v1277_v58, %v1215_v61 }
 0x1f9   : > { %v1149_v47 = vadd.f32 %v1148_v22, %v1147_v40  ;;  %v1279_v32 = vadd.f32 %v1278_v26, %v1216_v51 }
 0x1fb   : > { %v1150_v16 = vadd.f32 %v1149_v47, %v1080_v4  ;;  %v1280_v55 = vrot.slane %v1279_v32, 4 }
 0x1fd   : > { %1151 = vst [vmem:[%s2267_s3] sm:$0x1] %v1150_v16  ;;  %v1281_v41 = vadd.f32 %v1280_v55, %v1279_v32 }
 0x1ff   : > { %v1282_v62 = vrot.slane %v1281_v41, 2 }
 0x201   : > { %v1283_v48 = vadd.f32 %v1282_v62, %v1281_v41 }
 0x203   : > { %v1284_v59 = vrot.slane %v1283_v48, 1 }
 0x205   : > { %v1285_v30 = vadd.f32 %v1284_v59, %v1283_v48 }
 0x207   : > { %v1286_v0 = vadd.f32 %v1285_v30, %v1152_v8 }
 0x209   : > { %1287 = vst [vmem:[%s2268_s4] sm:$0x1] %v1286_v0 }
 0x20a PF: > { %s15_s15 = sadd.s32 1, %s1614_s15  }
 0x20b   : > { %p12_p5 = scmp.ge.s32.totalorder %s15_s15, 6  }
 0x20d   :  { %14 = sbr.rel (!%p12_p5) target bundleno = 1 (0x1), region = 78 }

// kernel: decoder_forward.8
= control target key start
LH: loop header
LB: loop body
LE: loop exit
PB: predicated region body
PF: predicated region fallthrough
CT: control target
= control target key end

     0   :  { %s613_s12 = smov 0   ;;  %s900_s0 = inlined_call_operand.vmem [shape: f32[2048,128], index: 0, kind: input, shape index: {}]   ;;  %s901_s1 = inlined_call_operand.vmem [shape: f32[1,128], index: 1, kind: input, shape index: {}]   ;;  %s902_s2 = inlined_call_operand.vmem [shape: f32[1,128], index: 2, kind: input, shape index: {}]   ;;  %s903_s3 = inlined_call_operand.vmem [shape: f32[2048,128], index: 3, kind: output, shape index: {}]  }
   0x1 LB: > { %s564_s13 = sadd.s32 4294967295, %s591_s12   ;;  %p568_p0 = scmp.ge.s32.totalorder %s591_s12, 1  ;;  %s591_s12 = sphi %s613_s12, %s13_s12  }
   0x2   : > { %p138_p1 = scmp.lt.s32.totalorder %s591_s12, 5 }
   0x4   : > { %p139_p2 = pnand %p568_p0, %p138_p1 }
   0x5   : > { %s569_s14 = sshll.u32 (!%p139_p2), %s564_s13, 6 }
   0x6   : > { %142 = sbr.rel (%p139_p2) target bundleno = 68 (0x44), region = 32  ;;  %p163_p3 = scmp.lt.s32.totalorder (!%p139_p2), %s569_s14, 255 }
   0xb   : > { %s905_s14 = smov (!%p163_p3, %s569_s14), 255  ;;  %v624_v0 = vld [vmem:[%s901_s1] ss:$0 sm:$0xff] }
   0xc   : > { %s570_s15 = sshll.u32 %s905_s14, 3  ;;  %v634_v1 = vld [vmem:[%s902_s2] ss:$0 sm:$0xff] }
   0xd   : > { %s629_s20 = scalar_lea.vmem %s900_s0, %s570_s15  ;;  %s657_s25 = scalar_lea.vmem %s903_s3, %s570_s15 }
   0xe   : > { %v174_v2 = vld [vmem:[%s629_s20] sm:$0xff]  ;;  %v175_v3 = vld [vmem:[%s629_s20 + $0x8] sm:$0xff]  ;;  %v176_v4 = vld [vmem:[%s629_s20 + $0x10] sm:$0xff] }
   0xf   : > { %v245_v5 = vmul.f32 %v624_v0, %v174_v2  ;;  %v246_v6 = vmul.f32 %v624_v0, %v175_v3  ;;  %v247_v7 = vmul.f32 %v624_v0, %v176_v4  ;;  %v177_v8 = vld [vmem:[%s629_s20 + $0x18] sm:$0xff]  ;;  %v178_v9 = vld [vmem:[%s629_s20 + $0x20] sm:$0xff]  ;;  %v179_v10 = vld [vmem:[%s629_s20 + $0x28] sm:$0xff] }
  0x10   : > { %v248_v11 = vmul.f32 %v624_v0, %v177_v8  ;;  %v249_v12 = vmul.f32 %v624_v0, %v178_v9  ;;  %v250_v13 = vmul.f32 %v624_v0, %v179_v10  ;;  %v180_v14 = vld [vmem:[%s629_s20 + $0x30] sm:$0xff]  ;;  %v181_v15 = vld [vmem:[%s629_s20 + $0x38] sm:$0xff]  ;;  %v182_v24 = vld [vmem:[%s629_s20 + $0x40] sm:$0xff] }
  0x11   : > { %v316_v16 = vadd.f32 %v634_v1, %v245_v5  ;;  %v317_v17 = vadd.f32 %v634_v1, %v246_v6  ;;  %v318_v18 = vadd.f32 %v634_v1, %v247_v7  ;;  %v251_v19 = vmul.f32 %v624_v0, %v180_v14  ;;  %v183_v25 = vld [vmem:[%s629_s20 + $0x48] sm:$0xff]  ;;  %v184_v26 = vld [vmem:[%s629_s20 + $0x50] sm:$0xff]  ;;  %v185_v31 = vld [vmem:[%s629_s20 + $0x58] sm:$0xff] }
  0x12   : > { %v319_v20 = vadd.f32 %v634_v1, %v248_v11  ;;  %v320_v21 = vadd.f32 %v634_v1, %v249_v12  ;;  %v321_v22 = vadd.f32 %v634_v1, %v250_v13  ;;  %v252_v23 = vmul.f32 %v624_v0, %v181_v15  ;;  %v186_v32 = vld [vmem:[%s629_s20 + $0x60] sm:$0xff]  ;;  %v187_v33 = vld [vmem:[%s629_s20 + $0x68] sm:$0xff]  ;;  %v188_v38 = vld [vmem:[%s629_s20 + $0x70] sm:$0xff] }
  0x13   : > { %v380_v27 = vmax.f32 %v316_v16, 0.0  ;;  %v381_v28 = vmax.f32 %v317_v17, 0.0  ;;  %v382_v29 = vmax.f32 %v318_v18, 0.0  ;;  %v322_v30 = vadd.f32 %v634_v1, %v251_v19  ;;  %v189_v43 = vld [vmem:[%s629_s20 + $0x78] sm:$0xff]  ;;  %v190_v56 = vld [vmem:[%s629_s20 + $0x80] sm:$0xff]  ;;  %v191_v57 = vld [vmem:[%s629_s20 + $0x88] sm:$0xff] }
  0x14   : > { %v383_v34 = vmax.f32 %v319_v20, 0.0  ;;  %v384_v35 = vmax.f32 %v320_v21, 0.0  ;;  %v385_v36 = vmax.f32 %v321_v22, 0.0  ;;  %v323_v37 = vadd.f32 %v634_v1, %v252_v23  ;;  %v192_v58 = vld [vmem:[%s629_s20 + $0x90] sm:$0xff]  ;;  %v193_v63 = vld [vmem:[%s629_s20 + $0x98] sm:$0xff]  ;;  %v194_v2 = vld [vmem:[%s629_s20 + $0xa0] sm:$0xff] }
  0x15   : > { %444 = vst [vmem:[%s657_s25] sm:$0xff] %v380_v27  ;;  %445 = vst [vmem:[%s657_s25 + $0x8] sm:$0xff] %v381_v28  ;;  %v386_v39 = vmax.f32 %v322_v30, 0.0  ;;  %v253_v40 = vmul.f32 %v624_v0, %v182_v24  ;;  %v254_v41 = vmul.f32 %v624_v0, %v183_v25  ;;  %v255_v42 = vmul.f32 %v624_v0, %v184_v26  ;;  %v195_v3 = vld [vmem:[%s629_s20 + $0xa8] sm:$0xff]  ;;  %v196_v8 = vld [vmem:[%s629_s20 + $0xb0] sm:$0xff] }
  0x16   : > { %446 = vst [vmem:[%s657_s25 + $0x10] sm:$0xff] %v382_v29  ;;  %447 = vst [vmem:[%s657_s25 + $0x18] sm:$0xff] %v383_v34  ;;  %v387_v44 = vmax.f32 %v323_v37, 0.0  ;;  %v256_v45 = vmul.f32 %v624_v0, %v185_v31  ;;  %v257_v46 = vmul.f32 %v624_v0, %v186_v32  ;;  %v258_v47 = vmul.f32 %v624_v0, %v187_v33  ;;  %v197_v13 = vld [vmem:[%s629_s20 + $0xb8] sm:$0xff]  ;;  %v198_v26 = vld [vmem:[%s629_s20 + $0xc0] sm:$0xff] }
  0x17   : > { %448 = vst [vmem:[%s657_s25 + $0x20] sm:$0xff] %v384_v35  ;;  %449 = vst [vmem:[%s657_s25 + $0x28] sm:$0xff] %v385_v36  ;;  %v324_v48 = vadd.f32 %v634_v1, %v253_v40  ;;  %v325_v49 = vadd.f32 %v634_v1, %v254_v41  ;;  %v326_v50 = vadd.f32 %v634_v1, %v255_v42  ;;  %v199_v27 = vld [vmem:[%s629_s20 + $0xc8] sm:$0xff]  ;;  %v200_v28 = vld [vmem:[%s629_s20 + $0xd0] sm:$0xff] }
  0x18   : > { %450 = vst [vmem:[%s657_s25 + $0x30] sm:$0xff] %v386_v39  ;;  %v259_v51 = vmul.f32 %v624_v0, %v188_v38  ;;  %451 = vst [vmem:[%s657_s25 + $0x38] sm:$0xff] %v387_v44  ;;  %v327_v52 = vadd.f32 %v634_v1, %v256_v45  ;;  %v328_v53 = vadd.f32 %v634_v1, %v257_v46  ;;  %v201_v33 = vld [vmem:[%s629_s20 + $0xd8] sm:$0xff]  ;;  %v202_v34 = vld [vmem:[%s629_s20 + $0xe0] sm:$0xff] }
  0x19   : > { %v329_v54 = vadd.f32 %v634_v1, %v258_v47  ;;  %v260_v55 = vmul.f32 %v624_v0, %v189_v43  ;;  %v388_v59 = vmax.f32 %v324_v48, 0.0  ;;  %v389_v60 = vmax.f32 %v325_v49, 0.0  ;;  %v203_v35 = vld [vmem:[%s629_s20 + $0xe8] sm:$0xff]  ;;  %v204_v40 = vld [vmem:[%s629_s20 + $0xf0] sm:$0xff]  ;;  %v205_v45 = vld [vmem:[%s629_s20 + $0xf8] sm:$0xff] }
  0x1a   : > { %v390_v61 = vmax.f32 %v326_v50, 0.0  ;;  %v330_v62 = vadd.f32 %v634_v1, %v259_v51  ;;  %v391_v4 = vmax.f32 %v327_v52, 0.0  ;;  %v392_v5 = vmax.f32 %v328_v53, 0.0 }
  0x1b   : > { %v393_v6 = vmax.f32 %v329_v54, 0.0  ;;  %v331_v7 = vadd.f32 %v634_v1, %v260_v55  ;;  %452 = vst [vmem:[%s657_s25 + $0x40] sm:$0xff] %v388_v59  ;;  %453 = vst [vmem:[%s657_s25 + $0x48] sm:$0xff] %v389_v60  ;;  %v261_v10 = vmul.f32 %v624_v0, %v190_v56  ;;  %v262_v11 = vmul.f32 %v624_v0, %v191_v57  ;;  %v207_v59 = vld [vmem:[%s629_s20 + $0x108] sm:$0xff]  ;;  %v208_v60 = vld [vmem:[%s629_s20 + $0x110] sm:$0xff] }
  0x1c   : > { %454 = vst [vmem:[%s657_s25 + $0x50] sm:$0xff] %v390_v61  ;;  %v394_v9 = vmax.f32 %v330_v62, 0.0  ;;  %v263_v12 = vmul.f32 %v624_v0, %v192_v58  ;;  %455 = vst [vmem:[%s657_s25 + $0x58] sm:$0xff] %v391_v4  ;;  %v264_v15 = vmul.f32 %v624_v0, %v193_v63  ;;  %v265_v16 = vmul.f32 %v624_v0, %v194_v2  ;;  %v206_v58 = vld [vmem:[%s629_s20 + $0x100] sm:$0xff] }
  0x1d   : > { %456 = vst [vmem:[%s657_s25 + $0x60] sm:$0xff] %v392_v5  ;;  %457 = vst [vmem:[%s657_s25 + $0x68] sm:$0xff] %v393_v6  ;;  %v395_v14 = vmax.f32 %v331_v7, 0.0  ;;  %v266_v17 = vmul.f32 %v624_v0, %v195_v3  ;;  %v332_v18 = vadd.f32 %v634_v1, %v261_v10  ;;  %v333_v19 = vadd.f32 %v634_v1, %v262_v11  ;;  %v209_v3 = vld [vmem:[%s629_s20 + $0x118] sm:$0xff]  ;;  %v210_v4 = vld [vmem:[%s629_s20 + $0x120] sm:$0xff] }
  0x1e   : > { %458 = vst [vmem:[%s657_s25 + $0x70] sm:$0xff] %v394_v9  ;;  %v334_v20 = vadd.f32 %v634_v1, %v263_v12  ;;  %v267_v21 = vmul.f32 %v624_v0, %v196_v8  ;;  %v335_v22 = vadd.f32 %v634_v1, %v264_v15  ;;  %v336_v23 = vadd.f32 %v634_v1, %v265_v16  ;;  %v211_v5 = vld [vmem:[%s629_s20 + $0x128] sm:$0xff]  ;;  %v212_v10 = vld [vmem:[%s629_s20 + $0x130] sm:$0xff]  ;;  %v213_v15 = vld [vmem:[%s629_s20 + $0x138] sm:$0xff] }
  0x1f   : > { %459 = vst [vmem:[%s657_s25 + $0x78] sm:$0xff] %v395_v14  ;;  %v337_v24 = vadd.f32 %v634_v1, %v266_v17  ;;  %v268_v25 = vmul.f32 %v624_v0, %v197_v13  ;;  %v396_v29 = vmax.f32 %v332_v18, 0.0  ;;  %v397_v30 = vmax.f32 %v333_v19, 0.0 }
  0x20   : > { %v398_v31 = vmax.f32 %v334_v20, 0.0  ;;  %v338_v32 = vadd.f32 %v634_v1, %v267_v21  ;;  %v399_v36 = vmax.f32 %v335_v22, 0.0  ;;  %v400_v37 = vmax.f32 %v336_v23, 0.0 }
  0x21   : > { %v401_v38 = vmax.f32 %v337_v24, 0.0  ;;  %v339_v39 = vadd.f32 %v634_v1, %v268_v25  ;;  %460 = vst [vmem:[%s657_s25 + $0x80] sm:$0xff] %v396_v29  ;;  %461 = vst [vmem:[%s657_s25 + $0x88] sm:$0xff] %v397_v30  ;;  %v269_v42 = vmul.f32 %v624_v0, %v198_v26  ;;  %v270_v43 = vmul.f32 %v624_v0, %v199_v27  ;;  %v215_v29 = vld [vmem:[%s629_s20 + $0x148] sm:$0xff]  ;;  %v216_v30 = vld [vmem:[%s629_s20 + $0x150] sm:$0xff] }
  0x22   : > { %462 = vst [vmem:[%s657_s25 + $0x90] sm:$0xff] %v398_v31  ;;  %v402_v41 = vmax.f32 %v338_v32, 0.0  ;;  %v271_v44 = vmul.f32 %v624_v0, %v200_v28  ;;  %463 = vst [vmem:[%s657_s25 + $0x98] sm:$0xff] %v399_v36  ;;  %v272_v47 = vmul.f32 %v624_v0, %v201_v33  ;;  %v273_v48 = vmul.f32 %v624_v0, %v202_v34  ;;  %v214_v28 = vld [vmem:[%s629_s20 + $0x140] sm:$0xff] }
  0x23   : > { %464 = vst [vmem:[%s657_s25 + $0xa0] sm:$0xff] %v400_v37  ;;  %465 = vst [vmem:[%s657_s25 + $0xa8] sm:$0xff] %v401_v38  ;;  %v403_v46 = vmax.f32 %v339_v39, 0.0  ;;  %v274_v49 = vmul.f32 %v624_v0, %v203_v35  ;;  %v340_v50 = vadd.f32 %v634_v1, %v269_v42  ;;  %v341_v51 = vadd.f32 %v634_v1, %v270_v43  ;;  %v217_v35 = vld [vmem:[%s629_s20 + $0x158] sm:$0xff]  ;;  %v218_v36 = vld [vmem:[%s629_s20 + $0x160] sm:$0xff] }
  0x24   : > { %466 = vst [vmem:[%s657_s25 + $0xb0] sm:$0xff] %v402_v41  ;;  %v342_v52 = vadd.f32 %v634_v1, %v271_v44  ;;  %v275_v53 = vmul.f32 %v624_v0, %v204_v40  ;;  %v343_v54 = vadd.f32 %v634_v1, %v272_v47  ;;  %v344_v55 = vadd.f32 %v634_v1, %v273_v48  ;;  %v219_v37 = vld [vmem:[%s629_s20 + $0x168] sm:$0xff]  ;;  %v220_v42 = vld [vmem:[%s629_s20 + $0x170] sm:$0xff]  ;;  %v221_v47 = vld [vmem:[%s629_s20 + $0x178] sm:$0xff] }
  0x25   : > { %467 = vst [vmem:[%s657_s25 + $0xb8] sm:$0xff] %v403_v46  ;;  %v345_v56 = vadd.f32 %v634_v1, %v274_v49  ;;  %v276_v57 = vmul.f32 %v624_v0, %v205_v45  ;;  %v404_v61 = vmax.f32 %v340_v50, 0.0  ;;  %v405_v62 = vmax.f32 %v341_v51, 0.0 }
  0x26   : > { %v406_v63 = vmax.f32 %v342_v52, 0.0  ;;  %v346_v2 = vadd.f32 %v634_v1, %v275_v53  ;;  %v407_v6 = vmax.f32 %v343_v54, 0.0  ;;  %v408_v7 = vmax.f32 %v344_v55, 0.0 }
  0x27   : > { %v409_v8 = vmax.f32 %v345_v56, 0.0  ;;  %v347_v9 = vadd.f32 %v634_v1, %v276_v57  ;;  %468 = vst [vmem:[%s657_s25 + $0xc0] sm:$0xff] %v404_v61  ;;  %469 = vst [vmem:[%s657_s25 + $0xc8] sm:$0xff] %v405_v62  ;;  %v277_v12 = vmul.f32 %v624_v0, %v206_v58  ;;  %v278_v13 = vmul.f32 %v624_v0, %v207_v59  ;;  %v223_v61 = vld [vmem:[%s629_s20 + $0x188] sm:$0xff]  ;;  %v224_v62 = vld [vmem:[%s629_s20 + $0x190] sm:$0xff] }
  0x28   : > { %470 = vst [vmem:[%s657_s25 + $0xd0] sm:$0xff] %v406_v63  ;;  %v410_v11 = vmax.f32 %v346_v2, 0.0  ;;  %v279_v14 = vmul.f32 %v624_v0, %v208_v60  ;;  %471 = vst [vmem:[%s657_s25 + $0xd8] sm:$0xff] %v407_v6  ;;  %v280_v17 = vmul.f32 %v624_v0, %v209_v3  ;;  %v281_v18 = vmul.f32 %v624_v0, %v210_v4  ;;  %v222_v60 = vld [vmem:[%s629_s20 + $0x180] sm:$0xff] }
  0x29   : > { %472 = vst [vmem:[%s657_s25 + $0xe0] sm:$0xff] %v408_v7  ;;  %473 = vst [vmem:[%s657_s25 + $0xe8] sm:$0xff] %v409_v8  ;;  %v411_v16 = vmax.f32 %v347_v9, 0.0  ;;  %v282_v19 = vmul.f32 %v624_v0, %v211_v5  ;;  %v348_v20 = vadd.f32 %v634_v1, %v277_v12  ;;  %v349_v21 = vadd.f32 %v634_v1, %v278_v13  ;;  %v225_v5 = vld [vmem:[%s629_s20 + $0x198] sm:$0xff]  ;;  %v226_v6 = vld [vmem:[%s629_s20 + $0x1a0] sm:$0xff] }
  0x2a   : > { %474 = vst [vmem:[%s657_s25 + $0xf0] sm:$0xff] %v410_v11  ;;  %v350_v22 = vadd.f32 %v634_v1, %v279_v14  ;;  %v283_v23 = vmul.f32 %v624_v0, %v212_v10  ;;  %v351_v24 = vadd.f32 %v634_v1, %v280_v17  ;;  %v352_v25 = vadd.f32 %v634_v1, %v281_v18  ;;  %v227_v7 = vld [vmem:[%s629_s20 + $0x1a8] sm:$0xff]  ;;  %v228_v12 = vld [vmem:[%s629_s20 + $0x1b0] sm:$0xff]  ;;  %v229_v17 = vld [vmem:[%s629_s20 + $0x1b8] sm:$0xff] }
  0x2b   : > { %475 = vst [vmem:[%s657_s25 + $0xf8] sm:$0xff] %v411_v16  ;;  %v353_v26 = vadd.f32 %v634_v1, %v282_v19  ;;  %v284_v27 = vmul.f32 %v624_v0, %v213_v15  ;;  %v412_v31 = vmax.f32 %v348_v20, 0.0  ;;  %v413_v32 = vmax.f32 %v349_v21, 0.0 }
  0x2c   : > { %v414_v33 = vmax.f32 %v350_v22, 0.0  ;;  %v354_v34 = vadd.f32 %v634_v1, %v283_v23  ;;  %v415_v38 = vmax.f32 %v351_v24, 0.0  ;;  %v416_v39 = vmax.f32 %v352_v25, 0.0 }
  0x2d   : > { %v417_v40 = vmax.f32 %v353_v26, 0.0  ;;  %v355_v41 = vadd.f32 %v634_v1, %v284_v27  ;;  %476 = vst [vmem:[%s657_s25 + $0x100] sm:$0xff] %v412_v31  ;;  %477 = vst [vmem:[%s657_s25 + $0x108] sm:$0xff] %v413_v32  ;;  %v285_v44 = vmul.f32 %v624_v0, %v214_v28  ;;  %v286_v45 = vmul.f32 %v624_v0, %v215_v29  ;;  %v231_v31 = vld [vmem:[%s629_s20 + $0x1c8] sm:$0xff]  ;;  %v232_v32 = vld [vmem:[%s629_s20 + $0x1d0] sm:$0xff] }
  0x2e   : > { %478 = vst [vmem:[%s657_s25 + $0x110] sm:$0xff] %v414_v33  ;;  %v418_v43 = vmax.f32 %v354_v34, 0.0  ;;  %v287_v46 = vmul.f32 %v624_v0, %v216_v30  ;;  %479 = vst [vmem:[%s657_s25 + $0x118] sm:$0xff] %v415_v38  ;;  %v288_v49 = vmul.f32 %v624_v0, %v217_v35  ;;  %v289_v50 = vmul.f32 %v624_v0, %v218_v36  ;;  %v230_v30 = vld [vmem:[%s629_s20 + $0x1c0] sm:$0xff] }
  0x2f   : > { %480 = vst [vmem:[%s657_s25 + $0x120] sm:$0xff] %v416_v39  ;;  %481 = vst [vmem:[%s657_s25 + $0x128] sm:$0xff] %v417_v40  ;;  %v419_v48 = vmax.f32 %v355_v41, 0.0  ;;  %v290_v51 = vmul.f32 %v624_v0, %v219_v37  ;;  %v356_v52 = vadd.f32 %v634_v1, %v285_v44  ;;  %v357_v53 = vadd.f32 %v634_v1, %v286_v45  ;;  %v233_v37 = vld [vmem:[%s629_s20 + $0x1d8] sm:$0xff]  ;;  %v234_v38 = vld [vmem:[%s629_s20 + $0x1e0] sm:$0xff] }
  0x30   : > { %482 = vst [vmem:[%s657_s25 + $0x130] sm:$0xff] %v418_v43  ;;  %v358_v54 = vadd.f32 %v634_v1, %v287_v46  ;;  %v291_v55 = vmul.f32 %v624_v0, %v220_v42  ;;  %v359_v56 = vadd.f32 %v634_v1, %v288_v49  ;;  %v360_v57 = vadd.f32 %v634_v1, %v289_v50  ;;  %v235_v39 = vld [vmem:[%s629_s20 + $0x1e8] sm:$0xff]  ;;  %v236_v44 = vld [vmem:[%s629_s20 + $0x1f0] sm:$0xff]  ;;  %v237_v49 = vld [vmem:[%s629_s20 + $0x1f8] sm:$0xff] }
  0x31   : > { %483 = vst [vmem:[%s657_s25 + $0x138] sm:$0xff] %v419_v48  ;;  %v361_v58 = vadd.f32 %v634_v1, %v290_v51  ;;  %v292_v59 = vmul.f32 %v624_v0, %v221_v47  ;;  %v420_v63 = vmax.f32 %v356_v52, 0.0  ;;  %v421_v2 = vmax.f32 %v357_v53, 0.0 }
  0x32   : > { %v422_v3 = vmax.f32 %v358_v54, 0.0  ;;  %v362_v4 = vadd.f32 %v634_v1, %v291_v55  ;;  %v423_v8 = vmax.f32 %v359_v56, 0.0  ;;  %v424_v9 = vmax.f32 %v360_v57, 0.0 }
  0x33   : > { %v425_v10 = vmax.f32 %v361_v58, 0.0  ;;  %v363_v11 = vadd.f32 %v634_v1, %v292_v59  ;;  %484 = vst [vmem:[%s657_s25 + $0x140] sm:$0xff] %v420_v63  ;;  %485 = vst [vmem:[%s657_s25 + $0x148] sm:$0xff] %v421_v2  ;;  %v293_v14 = vmul.f32 %v624_v0, %v222_v60  ;;  %v294_v15 = vmul.f32 %v624_v0, %v223_v61 }
  0x34   : > { %486 = vst [vmem:[%s657_s25 + $0x150] sm:$0xff] %v422_v3  ;;  %v426_v13 = vmax.f32 %v362_v4, 0.0  ;;  %v295_v16 = vmul.f32 %v624_v0, %v224_v62  ;;  %487 = vst [vmem:[%s657_s25 + $0x158] sm:$0xff] %v423_v8  ;;  %v296_v19 = vmul.f32 %v624_v0, %v225_v5  ;;  %v297_v20 = vmul.f32 %v624_v0, %v226_v6 }
  0x35   : > { %488 = vst [vmem:[%s657_s25 + $0x160] sm:$0xff] %v424_v9  ;;  %489 = vst [vmem:[%s657_s25 + $0x168] sm:$0xff] %v425_v10  ;;  %v427_v18 = vmax.f32 %v363_v11, 0.0  ;;  %v298_v21 = vmul.f32 %v624_v0, %v227_v7  ;;  %v364_v22 = vadd.f32 %v634_v1, %v293_v14  ;;  %v365_v23 = vadd.f32 %v634_v1, %v294_v15 }
  0x36   : > { %490 = vst [vmem:[%s657_s25 + $0x170] sm:$0xff] %v426_v13  ;;  %v366_v24 = vadd.f32 %v634_v1, %v295_v16  ;;  %v299_v25 = vmul.f32 %v624_v0, %v228_v12  ;;  %v367_v26 = vadd.f32 %v634_v1, %v296_v19  ;;  %v368_v27 = vadd.f32 %v634_v1, %v297_v20 }
  0x37   : > { %491 = vst [vmem:[%s657_s25 + $0x178] sm:$0xff] %v427_v18  ;;  %v369_v28 = vadd.f32 %v634_v1, %v298_v21  ;;  %v300_v29 = vmul.f32 %v624_v0, %v229_v17  ;;  %v428_v33 = vmax.f32 %v364_v22, 0.0  ;;  %v429_v34 = vmax.f32 %v365_v23, 0.0 }
  0x38   : > { %v430_v35 = vmax.f32 %v366_v24, 0.0  ;;  %v370_v36 = vadd.f32 %v634_v1, %v299_v25  ;;  %v431_v40 = vmax.f32 %v367_v26, 0.0  ;;  %v432_v41 = vmax.f32 %v368_v27, 0.0 }
  0x39   : > { %v433_v42 = vmax.f32 %v369_v28, 0.0  ;;  %v371_v43 = vadd.f32 %v634_v1, %v300_v29  ;;  %492 = vst [vmem:[%s657_s25 + $0x180] sm:$0xff] %v428_v33  ;;  %493 = vst [vmem:[%s657_s25 + $0x188] sm:$0xff] %v429_v34  ;;  %v301_v46 = vmul.f32 %v624_v0, %v230_v30  ;;  %v302_v47 = vmul.f32 %v624_v0, %v231_v31 }
  0x3a   : > { %494 = vst [vmem:[%s657_s25 + $0x190] sm:$0xff] %v430_v35  ;;  %v434_v45 = vmax.f32 %v370_v36, 0.0  ;;  %v303_v48 = vmul.f32 %v624_v0, %v232_v32  ;;  %495 = vst [vmem:[%s657_s25 + $0x198] sm:$0xff] %v431_v40  ;;  %v304_v51 = vmul.f32 %v624_v0, %v233_v37  ;;  %v305_v52 = vmul.f32 %v624_v0, %v234_v38 }
  0x3b   : > { %496 = vst [vmem:[%s657_s25 + $0x1a0] sm:$0xff] %v432_v41  ;;  %497 = vst [vmem:[%s657_s25 + $0x1a8] sm:$0xff] %v433_v42  ;;  %v435_v50 = vmax.f32 %v371_v43, 0.0  ;;  %v306_v53 = vmul.f32 %v624_v0, %v235_v39  ;;  %v372_v54 = vadd.f32 %v634_v1, %v301_v46  ;;  %v373_v55 = vadd.f32 %v634_v1, %v302_v47 }
  0x3c   : > { %498 = vst [vmem:[%s657_s25 + $0x1b0] sm:$0xff] %v434_v45  ;;  %v374_v56 = vadd.f32 %v634_v1, %v303_v48  ;;  %v307_v57 = vmul.f32 %v624_v0, %v236_v44  ;;  %v375_v58 = vadd.f32 %v634_v1, %v304_v51  ;;  %v376_v59 = vadd.f32 %v634_v1, %v305_v52 }
  0x3d   : > { %499 = vst [vmem:[%s657_s25 + $0x1b8] sm:$0xff] %v435_v50  ;;  %v377_v60 = vadd.f32 %v634_v1, %v306_v53  ;;  %v308_v61 = vmul.f32 %v624_v0, %v237_v49  ;;  %v436_v62 = vmax.f32 %v372_v54, 0.0  ;;  %v437_v63 = vmax.f32 %v373_v55, 0.0 }
  0x3e   : > { %v438_v2 = vmax.f32 %v374_v56, 0.0  ;;  %v378_v3 = vadd.f32 %v634_v1, %v307_v57  ;;  %v439_v4 = vmax.f32 %v375_v58, 0.0  ;;  %v440_v5 = vmax.f32 %v376_v59, 0.0 }
  0x3f   : > { %v441_v6 = vmax.f32 %v377_v60, 0.0  ;;  %v379_v7 = vadd.f32 %v634_v1, %v308_v61  ;;  %500 = vst [vmem:[%s657_s25 + $0x1c0] sm:$0xff] %v436_v62  ;;  %501 = vst [vmem:[%s657_s25 + $0x1c8] sm:$0xff] %v437_v63 }
  0x40   : > { %502 = vst [vmem:[%s657_s25 + $0x1d0] sm:$0xff] %v438_v2  ;;  %v442_v8 = vmax.f32 %v378_v3, 0.0  ;;  %503 = vst [vmem:[%s657_s25 + $0x1d8] sm:$0xff] %v439_v4 }
  0x41   : > { %504 = vst [vmem:[%s657_s25 + $0x1e0] sm:$0xff] %v440_v5  ;;  %505 = vst [vmem:[%s657_s25 + $0x1e8] sm:$0xff] %v441_v6  ;;  %v443_v0 = vmax.f32 %v379_v7, 0.0 }
  0x42   : > { %506 = vst [vmem:[%s657_s25 + $0x1f0] sm:$0xff] %v442_v8 }
  0x43   : > { %507 = vst [vmem:[%s657_s25 + $0x1f8] sm:$0xff] %v443_v0 }
  0x44 PF: > { %s13_s12 = sadd.s32 1, %s591_s12  }
  0x45   : > { %p10_p4 = scmp.ge.s32.totalorder %s13_s12, 6  }
  0x47   :  { %12 = sbr.rel (!%p10_p4) target bundleno = 1 (0x1), region = 62 }

// kernel: decoder_forward.9
= control target key start
LH: loop header
LB: loop body
LE: loop exit
PB: predicated region body
PF: predicated region fallthrough
CT: control target
= control target key end

     0   :  { %s1477_s15 = smov 0   ;;  %s2051_s0 = inlined_call_operand.vmem [shape: bf16[2048,72], index: 0, kind: input, shape index: {}]   ;;  %s2052_s1 = inlined_call_operand.vmem [shape: bf16[72,128], index: 1, kind: input, shape index: {}]   ;;  %s2053_s2 = inlined_call_operand.vmem [shape: f32[2048,128], index: 2, kind: output, shape index: {0}]   ;;  %s2054_s3 = inlined_call_operand.vmem [shape: f32[1,128], index: 3, kind: output, shape index: {1}]   ;;  %s2055_s4 = inlined_call_operand.vmem [shape: f32[1,128], index: 4, kind: output, shape index: {2}]  }
   0x1 LB: > { %s1193_s16 = sadd.s32 4294967295, %s1449_s15   ;;  %p1197_p0 = scmp.ge.s32.totalorder %s1449_s15, 1  ;;  %s1449_s15 = sphi %s1477_s15, %s15_s15  }
   0x2   : > { %p158_p1 = scmp.lt.s32.totalorder %s1449_s15, 5 }
   0x4   : > { %p159_p2 = pnand %p1197_p0, %p158_p1 }
   0x6   : > { %162 = sbr.rel (%p159_p2) target bundleno = 444 (0x1bc), region = 28 }
   0xb   : > { %v1406_v0 = vld [vmem:[%s2052_s1 + $0x20] ss:$0 sps:$4 sm:$0xff]   ;;  %vm554_vm0 = vcmask 1043456   ;;  %v1407_v1 = vld [vmem:[%s2052_s1 + $0x18] sm:$0xff]   ;;  %s1198_s21 = sshll.u32 %s1193_s16, 6  ;;  %v1408_v3 = vld [vmem:[%s2052_s1 + $0x10] sm:$0xff]  }
   0xc   : > { %1395 = vmatprep.subr.msk.bf16.mxu0 %vm554_vm0, %v1406_v0  ;;  %1396 = vmatprep.subr.msk.bf16.mxu1 %vm554_vm0, %v1406_v0  ;;  %v556_v2 = vsel %vm554_vm0, %v1406_v0, 0  ;;  %p185_p3 = scmp.lt.s32.totalorder %s1198_s21, 255  ;;  %v1409_v4 = vld [vmem:[%s2052_s1 + $0x8] sm:$0xff]   ;;  %vm457_vm1 = vcmask 588800   ;;  %v1410_v7 = vld [vmem:[%s2052_s1] sm:$0xff]   ;;  %p1271_p4 = scmp.ne.s32.totalorder %s1193_s16, 0 }
   0xd   : > { %1312 = vmatpush3.bf16.msra.mxu0 %v556_v2  ;;  %1390 = vmatpush3.bf16.msra.mxu1 %v556_v2 }
   0xe   : > { %1313 = vmatprep.subr.bf16.mxu0 %v1407_v1  ;;  %1386 = vmatprep.subr.bf16.mxu1 %v1407_v1  ;;  %s2105_s21 = smov (!%p185_p3, %s1198_s21), 255 }
   0xf   : > { %s1199_s26 = sshll.u32 %s2105_s21, 2  ;;  %s1201_s6 = sshll.u32 %s2105_s21, 3 }
  0x10   : > { %s1505_s29 = scalar_lea.vmem %s2051_s0, %s1199_s26  ;;  %s1578_s9 = scalar_lea.vmem %s2053_s2, %s1201_s6 }
  0x11   : > { %1314 = vmatpush3.bf16.msra.mxu0 %v1407_v1  ;;  %1391 = vmatpush3.bf16.msra.mxu1 %v1407_v1  ;;  %v1411_v5 = vld [vmem:[%s1505_s29] sm:$0xff]   ;;  %v1413_v8 = vld [vmem:[%s1505_s29 + $0x8] sm:$0xff]   ;;  %v1415_v10 = vld [vmem:[%s1505_s29 + $0x10] sm:$0xff]  }
  0x12   : > { %1315 = vmatprep.subr.bf16.mxu0 %v1408_v3  ;;  %1387 = vmatprep.subr.bf16.mxu1 %v1408_v3  ;;  %v1412_v6 = vld [vmem:[%s1505_s29 + $0x80] sm:$0xff]   ;;  %v1414_v9 = vld [vmem:[%s1505_s29 + $0x88] sm:$0xff]   ;;  %v1416_v11 = vld [vmem:[%s1505_s29 + $0x90] sm:$0xff]  }
  0x13   : > { %1321 = vmatprep.mubr.msk.bf16.mxu0 %vm457_vm1, %v1411_v5  ;;  %1353 = vmatprep.mubr.msk.bf16.mxu1 %vm457_vm1, %v1412_v6  ;;  %v1417_v12 = vld [vmem:[%s1505_s29 + $0x18] sm:$0xff]   ;;  %v1419_v14 = vld [vmem:[%s1505_s29 + $0x20] sm:$0xff]   ;;  %v1421_v16 = vld [vmem:[%s1505_s29 + $0x28] sm:$0xff]  }
  0x14   : > { %v1418_v13 = vld [vmem:[%s1505_s29 + $0x98] sm:$0xff]   ;;  %v1420_v15 = vld [vmem:[%s1505_s29 + $0xa0] sm:$0xff]   ;;  %v1422_v17 = vld [vmem:[%s1505_s29 + $0xa8] sm:$0xff]  }
  0x15   : > { %1316 = vmatpush3.bf16.msra.mxu0 %v1408_v3  ;;  %1392 = vmatpush3.bf16.msra.mxu1 %v1408_v3  ;;  %v1423_v18 = vld [vmem:[%s1505_s29 + $0x30] sm:$0xff]   ;;  %v1425_v20 = vld [vmem:[%s1505_s29 + $0x38] sm:$0xff]   ;;  %v1427_v22 = vld [vmem:[%s1505_s29 + $0x40] sm:$0xff]  }
  0x16   : > { %1317 = vmatprep.subr.bf16.mxu0 %v1409_v4  ;;  %1388 = vmatprep.subr.bf16.mxu1 %v1409_v4  ;;  %v1424_v19 = vld [vmem:[%s1505_s29 + $0xb0] sm:$0xff]   ;;  %v1426_v21 = vld [vmem:[%s1505_s29 + $0xb8] sm:$0xff]   ;;  %v1428_v23 = vld [vmem:[%s1505_s29 + $0xc0] sm:$0xff]  }
  0x17   : > { %v1429_v24 = vld [vmem:[%s1505_s29 + $0x48] sm:$0xff]   ;;  %v1431_v26 = vld [vmem:[%s1505_s29 + $0x50] sm:$0xff]   ;;  %v1433_v28 = vld [vmem:[%s1505_s29 + $0x58] sm:$0xff]  }
  0x18   : > { %v1430_v25 = vld [vmem:[%s1505_s29 + $0xc8] sm:$0xff]   ;;  %v1432_v27 = vld [vmem:[%s1505_s29 + $0xd0] sm:$0xff]   ;;  %v1434_v29 = vld [vmem:[%s1505_s29 + $0xd8] sm:$0xff]  }
  0x19   : > { %1318 = vmatpush3.bf16.msra.mxu0 %v1409_v4  ;;  %1393 = vmatpush3.bf16.msra.mxu1 %v1409_v4  ;;  %v1435_v30 = vld [vmem:[%s1505_s29 + $0x60] sm:$0xff]   ;;  %v1437_v32 = vld [vmem:[%s1505_s29 + $0x68] sm:$0xff]   ;;  %v1439_v34 = vld [vmem:[%s1505_s29 + $0x70] sm:$0xff]  }
  0x1a   : > { %1319 = vmatprep.subr.bf16.mxu0 %v1410_v7  ;;  %1389 = vmatprep.subr.bf16.mxu1 %v1410_v7  ;;  %v1436_v31 = vld [vmem:[%s1505_s29 + $0xe0] sm:$0xff]   ;;  %v1438_v33 = vld [vmem:[%s1505_s29 + $0xe8] sm:$0xff]   ;;  %v1440_v35 = vld [vmem:[%s1505_s29 + $0xf0] sm:$0xff]  }
  0x1b   : > { %v1441_v36 = vld [vmem:[%s1505_s29 + $0x78] sm:$0xff]  }
  0x1c   : > { %v1442_v37 = vld [vmem:[%s1505_s29 + $0xf8] sm:$0xff]  }
  0x1d   : > { %1320 = vmatpush3.bf16.msra.mxu0 %v1410_v7  ;;  %1394 = vmatpush3.bf16.msra.mxu1 %v1410_v7 }
  0x20   : > { %1322 = vmatmul.mubr.msk.bf16.vlgmr.msra.gmra.mxu0 %vm457_vm1, %v1413_v8  ;;  %1354 = vmatmul.mubr.msk.bf16.vlgmr.msra.gmra.mxu1 %vm457_vm1, %v1414_v9 }
  0x21   : > { %1325 = vmatprep.mubr.msk.bf16.mxu0 %vm457_vm1, %v1415_v10  ;;  %1357 = vmatprep.mubr.msk.bf16.mxu1 %vm457_vm1, %v1416_v11 }
  0x28   : > { %1326 = vmatmul.mubr.msk.bf16.gmra.mxu0 %vm457_vm1, %v1417_v12  ;;  %1358 = vmatmul.mubr.msk.bf16.gmra.mxu1 %vm457_vm1, %v1418_v13 }
  0x29   : > { %1329 = vmatprep.mubr.msk.bf16.mxu0 %vm457_vm1, %v1419_v14  ;;  %1361 = vmatprep.mubr.msk.bf16.mxu1 %vm457_vm1, %v1420_v15 }
  0x30   : > { %1330 = vmatmul.mubr.msk.bf16.gmra.mxu0 %vm457_vm1, %v1421_v16  ;;  %1362 = vmatmul.mubr.msk.bf16.gmra.mxu1 %vm457_vm1, %v1422_v17 }
  0x31   : > { %1333 = vmatprep.mubr.msk.bf16.mxu0 %vm457_vm1, %v1423_v18  ;;  %1365 = vmatprep.mubr.msk.bf16.mxu1 %vm457_vm1, %v1424_v19 }
  0x38   : > { %1334 = vmatmul.mubr.msk.bf16.gmra.mxu0 %vm457_vm1, %v1425_v20  ;;  %1366 = vmatmul.mubr.msk.bf16.gmra.mxu1 %vm457_vm1, %v1426_v21 }
  0x39   : > { %1337 = vmatprep.mubr.msk.bf16.mxu0 %vm457_vm1, %v1427_v22  ;;  %1369 = vmatprep.mubr.msk.bf16.mxu1 %vm457_vm1, %v1428_v23 }
  0x40   : > { %1338 = vmatmul.mubr.msk.bf16.gmra.mxu0 %vm457_vm1, %v1429_v24  ;;  %1370 = vmatmul.mubr.msk.bf16.gmra.mxu1 %vm457_vm1, %v1430_v25 }
  0x41   : > { %1341 = vmatprep.mubr.msk.bf16.mxu0 %vm457_vm1, %v1431_v26  ;;  %1373 = vmatprep.mubr.msk.bf16.mxu1 %vm457_vm1, %v1432_v27 }
  0x48   : > { %1342 = vmatmul.mubr.msk.bf16.gmra.mxu0 %vm457_vm1, %v1433_v28  ;;  %1374 = vmatmul.mubr.msk.bf16.gmra.mxu1 %vm457_vm1, %v1434_v29 }
  0x49   : > { %1345 = vmatprep.mubr.msk.bf16.mxu0 %vm457_vm1, %v1435_v30  ;;  %1377 = vmatprep.mubr.msk.bf16.mxu1 %vm457_vm1, %v1436_v31 }
  0x50   : > { %1346 = vmatmul.mubr.msk.bf16.gmra.mxu0 %vm457_vm1, %v1437_v32  ;;  %1378 = vmatmul.mubr.msk.bf16.gmra.mxu1 %vm457_vm1, %v1438_v33 }
  0x51   : > { %1349 = vmatprep.mubr.msk.bf16.mxu0 %vm457_vm1, %v1439_v34  ;;  %1381 = vmatprep.mubr.msk.bf16.mxu1 %vm457_vm1, %v1440_v35 }
  0x58   : > { %1350 = vmatmul.mubr.msk.bf16.gmra.mxu0 %vm457_vm1, %v1441_v36  ;;  %1382 = vmatmul.mubr.msk.bf16.gmra.mxu1 %vm457_vm1, %v1442_v37 }
  0xe0   : > { %v1580_v38 = vpop.f32.mrf.mxu0  ;;  %v1582_v39 = vpop.f32.mrf.mxu1 }
  0xe1   : > { %849 = vst [vmem:[%s1578_s9 + $0x10] sm:$0xff] %v1580_v38  ;;  %881 = vst [vmem:[%s1578_s9 + $0x110] sm:$0xff] %v1582_v39 }
  0xe2   : > { %v1588_v40 = vpop.f32.mrf.mxu0  ;;  %v1590_v41 = vpop.f32.mrf.mxu1 }
  0xe3   : > { %847 = vst [vmem:[%s1578_s9] sm:$0xff] %v1588_v40  ;;  %879 = vst [vmem:[%s1578_s9 + $0x100] sm:$0xff] %v1590_v41 }
  0xe4   : > { %v1596_v42 = vpop.f32.mrf.mxu0  ;;  %v1598_v43 = vpop.f32.mrf.mxu1 }
  0xe5   : > { %850 = vst [vmem:[%s1578_s9 + $0x18] sm:$0xff] %v1596_v42  ;;  %882 = vst [vmem:[%s1578_s9 + $0x118] sm:$0xff] %v1598_v43 }
  0xe6   : > { %v1604_v44 = vpop.f32.mrf.mxu0  ;;  %v1606_v45 = vpop.f32.mrf.mxu1 }
  0xe7   : > { %848 = vst [vmem:[%s1578_s9 + $0x8] sm:$0xff] %v1604_v44  ;;  %880 = vst [vmem:[%s1578_s9 + $0x108] sm:$0xff] %v1606_v45 }
  0xe8   : > { %v1612_v46 = vpop.f32.mrf.mxu0  ;;  %v1614_v47 = vpop.f32.mrf.mxu1 }
  0xe9   : > { %853 = vst [vmem:[%s1578_s9 + $0x30] sm:$0xff] %v1612_v46  ;;  %885 = vst [vmem:[%s1578_s9 + $0x130] sm:$0xff] %v1614_v47 }
  0xea   : > { %v1620_v48 = vpop.f32.mrf.mxu0  ;;  %v1622_v49 = vpop.f32.mrf.mxu1 }
  0xeb   : > { %851 = vst [vmem:[%s1578_s9 + $0x20] sm:$0xff] %v1620_v48  ;;  %883 = vst [vmem:[%s1578_s9 + $0x120] sm:$0xff] %v1622_v49 }
  0xec   : > { %v1628_v50 = vpop.f32.mrf.mxu0  ;;  %v1630_v51 = vpop.f32.mrf.mxu1 }
  0xed   : > { %854 = vst [vmem:[%s1578_s9 + $0x38] sm:$0xff] %v1628_v50  ;;  %886 = vst [vmem:[%s1578_s9 + $0x138] sm:$0xff] %v1630_v51 }
  0xee   : > { %v1636_v52 = vpop.f32.mrf.mxu0  ;;  %v1638_v53 = vpop.f32.mrf.mxu1 }
  0xef   : > { %852 = vst [vmem:[%s1578_s9 + $0x28] sm:$0xff] %v1636_v52  ;;  %884 = vst [vmem:[%s1578_s9 + $0x128] sm:$0xff] %v1638_v53 }
  0xf0   : > { %v1644_v54 = vpop.f32.mrf.mxu0  ;;  %v1646_v55 = vpop.f32.mrf.mxu1 }
  0xf1   : > { %857 = vst [vmem:[%s1578_s9 + $0x50] sm:$0xff] %v1644_v54  ;;  %889 = vst [vmem:[%s1578_s9 + $0x150] sm:$0xff] %v1646_v55 }
  0xf2   : > { %v1652_v56 = vpop.f32.mrf.mxu0  ;;  %v1654_v57 = vpop.f32.mrf.mxu1 }
  0xf3   : > { %855 = vst [vmem:[%s1578_s9 + $0x40] sm:$0xff] %v1652_v56  ;;  %887 = vst [vmem:[%s1578_s9 + $0x140] sm:$0xff] %v1654_v57 }
  0xf4   : > { %v1660_v58 = vpop.f32.mrf.mxu0  ;;  %v1662_v59 = vpop.f32.mrf.mxu1 }
  0xf5   : > { %858 = vst [vmem:[%s1578_s9 + $0x58] sm:$0xff] %v1660_v58  ;;  %890 = vst [vmem:[%s1578_s9 + $0x158] sm:$0xff] %v1662_v59 }
  0xf6   : > { %v1668_v60 = vpop.f32.mrf.mxu0  ;;  %v1670_v61 = vpop.f32.mrf.mxu1 }
  0xf7   : > { %856 = vst [vmem:[%s1578_s9 + $0x48] sm:$0xff] %v1668_v60  ;;  %888 = vst [vmem:[%s1578_s9 + $0x148] sm:$0xff] %v1670_v61 }
  0xf8   : > { %v1676_v62 = vpop.f32.mrf.mxu0  ;;  %v1678_v63 = vpop.f32.mrf.mxu1 }
  0xf9   : > { %861 = vst [vmem:[%s1578_s9 + $0x70] sm:$0xff] %v1676_v62  ;;  %893 = vst [vmem:[%s1578_s9 + $0x170] sm:$0xff] %v1678_v63 }
  0xfa   : > { %v1684_v0 = vpop.f32.mrf.mxu0  ;;  %v1686_v1 = vpop.f32.mrf.mxu1 }
  0xfb   : > { %859 = vst [vmem:[%s1578_s9 + $0x60] sm:$0xff] %v1684_v0  ;;  %891 = vst [vmem:[%s1578_s9 + $0x160] sm:$0xff] %v1686_v1 }
  0xfc   : > { %v1692_v2 = vpop.f32.mrf.mxu0  ;;  %v1694_v3 = vpop.f32.mrf.mxu1 }
  0xfd   : > { %862 = vst [vmem:[%s1578_s9 + $0x78] sm:$0xff] %v1692_v2  ;;  %894 = vst [vmem:[%s1578_s9 + $0x178] sm:$0xff] %v1694_v3 }
  0xfe   : > { %v1700_v4 = vpop.f32.mrf.mxu0  ;;  %v1702_v5 = vpop.f32.mrf.mxu1 }
  0xff   : > { %860 = vst [vmem:[%s1578_s9 + $0x68] sm:$0xff] %v1700_v4  ;;  %892 = vst [vmem:[%s1578_s9 + $0x168] sm:$0xff] %v1702_v5 }
 0x100   : > { %v1708_v6 = vpop.f32.mrf.mxu0  ;;  %v1710_v7 = vpop.f32.mrf.mxu1 }
 0x101   : > { %865 = vst [vmem:[%s1578_s9 + $0x90] sm:$0xff] %v1708_v6  ;;  %897 = vst [vmem:[%s1578_s9 + $0x190] sm:$0xff] %v1710_v7 }
 0x102   : > { %v1716_v8 = vpop.f32.mrf.mxu0  ;;  %v1718_v9 = vpop.f32.mrf.mxu1 }
 0x103   : > { %863 = vst [vmem:[%s1578_s9 + $0x80] sm:$0xff] %v1716_v8  ;;  %895 = vst [vmem:[%s1578_s9 + $0x180] sm:$0xff] %v1718_v9 }
 0x104   : > { %v1724_v10 = vpop.f32.mrf.mxu0  ;;  %v1726_v11 = vpop.f32.mrf.mxu1 }
 0x105   : > { %866 = vst [vmem:[%s1578_s9 + $0x98] sm:$0xff] %v1724_v10  ;;  %898 = vst [vmem:[%s1578_s9 + $0x198] sm:$0xff] %v1726_v11 }
 0x106   : > { %v1732_v12 = vpop.f32.mrf.mxu0  ;;  %v1734_v13 = vpop.f32.mrf.mxu1 }
 0x107   : > { %864 = vst [vmem:[%s1578_s9 + $0x88] sm:$0xff] %v1732_v12  ;;  %896 = vst [vmem:[%s1578_s9 + $0x188] sm:$0xff] %v1734_v13 }
 0x108   : > { %v1740_v14 = vpop.f32.mrf.mxu0  ;;  %v1742_v15 = vpop.f32.mrf.mxu1 }
 0x109   : > { %2080 = vst [vmem:[#allocation2_spill] sm:$0xff] %v1742_v15  ;;  %869 = vst [vmem:[%s1578_s9 + $0xb0] sm:$0xff] %v1740_v14 }
 0x10a   : > { %901 = vst [vmem:[%s1578_s9 + $0x1b0] sm:$0xff] %v1742_v15  ;;  %v1748_v16 = vpop.f32.mrf.mxu0  ;;  %v1750_v17 = vpop.f32.mrf.mxu1 }
 0x10b   : > { %2081 = vst [vmem:[#allocation3_spill] sm:$0xff] %v1750_v17  ;;  %867 = vst [vmem:[%s1578_s9 + $0xa0] sm:$0xff] %v1748_v16 }
 0x10c   : > { %899 = vst [vmem:[%s1578_s9 + $0x1a0] sm:$0xff] %v1750_v17  ;;  %v1756_v18 = vpop.f32.mrf.mxu0  ;;  %v1758_v19 = vpop.f32.mrf.mxu1 }
 0x10d   : > { %2082 = vst [vmem:[#allocation4_spill] sm:$0xff] %v1758_v19  ;;  %870 = vst [vmem:[%s1578_s9 + $0xb8] sm:$0xff] %v1756_v18 }
 0x10e   : > { %902 = vst [vmem:[%s1578_s9 + $0x1b8] sm:$0xff] %v1758_v19  ;;  %v1764_v20 = vpop.f32.mrf.mxu0  ;;  %v1766_v21 = vpop.f32.mrf.mxu1 }
 0x10f   : > { %2083 = vst [vmem:[#allocation5_spill] sm:$0xff] %v1766_v21  ;;  %868 = vst [vmem:[%s1578_s9 + $0xa8] sm:$0xff] %v1764_v20 }
 0x110   : > { %900 = vst [vmem:[%s1578_s9 + $0x1a8] sm:$0xff] %v1766_v21  ;;  %v1772_v22 = vpop.f32.mrf.mxu0  ;;  %v1774_v23 = vpop.f32.mrf.mxu1 }
 0x111   : > { %2084 = vst [vmem:[#allocation6_spill] sm:$0xff] %v1774_v23  ;;  %873 = vst [vmem:[%s1578_s9 + $0xd0] sm:$0xff] %v1772_v22 }
 0x112   : > { %905 = vst [vmem:[%s1578_s9 + $0x1d0] sm:$0xff] %v1774_v23  ;;  %v1780_v24 = vpop.f32.mrf.mxu0  ;;  %v1782_v25 = vpop.f32.mrf.mxu1 }
 0x113   : > { %2085 = vst [vmem:[#allocation7_spill] sm:$0xff] %v1782_v25  ;;  %871 = vst [vmem:[%s1578_s9 + $0xc0] sm:$0xff] %v1780_v24 }
 0x114   : > { %903 = vst [vmem:[%s1578_s9 + $0x1c0] sm:$0xff] %v1782_v25  ;;  %v1788_v26 = vpop.f32.mrf.mxu0  ;;  %v1790_v27 = vpop.f32.mrf.mxu1 }
 0x115   : > { %2086 = vst [vmem:[#allocation8_spill] sm:$0xff] %v1790_v27  ;;  %874 = vst [vmem:[%s1578_s9 + $0xd8] sm:$0xff] %v1788_v26 }
 0x116   : > { %906 = vst [vmem:[%s1578_s9 + $0x1d8] sm:$0xff] %v1790_v27  ;;  %v1796_v28 = vpop.f32.mrf.mxu0  ;;  %v1798_v29 = vpop.f32.mrf.mxu1 }
 0x117   : > { %2087 = vst [vmem:[#allocation9_spill] sm:$0xff] %v1798_v29  ;;  %872 = vst [vmem:[%s1578_s9 + $0xc8] sm:$0xff] %v1796_v28 }
 0x118   : > { %904 = vst [vmem:[%s1578_s9 + $0x1c8] sm:$0xff] %v1798_v29  ;;  %v1804_v30 = vpop.f32.mrf.mxu0  ;;  %v1806_v31 = vpop.f32.mrf.mxu1 }
 0x119   : > { %2088 = vst [vmem:[#allocation10_spill] sm:$0xff] %v1806_v31  ;;  %877 = vst [vmem:[%s1578_s9 + $0xf0] sm:$0xff] %v1804_v30 }
 0x11a   : > { %909 = vst [vmem:[%s1578_s9 + $0x1f0] sm:$0xff] %v1806_v31  ;;  %v1812_v32 = vpop.f32.mrf.mxu0  ;;  %v1814_v33 = vpop.f32.mrf.mxu1 }
 0x11b   : > { %2089 = vst [vmem:[#allocation11_spill] sm:$0xff] %v1814_v33  ;;  %875 = vst [vmem:[%s1578_s9 + $0xe0] sm:$0xff] %v1812_v32 }
 0x11c   : > { %907 = vst [vmem:[%s1578_s9 + $0x1e0] sm:$0xff] %v1814_v33  ;;  %v1820_v34 = vpop.f32.mrf.mxu0  ;;  %v1822_v35 = vpop.f32.mrf.mxu1  ;;  %914 = sbr.rel (%p1271_p4) target bundleno = 291 (0x123), region = 32 }
 0x11d   : > { %2090 = vst [vmem:[#allocation12_spill] sm:$0xff] %v1822_v35  ;;  %878 = vst [vmem:[%s1578_s9 + $0xf8] sm:$0xff] %v1820_v34 }
 0x11e   : > { %910 = vst [vmem:[%s1578_s9 + $0x1f8] sm:$0xff] %v1822_v35  ;;  %v1828_v36 = vpop.f32.mrf.mxu0  ;;  %v1830_v37 = vpop.f32.mrf.mxu1 }
 0x11f   : > { %2091 = vst [vmem:[#allocation13_spill] sm:$0xff] %v1830_v37  ;;  %876 = vst [vmem:[%s1578_s9 + $0xe8] sm:$0xff] %v1828_v36 }
 0x120   : > { %908 = vst [vmem:[%s1578_s9 + $0x1e8] sm:$0xff] %v1830_v37 }
 0x121   : > { %v1451_v31 = vmov 0.0  }
 0x122   : > { %915 = vst [vmem:[%s2054_s3] sm:$0x1] %v1451_v31  ;;  %916 = vst [vmem:[%s2055_s4] sm:$0x1] %v1451_v31 }
 0x123 PF: > { %v918_v35 = vadd.f32 %v1604_v44, %v1588_v40  ;;  %v990_v31 = vmul.f32 %v1588_v40, %v1588_v40  ;;  %v991_v15 = vmul.f32 %v1604_v44, %v1604_v44  ;;  %v995_v44 = vmul.f32 %v1636_v52, %v1636_v52 }
 0x125   : > { %v919_v33 = vadd.f32 %v1580_v38, %v918_v35 }
 0x127   : > { %v920_v37 = vadd.f32 %v1596_v42, %v919_v33  ;;  %v992_v33 = vmul.f32 %v1580_v38, %v1580_v38 }
 0x129   : > { %v921_v27 = vadd.f32 %v920_v37, %v1620_v48 }
 0x12b   : > { %v922_v23 = vadd.f32 %v921_v27, %v1636_v52  ;;  %v1054_v27 = vadd.f32 %v991_v15, %v990_v31  ;;  %v997_v15 = vmul.f32 %v1628_v50, %v1628_v50 }
 0x12d   : > { %v923_v29 = vadd.f32 %v1612_v46, %v922_v23  ;;  %v993_v23 = vmul.f32 %v1596_v42, %v1596_v42  ;;  %v1055_v40 = vadd.f32 %v1054_v27, %v992_v33  ;;  %v998_v33 = vmul.f32 %v1652_v56, %v1652_v56 }
 0x12e   : > { %v1000_v27 = vmul.f32 %v1644_v54, %v1644_v54 }
 0x12f   : > { %v924_v25 = vadd.f32 %v1628_v50, %v923_v29 }
 0x131   : > { %v925_v19 = vadd.f32 %v924_v25, %v1652_v56  ;;  %v994_v25 = vmul.f32 %v1620_v48, %v1620_v48 }
 0x133   : > { %v926_v35 = vadd.f32 %v925_v19, %v1668_v60  ;;  %v1056_v19 = vadd.f32 %v1055_v40, %v993_v23  ;;  %v1002_v40 = vmul.f32 %v1684_v0, %v1684_v0 }
 0x135   : > { %v927_v37 = vadd.f32 %v1644_v54, %v926_v35  ;;  %v996_v35 = vmul.f32 %v1612_v46, %v1612_v46  ;;  %v1057_v17 = vadd.f32 %v1056_v19, %v994_v25  ;;  %v1003_v19 = vmul.f32 %v1700_v4, %v1700_v4 }
 0x137   : > { %v928_v29 = vadd.f32 %v1660_v58, %v927_v37  ;;  %v1058_v31 = vadd.f32 %v1057_v17, %v995_v44  ;;  %v1001_v17 = vmul.f32 %v1660_v58, %v1660_v58 }
 0x139   : > { %v929_v21 = vadd.f32 %v928_v29, %v1684_v0  ;;  %v1059_v37 = vadd.f32 %v1058_v31, %v996_v35  ;;  %v1004_v35 = vmul.f32 %v1676_v62, %v1676_v62 }
 0x13b   : > { %v930_v38 = vadd.f32 %v929_v21, %v1700_v4  ;;  %v999_v21 = vmul.f32 %v1668_v60, %v1668_v60  ;;  %v1060_v23 = vadd.f32 %v1059_v37, %v997_v15  ;;  %v1005_v15 = vmul.f32 %v1692_v2, %v1692_v2 }
 0x13c   : > { %v1007_v37 = vmul.f32 %v1732_v12, %v1732_v12 }
 0x13d   : > { %v931_v42 = vadd.f32 %v1676_v62, %v930_v38  ;;  %v1061_v29 = vadd.f32 %v1060_v23, %v998_v33 }
 0x13f   : > { %v932_v48 = vadd.f32 %v1692_v2, %v931_v42  ;;  %v1062_v25 = vadd.f32 %v1061_v29, %v999_v21  ;;  %v1008_v21 = vmul.f32 %v1708_v6, %v1708_v6  ;;  %v1010_v29 = vmul.f32 %v1748_v16, %v1748_v16 }
 0x141   : > { %v933_v52 = vadd.f32 %v932_v48, %v1716_v8  ;;  %v1063_v44 = vadd.f32 %v1062_v25, %v1000_v27  ;;  %v1006_v48 = vmul.f32 %v1716_v8, %v1716_v8 }
 0x143   : > { %v934_v46 = vadd.f32 %v933_v52, %v1732_v12  ;;  %v1064_v38 = vadd.f32 %v1063_v44, %v1001_v17  ;;  %v1011_v17 = vmul.f32 %v1764_v20, %v1764_v20  ;;  %v1013_v44 = vmul.f32 %v1756_v18, %v1756_v18 }
 0x145   : > { %v935_v50 = vadd.f32 %v1708_v6, %v934_v46  ;;  %v1065_v42 = vadd.f32 %v1064_v38, %v1002_v40  ;;  %v1009_v46 = vmul.f32 %v1724_v10, %v1724_v10 }
 0x147   : > { %v936_v56 = vadd.f32 %v1724_v10, %v935_v50  ;;  %v1066_v31 = vadd.f32 %v1065_v42, %v1003_v19  ;;  %v1014_v19 = vmul.f32 %v1780_v24, %v1780_v24  ;;  %v1016_v42 = vmul.f32 %v1772_v22, %v1772_v22 }
 0x149   : > { %v937_v60 = vadd.f32 %v936_v56, %v1748_v16  ;;  %v1067_v33 = vadd.f32 %v1066_v31, %v1004_v35  ;;  %v1012_v56 = vmul.f32 %v1740_v14, %v1740_v14 }
 0x14b   : > { %v938_v54 = vadd.f32 %v937_v60, %v1764_v20  ;;  %v1068_v52 = vadd.f32 %v1067_v33, %v1005_v15  ;;  %v1017_v15 = vmul.f32 %v1788_v26, %v1788_v26  ;;  %v1019_v33 = vmul.f32 %v1828_v36, %v1828_v36 }
 0x14d   : > { %v939_v58 = vadd.f32 %v1740_v14, %v938_v54  ;;  %v1069_v23 = vadd.f32 %v1068_v52, %v1006_v48  ;;  %v1015_v54 = vmul.f32 %v1796_v28, %v1796_v28 }
 0x14f   : > { %v940_v0 = vadd.f32 %v1756_v18, %v939_v58  ;;  %v1070_v27 = vadd.f32 %v1069_v23, %v1007_v37  ;;  %v1020_v37 = vmul.f32 %v1804_v30, %v1804_v30  ;;  %v1022_v23 = vmul.f32 %v1590_v41, %v1590_v41 }
 0x151   : > { %v941_v4 = vadd.f32 %v940_v0, %v1780_v24  ;;  %v1071_v50 = vadd.f32 %v1070_v27, %v1008_v21  ;;  %v1018_v0 = vmul.f32 %v1812_v32, %v1812_v32 }
 0x153   : > { %v942_v62 = vadd.f32 %v941_v4, %v1796_v28  ;;  %v1072_v25 = vadd.f32 %v1071_v50, %v1009_v46  ;;  %v1023_v46 = vmul.f32 %v1606_v45, %v1606_v45  ;;  %v1025_v50 = vmul.f32 %v1598_v43, %v1598_v43 }
 0x155   : > { %v943_v2 = vadd.f32 %v1772_v22, %v942_v62  ;;  %v1073_v40 = vadd.f32 %v1072_v25, %v1010_v29  ;;  %v1021_v62 = vmul.f32 %v1820_v34, %v1820_v34 }
 0x157   : > { %v944_v8 = vadd.f32 %v1788_v26, %v943_v2  ;;  %v1074_v60 = vadd.f32 %v1073_v40, %v1011_v17  ;;  %v1026_v17 = vmul.f32 %v1622_v49, %v1622_v49  ;;  %v1028_v40 = vmul.f32 %v1614_v47, %v1614_v47 }
 0x159   : > { %v945_v12 = vadd.f32 %v944_v8, %v1812_v32  ;;  %v1075_v38 = vadd.f32 %v1074_v60, %v1012_v56  ;;  %v1024_v8 = vmul.f32 %v1582_v39, %v1582_v39 }
 0x15b   : > { %v946_v6 = vadd.f32 %v945_v12, %v1828_v36  ;;  %v1076_v35 = vadd.f32 %v1075_v38, %v1013_v44  ;;  %v1029_v44 = vmul.f32 %v1630_v51, %v1630_v51  ;;  %v1031_v38 = vmul.f32 %v1670_v61, %v1670_v61 }
 0x15d   : > { %v947_v10 = vadd.f32 %v1804_v30, %v946_v6  ;;  %v1077_v58 = vadd.f32 %v1076_v35, %v1014_v19  ;;  %v1027_v6 = vmul.f32 %v1638_v53, %v1638_v53 }
 0x15f   : > { %v948_v16 = vadd.f32 %v1820_v34, %v947_v10  ;;  %v1078_v31 = vadd.f32 %v1077_v58, %v1015_v54  ;;  %v1032_v54 = vmul.f32 %v1646_v55, %v1646_v55  ;;  %v1034_v58 = vmul.f32 %v1686_v1, %v1686_v1 }
 0x161   : > { %v949_v20 = vadd.f32 %v948_v16, %v1590_v41  ;;  %v1079_v48 = vadd.f32 %v1078_v31, %v1016_v42  ;;  %v1030_v16 = vmul.f32 %v1654_v57, %v1654_v57  ;;  %v1035_v31 = vmul.f32 %v1702_v5, %v1702_v5 }
 0x163   : > { %v950_v14 = vadd.f32 %v949_v20, %v1606_v45  ;;  %v1080_v4 = vadd.f32 %v1079_v48, %v1017_v15  ;;  %v1036_v48 = vmul.f32 %v1678_v63, %v1678_v63 }
 0x165   : > { %v951_v18 = vadd.f32 %v1582_v39, %v950_v14  ;;  %v1081_v52 = vadd.f32 %v1080_v4, %v1018_v0  ;;  %v1033_v14 = vmul.f32 %v1662_v59, %v1662_v59  ;;  %v1037_v4 = vmul.f32 %v1694_v3, %v1694_v3 }
 0x167   : > { %v952_v24 = vadd.f32 %v1598_v43, %v951_v18  ;;  %v1082_v21 = vadd.f32 %v1081_v52, %v1019_v33  ;;  %v1038_v52 = vmul.f32 %v1718_v9, %v1718_v9 }
 0x169   : > { %v953_v28 = vadd.f32 %v952_v24, %v1622_v49  ;;  %v1083_v2 = vadd.f32 %v1082_v21, %v1020_v37  ;;  %v1039_v21 = vmul.f32 %v1734_v13, %v1734_v13 }
 0x16b   : > { %v954_v22 = vadd.f32 %v953_v28, %v1638_v53  ;;  %v1084_v27 = vadd.f32 %v1083_v2, %v1021_v62  ;;  %v1040_v2 = vmul.f32 %v1710_v7, %v1710_v7 }
 0x16d   : > { %v955_v26 = vadd.f32 %v1614_v47, %v954_v22  ;;  %v1085_v29 = vadd.f32 %v1084_v27, %v1022_v23  ;;  %v1041_v27 = vmul.f32 %v1726_v11, %v1726_v11 }
 0x16f   : > { %v956_v32 = vadd.f32 %v1630_v51, %v955_v26  ;;  %v1086_v12 = vadd.f32 %v1085_v29, %v1023_v46 }
 0x171   : > { %v957_v36 = vadd.f32 %v956_v32, %v1654_v57  ;;  %v1087_v25 = vadd.f32 %v1086_v12, %v1024_v8 }
 0x173   : > { %v958_v30 = vadd.f32 %v957_v36, %v1670_v61  ;;  %v1088_v56 = vadd.f32 %v1087_v25, %v1025_v50  ;;  %v2092_v61 = vld [vmem:[#allocation3_spill] sm:$0xff] }
 0x174   : > { %v1042_v29 = vmul.f32 %v2092_v61, %v2092_v61 }
 0x175   : > { %v959_v34 = vadd.f32 %v1646_v55, %v958_v30  ;;  %v1089_v10 = vadd.f32 %v1088_v56, %v1026_v17  ;;  %v2093_v55 = vld [vmem:[#allocation5_spill] sm:$0xff] }
 0x176   : > { %v1043_v12 = vmul.f32 %v2093_v55, %v2093_v55 }
 0x177   : > { %v960_v41 = vadd.f32 %v1662_v59, %v959_v34  ;;  %v1090_v60 = vadd.f32 %v1089_v10, %v1027_v6  ;;  %v2094_v59 = vld [vmem:[#allocation2_spill] sm:$0xff] }
 0x178   : > { %v1044_v25 = vmul.f32 %v2094_v59, %v2094_v59 }
 0x179   : > { %v961_v45 = vadd.f32 %v960_v41, %v1686_v1  ;;  %v1091_v19 = vadd.f32 %v1090_v60, %v1028_v40  ;;  %v2095_v1 = vld [vmem:[#allocation4_spill] sm:$0xff] }
 0x17a   : > { %v1045_v56 = vmul.f32 %v2095_v1, %v2095_v1  ;;  %v2103_v40 = vld [vmem:[#allocation12_spill] sm:$0xff] }
 0x17b   : > { %v962_v39 = vadd.f32 %v961_v45, %v1702_v5  ;;  %v1092_v20 = vadd.f32 %v1091_v19, %v1029_v44  ;;  %v2096_v5 = vld [vmem:[#allocation7_spill] sm:$0xff] }
 0x17d   : > { %v963_v43 = vadd.f32 %v1678_v63, %v962_v39  ;;  %v1093_v35 = vadd.f32 %v1092_v20, %v1030_v16  ;;  %v2097_v63 = vld [vmem:[#allocation9_spill] sm:$0xff] }
 0x17f   : > { %v964_v49 = vadd.f32 %v1694_v3, %v963_v43  ;;  %v1094_v42 = vadd.f32 %v1093_v35, %v1031_v38  ;;  %v2098_v3 = vld [vmem:[#allocation6_spill] sm:$0xff]  ;;  %v1046_v43 = vmul.f32 %v2096_v5, %v2096_v5 }
 0x181   : > { %v965_v53 = vadd.f32 %v964_v49, %v1718_v9  ;;  %v1095_v18 = vadd.f32 %v1094_v42, %v1032_v54  ;;  %v2099_v9 = vld [vmem:[#allocation8_spill] sm:$0xff]  ;;  %v1047_v49 = vmul.f32 %v2097_v63, %v2097_v63 }
 0x183   : > { %v966_v47 = vadd.f32 %v965_v53, %v1734_v13  ;;  %v1096_v24 = vadd.f32 %v1095_v18, %v1033_v14  ;;  %v2100_v13 = vld [vmem:[#allocation11_spill] sm:$0xff]  ;;  %v1048_v53 = vmul.f32 %v2098_v3, %v2098_v3  ;;  %v917_v18 = vld [vmem:[%s2054_s3] sm:$0x1] }
 0x185   : > { %v967_v51 = vadd.f32 %v1710_v7, %v966_v47  ;;  %v1097_v28 = vadd.f32 %v1096_v24, %v1034_v58  ;;  %v2101_v7 = vld [vmem:[#allocation13_spill] sm:$0xff]  ;;  %v1049_v47 = vmul.f32 %v2099_v9, %v2099_v9 }
 0x187   : > { %v968_v57 = vadd.f32 %v1726_v11, %v967_v51  ;;  %v1098_v22 = vadd.f32 %v1097_v28, %v1035_v31  ;;  %v2102_v11 = vld [vmem:[#allocation10_spill] sm:$0xff]  ;;  %v1050_v51 = vmul.f32 %v2100_v13, %v2100_v13 }
 0x189   : > { %v969_v15 = vadd.f32 %v968_v57, %v2092_v61  ;;  %v1099_v26 = vadd.f32 %v1098_v22, %v1036_v48  ;;  %v1051_v57 = vmul.f32 %v2101_v7, %v2101_v7 }
 0x18b   : > { %v970_v0 = vadd.f32 %v969_v15, %v2093_v55  ;;  %v1100_v32 = vadd.f32 %v1099_v26, %v1037_v4  ;;  %v1052_v15 = vmul.f32 %v2102_v11, %v2102_v11  ;;  %v1053_v55 = vmul.f32 %v2103_v40, %v2103_v40 }
 0x18d   : > { %v971_v33 = vadd.f32 %v2094_v59, %v970_v0  ;;  %v1101_v36 = vadd.f32 %v1100_v32, %v1038_v52 }
 0x18f   : > { %v972_v37 = vadd.f32 %v2095_v1, %v971_v33  ;;  %v1102_v30 = vadd.f32 %v1101_v36, %v1039_v21 }
 0x191   : > { %v973_v62 = vadd.f32 %v972_v37, %v2096_v5  ;;  %v1103_v34 = vadd.f32 %v1102_v30, %v1040_v2  ;;  %v989_v37 = vld [vmem:[%s2055_s4] sm:$0x1] }
 0x193   : > { %v974_v23 = vadd.f32 %v973_v62, %v2097_v63  ;;  %v1104_v41 = vadd.f32 %v1103_v34, %v1041_v27 }
 0x195   : > { %v975_v46 = vadd.f32 %v2098_v3, %v974_v23  ;;  %v1105_v45 = vadd.f32 %v1104_v41, %v1042_v29 }
 0x197   : > { %v976_v8 = vadd.f32 %v2099_v9, %v975_v46  ;;  %v1106_v39 = vadd.f32 %v1105_v45, %v1043_v12 }
 0x199   : > { %v977_v50 = vadd.f32 %v976_v8, %v2100_v13  ;;  %v1107_v44 = vadd.f32 %v1106_v39, %v1044_v25 }
 0x19b   : > { %v978_v17 = vadd.f32 %v977_v50, %v2101_v7  ;;  %v1108_v16 = vadd.f32 %v1107_v44, %v1045_v56 }
 0x19d   : > { %v979_v6 = vadd.f32 %v2102_v11, %v978_v17  ;;  %v1109_v38 = vadd.f32 %v1108_v16, %v1046_v43 }
 0x19f   : > { %v980_v10 = vadd.f32 %v2103_v40, %v979_v6  ;;  %v1110_v54 = vadd.f32 %v1109_v38, %v1047_v49 }
 0x1a1   : > { %v981_v60 = vrot.slane %v980_v10, 4  ;;  %v1111_v14 = vadd.f32 %v1110_v54, %v1048_v53 }
 0x1a3   : > { %v982_v19 = vadd.f32 %v981_v60, %v980_v10  ;;  %v1112_v58 = vadd.f32 %v1111_v14, %v1049_v47 }
 0x1a5   : > { %v983_v20 = vrot.slane %v982_v19, 2  ;;  %v1113_v31 = vadd.f32 %v1112_v58, %v1050_v51 }
 0x1a7   : > { %v984_v35 = vadd.f32 %v983_v20, %v982_v19  ;;  %v1114_v0 = vadd.f32 %v1113_v31, %v1051_v57 }
 0x1a9   : > { %v985_v42 = vrot.slane %v984_v35, 1  ;;  %v1115_v48 = vadd.f32 %v1114_v0, %v1052_v15 }
 0x1ab   : > { %v986_v61 = vadd.f32 %v985_v42, %v984_v35  ;;  %v1116_v28 = vadd.f32 %v1115_v48, %v1053_v55 }
 0x1ad   : > { %v987_v24 = vadd.f32 %v986_v61, %v917_v18  ;;  %v1117_v59 = vrot.slane %v1116_v28, 4 }
 0x1af   : > { %988 = vst [vmem:[%s2054_s3] sm:$0x1] %v987_v24  ;;  %v1118_v33 = vadd.f32 %v1117_v59, %v1116_v28 }
 0x1b1   : > { %v1119_v4 = vrot.slane %v1118_v33, 2 }
 0x1b3   : > { %v1120_v22 = vadd.f32 %v1119_v4, %v1118_v33 }
 0x1b5   : > { %v1121_v1 = vrot.slane %v1120_v22, 1 }
 0x1b7   : > { %v1122_v52 = vadd.f32 %v1121_v1, %v1120_v22 }
 0x1b9   : > { %v1123_v26 = vadd.f32 %v1122_v52, %v989_v37 }
 0x1bb   : > { %1124 = vst [vmem:[%s2055_s4] sm:$0x1] %v1123_v26 }
 0x1bc PF: > { %s15_s15 = sadd.s32 1, %s1449_s15  }
 0x1bd   : > { %p12_p5 = scmp.ge.s32.totalorder %s15_s15, 6  }
 0x1bf   :  { %14 = sbr.rel (!%p12_p5) target bundleno = 1 (0x1), region = 78 }

// kernel: decoder_forward.12
= control target key start
LH: loop header
LB: loop body
LE: loop exit
PB: predicated region body
PF: predicated region fallthrough
CT: control target
= control target key end

     0   :  { %s613_s12 = smov 0   ;;  %s900_s0 = inlined_call_operand.vmem [shape: f32[8192,128], index: 0, kind: input, shape index: {}]   ;;  %s901_s1 = inlined_call_operand.vmem [shape: f32[1,128], index: 1, kind: input, shape index: {}]   ;;  %s902_s2 = inlined_call_operand.vmem [shape: f32[1,128], index: 2, kind: input, shape index: {}]   ;;  %s903_s3 = inlined_call_operand.vmem [shape: f32[8192,128], index: 3, kind: output, shape index: {}]  }
   0x1 LB: > { %s564_s13 = sadd.s32 4294967295, %s591_s12   ;;  %p568_p0 = scmp.ge.s32.totalorder %s591_s12, 1  ;;  %s591_s12 = sphi %s613_s12, %s13_s12  }
   0x2   : > { %p138_p1 = scmp.lt.s32.totalorder %s591_s12, 17 }
   0x4   : > { %p139_p2 = pnand %p568_p0, %p138_p1 }
   0x5   : > { %s569_s14 = sshll.u32 (!%p139_p2), %s564_s13, 6 }
   0x6   : > { %142 = sbr.rel (%p139_p2) target bundleno = 68 (0x44), region = 32  ;;  %p163_p3 = scmp.lt.s32.totalorder (!%p139_p2), %s569_s14, 1023 }
   0xb   : > { %s905_s14 = smov (!%p163_p3, %s569_s14), 1023  ;;  %v624_v0 = vld [vmem:[%s901_s1] ss:$0 sm:$0xff] }
   0xc   : > { %s570_s15 = sshll.u32 %s905_s14, 3  ;;  %v634_v1 = vld [vmem:[%s902_s2] ss:$0 sm:$0xff] }
   0xd   : > { %s629_s20 = scalar_lea.vmem %s900_s0, %s570_s15  ;;  %s657_s25 = scalar_lea.vmem %s903_s3, %s570_s15 }
   0xe   : > { %v174_v2 = vld [vmem:[%s629_s20] sm:$0xff]  ;;  %v175_v3 = vld [vmem:[%s629_s20 + $0x8] sm:$0xff]  ;;  %v176_v4 = vld [vmem:[%s629_s20 + $0x10] sm:$0xff] }
   0xf   : > { %v245_v5 = vmul.f32 %v624_v0, %v174_v2  ;;  %v246_v6 = vmul.f32 %v624_v0, %v175_v3  ;;  %v247_v7 = vmul.f32 %v624_v0, %v176_v4  ;;  %v177_v8 = vld [vmem:[%s629_s20 + $0x18] sm:$0xff]  ;;  %v178_v9 = vld [vmem:[%s629_s20 + $0x20] sm:$0xff]  ;;  %v179_v10 = vld [vmem:[%s629_s20 + $0x28] sm:$0xff] }
  0x10   : > { %v248_v11 = vmul.f32 %v624_v0, %v177_v8  ;;  %v249_v12 = vmul.f32 %v624_v0, %v178_v9  ;;  %v250_v13 = vmul.f32 %v624_v0, %v179_v10  ;;  %v180_v14 = vld [vmem:[%s629_s20 + $0x30] sm:$0xff]  ;;  %v181_v15 = vld [vmem:[%s629_s20 + $0x38] sm:$0xff]  ;;  %v182_v24 = vld [vmem:[%s629_s20 + $0x40] sm:$0xff] }
  0x11   : > { %v316_v16 = vadd.f32 %v634_v1, %v245_v5  ;;  %v317_v17 = vadd.f32 %v634_v1, %v246_v6  ;;  %v318_v18 = vadd.f32 %v634_v1, %v247_v7  ;;  %v251_v19 = vmul.f32 %v624_v0, %v180_v14  ;;  %v183_v25 = vld [vmem:[%s629_s20 + $0x48] sm:$0xff]  ;;  %v184_v26 = vld [vmem:[%s629_s20 + $0x50] sm:$0xff]  ;;  %v185_v31 = vld [vmem:[%s629_s20 + $0x58] sm:$0xff] }
  0x12   : > { %v319_v20 = vadd.f32 %v634_v1, %v248_v11  ;;  %v320_v21 = vadd.f32 %v634_v1, %v249_v12  ;;  %v321_v22 = vadd.f32 %v634_v1, %v250_v13  ;;  %v252_v23 = vmul.f32 %v624_v0, %v181_v15  ;;  %v186_v32 = vld [vmem:[%s629_s20 + $0x60] sm:$0xff]  ;;  %v187_v33 = vld [vmem:[%s629_s20 + $0x68] sm:$0xff]  ;;  %v188_v38 = vld [vmem:[%s629_s20 + $0x70] sm:$0xff] }
  0x13   : > { %v380_v27 = vmax.f32 %v316_v16, 0.0  ;;  %v381_v28 = vmax.f32 %v317_v17, 0.0  ;;  %v382_v29 = vmax.f32 %v318_v18, 0.0  ;;  %v322_v30 = vadd.f32 %v634_v1, %v251_v19  ;;  %v189_v43 = vld [vmem:[%s629_s20 + $0x78] sm:$0xff]  ;;  %v190_v56 = vld [vmem:[%s629_s20 + $0x80] sm:$0xff]  ;;  %v191_v57 = vld [vmem:[%s629_s20 + $0x88] sm:$0xff] }
  0x14   : > { %v383_v34 = vmax.f32 %v319_v20, 0.0  ;;  %v384_v35 = vmax.f32 %v320_v21, 0.0  ;;  %v385_v36 = vmax.f32 %v321_v22, 0.0  ;;  %v323_v37 = vadd.f32 %v634_v1, %v252_v23  ;;  %v192_v58 = vld [vmem:[%s629_s20 + $0x90] sm:$0xff]  ;;  %v193_v63 = vld [vmem:[%s629_s20 + $0x98] sm:$0xff]  ;;  %v194_v2 = vld [vmem:[%s629_s20 + $0xa0] sm:$0xff] }
  0x15   : > { %444 = vst [vmem:[%s657_s25] sm:$0xff] %v380_v27  ;;  %445 = vst [vmem:[%s657_s25 + $0x8] sm:$0xff] %v381_v28  ;;  %v386_v39 = vmax.f32 %v322_v30, 0.0  ;;  %v253_v40 = vmul.f32 %v624_v0, %v182_v24  ;;  %v254_v41 = vmul.f32 %v624_v0, %v183_v25  ;;  %v255_v42 = vmul.f32 %v624_v0, %v184_v26  ;;  %v195_v3 = vld [vmem:[%s629_s20 + $0xa8] sm:$0xff]  ;;  %v196_v8 = vld [vmem:[%s629_s20 + $0xb0] sm:$0xff] }
  0x16   : > { %446 = vst [vmem:[%s657_s25 + $0x10] sm:$0xff] %v382_v29  ;;  %447 = vst [vmem:[%s657_s25 + $0x18] sm:$0xff] %v383_v34  ;;  %v387_v44 = vmax.f32 %v323_v37, 0.0  ;;  %v256_v45 = vmul.f32 %v624_v0, %v185_v31  ;;  %v257_v46 = vmul.f32 %v624_v0, %v186_v32  ;;  %v258_v47 = vmul.f32 %v624_v0, %v187_v33  ;;  %v197_v13 = vld [vmem:[%s629_s20 + $0xb8] sm:$0xff]  ;;  %v198_v26 = vld [vmem:[%s629_s20 + $0xc0] sm:$0xff] }
  0x17   : > { %448 = vst [vmem:[%s657_s25 + $0x20] sm:$0xff] %v384_v35  ;;  %449 = vst [vmem:[%s657_s25 + $0x28] sm:$0xff] %v385_v36  ;;  %v324_v48 = vadd.f32 %v634_v1, %v253_v40  ;;  %v325_v49 = vadd.f32 %v634_v1, %v254_v41  ;;  %v326_v50 = vadd.f32 %v634_v1, %v255_v42  ;;  %v199_v27 = vld [vmem:[%s629_s20 + $0xc8] sm:$0xff]  ;;  %v200_v28 = vld [vmem:[%s629_s20 + $0xd0] sm:$0xff] }
  0x18   : > { %450 = vst [vmem:[%s657_s25 + $0x30] sm:$0xff] %v386_v39  ;;  %v259_v51 = vmul.f32 %v624_v0, %v188_v38  ;;  %451 = vst [vmem:[%s657_s25 + $0x38] sm:$0xff] %v387_v44  ;;  %v327_v52 = vadd.f32 %v634_v1, %v256_v45  ;;  %v328_v53 = vadd.f32 %v634_v1, %v257_v46  ;;  %v201_v33 = vld [vmem:[%s629_s20 + $0xd8] sm:$0xff]  ;;  %v202_v34 = vld [vmem:[%s629_s20 + $0xe0] sm:$0xff] }
  0x19   : > { %v329_v54 = vadd.f32 %v634_v1, %v258_v47  ;;  %v260_v55 = vmul.f32 %v624_v0, %v189_v43  ;;  %v388_v59 = vmax.f32 %v324_v48, 0.0  ;;  %v389_v60 = vmax.f32 %v325_v49, 0.0  ;;  %v203_v35 = vld [vmem:[%s629_s20 + $0xe8] sm:$0xff]  ;;  %v204_v40 = vld [vmem:[%s629_s20 + $0xf0] sm:$0xff]  ;;  %v205_v45 = vld [vmem:[%s629_s20 + $0xf8] sm:$0xff] }
  0x1a   : > { %v390_v61 = vmax.f32 %v326_v50, 0.0  ;;  %v330_v62 = vadd.f32 %v634_v1, %v259_v51  ;;  %v391_v4 = vmax.f32 %v327_v52, 0.0  ;;  %v392_v5 = vmax.f32 %v328_v53, 0.0 }
  0x1b   : > { %v393_v6 = vmax.f32 %v329_v54, 0.0  ;;  %v331_v7 = vadd.f32 %v634_v1, %v260_v55  ;;  %452 = vst [vmem:[%s657_s25 + $0x40] sm:$0xff] %v388_v59  ;;  %453 = vst [vmem:[%s657_s25 + $0x48] sm:$0xff] %v389_v60  ;;  %v261_v10 = vmul.f32 %v624_v0, %v190_v56  ;;  %v262_v11 = vmul.f32 %v624_v0, %v191_v57  ;;  %v207_v59 = vld [vmem:[%s629_s20 + $0x108] sm:$0xff]  ;;  %v208_v60 = vld [vmem:[%s629_s20 + $0x110] sm:$0xff] }
  0x1c   : > { %454 = vst [vmem:[%s657_s25 + $0x50] sm:$0xff] %v390_v61  ;;  %v394_v9 = vmax.f32 %v330_v62, 0.0  ;;  %v263_v12 = vmul.f32 %v624_v0, %v192_v58  ;;  %455 = vst [vmem:[%s657_s25 + $0x58] sm:$0xff] %v391_v4  ;;  %v264_v15 = vmul.f32 %v624_v0, %v193_v63  ;;  %v265_v16 = vmul.f32 %v624_v0, %v194_v2  ;;  %v206_v58 = vld [vmem:[%s629_s20 + $0x100] sm:$0xff] }
  0x1d   : > { %456 = vst [vmem:[%s657_s25 + $0x60] sm:$0xff] %v392_v5  ;;  %457 = vst [vmem:[%s657_s25 + $0x68] sm:$0xff] %v393_v6  ;;  %v395_v14 = vmax.f32 %v331_v7, 0.0  ;;  %v266_v17 = vmul.f32 %v624_v0, %v195_v3  ;;  %v332_v18 = vadd.f32 %v634_v1, %v261_v10  ;;  %v333_v19 = vadd.f32 %v634_v1, %v262_v11  ;;  %v209_v3 = vld [vmem:[%s629_s20 + $0x118] sm:$0xff]  ;;  %v210_v4 = vld [vmem:[%s629_s20 + $0x120] sm:$0xff] }
  0x1e   : > { %458 = vst [vmem:[%s657_s25 + $0x70] sm:$0xff] %v394_v9  ;;  %v334_v20 = vadd.f32 %v634_v1, %v263_v12  ;;  %v267_v21 = vmul.f32 %v624_v0, %v196_v8  ;;  %v335_v22 = vadd.f32 %v634_v1, %v264_v15  ;;  %v336_v23 = vadd.f32 %v634_v1, %v265_v16  ;;  %v211_v5 = vld [vmem:[%s629_s20 + $0x128] sm:$0xff]  ;;  %v212_v10 = vld [vmem:[%s629_s20 + $0x130] sm:$0xff]  ;;  %v213_v15 = vld [vmem:[%s629_s20 + $0x138] sm:$0xff] }
  0x1f   : > { %459 = vst [vmem:[%s657_s25 + $0x78] sm:$0xff] %v395_v14  ;;  %v337_v24 = vadd.f32 %v634_v1, %v266_v17  ;;  %v268_v25 = vmul.f32 %v624_v0, %v197_v13  ;;  %v396_v29 = vmax.f32 %v332_v18, 0.0  ;;  %v397_v30 = vmax.f32 %v333_v19, 0.0 }
  0x20   : > { %v398_v31 = vmax.f32 %v334_v20, 0.0  ;;  %v338_v32 = vadd.f32 %v634_v1, %v267_v21  ;;  %v399_v36 = vmax.f32 %v335_v22, 0.0  ;;  %v400_v37 = vmax.f32 %v336_v23, 0.0 }
  0x21   : > { %v401_v38 = vmax.f32 %v337_v24, 0.0  ;;  %v339_v39 = vadd.f32 %v634_v1, %v268_v25  ;;  %460 = vst [vmem:[%s657_s25 + $0x80] sm:$0xff] %v396_v29  ;;  %461 = vst [vmem:[%s657_s25 + $0x88] sm:$0xff] %v397_v30  ;;  %v269_v42 = vmul.f32 %v624_v0, %v198_v26  ;;  %v270_v43 = vmul.f32 %v624_v0, %v199_v27  ;;  %v215_v29 = vld [vmem:[%s629_s20 + $0x148] sm:$0xff]  ;;  %v216_v30 = vld [vmem:[%s629_s20 + $0x150] sm:$0xff] }
  0x22   : > { %462 = vst [vmem:[%s657_s25 + $0x90] sm:$0xff] %v398_v31  ;;  %v402_v41 = vmax.f32 %v338_v32, 0.0  ;;  %v271_v44 = vmul.f32 %v624_v0, %v200_v28  ;;  %463 = vst [vmem:[%s657_s25 + $0x98] sm:$0xff] %v399_v36  ;;  %v272_v47 = vmul.f32 %v624_v0, %v201_v33  ;;  %v273_v48 = vmul.f32 %v624_v0, %v202_v34  ;;  %v214_v28 = vld [vmem:[%s629_s20 + $0x140] sm:$0xff] }
  0x23   : > { %464 = vst [vmem:[%s657_s25 + $0xa0] sm:$0xff] %v400_v37  ;;  %465 = vst [vmem:[%s657_s25 + $0xa8] sm:$0xff] %v401_v38  ;;  %v403_v46 = vmax.f32 %v339_v39, 0.0  ;;  %v274_v49 = vmul.f32 %v624_v0, %v203_v35  ;;  %v340_v50 = vadd.f32 %v634_v1, %v269_v42  ;;  %v341_v51 = vadd.f32 %v634_v1, %v270_v43  ;;  %v217_v35 = vld [vmem:[%s629_s20 + $0x158] sm:$0xff]  ;;  %v218_v36 = vld [vmem:[%s629_s20 + $0x160] sm:$0xff] }
  0x24   : > { %466 = vst [vmem:[%s657_s25 + $0xb0] sm:$0xff] %v402_v41  ;;  %v342_v52 = vadd.f32 %v634_v1, %v271_v44  ;;  %v275_v53 = vmul.f32 %v624_v0, %v204_v40  ;;  %v343_v54 = vadd.f32 %v634_v1, %v272_v47  ;;  %v344_v55 = vadd.f32 %v634_v1, %v273_v48  ;;  %v219_v37 = vld [vmem:[%s629_s20 + $0x168] sm:$0xff]  ;;  %v220_v42 = vld [vmem:[%s629_s20 + $0x170] sm:$0xff]  ;;  %v221_v47 = vld [vmem:[%s629_s20 + $0x178] sm:$0xff] }
  0x25   : > { %467 = vst [vmem:[%s657_s25 + $0xb8] sm:$0xff] %v403_v46  ;;  %v345_v56 = vadd.f32 %v634_v1, %v274_v49  ;;  %v276_v57 = vmul.f32 %v624_v0, %v205_v45  ;;  %v404_v61 = vmax.f32 %v340_v50, 0.0  ;;  %v405_v62 = vmax.f32 %v341_v51, 0.0 }
  0x26   : > { %v406_v63 = vmax.f32 %v342_v52, 0.0  ;;  %v346_v2 = vadd.f32 %v634_v1, %v275_v53  ;;  %v407_v6 = vmax.f32 %v343_v54, 0.0  ;;  %v408_v7 = vmax.f32 %v344_v55, 0.0 }
  0x27   : > { %v409_v8 = vmax.f32 %v345_v56, 0.0  ;;  %v347_v9 = vadd.f32 %v634_v1, %v276_v57  ;;  %468 = vst [vmem:[%s657_s25 + $0xc0] sm:$0xff] %v404_v61  ;;  %469 = vst [vmem:[%s657_s25 + $0xc8] sm:$0xff] %v405_v62  ;;  %v277_v12 = vmul.f32 %v624_v0, %v206_v58  ;;  %v278_v13 = vmul.f32 %v624_v0, %v207_v59  ;;  %v223_v61 = vld [vmem:[%s629_s20 + $0x188] sm:$0xff]  ;;  %v224_v62 = vld [vmem:[%s629_s20 + $0x190] sm:$0xff] }
  0x28   : > { %470 = vst [vmem:[%s657_s25 + $0xd0] sm:$0xff] %v406_v63  ;;  %v410_v11 = vmax.f32 %v346_v2, 0.0  ;;  %v279_v14 = vmul.f32 %v624_v0, %v208_v60  ;;  %471 = vst [vmem:[%s657_s25 + $0xd8] sm:$0xff] %v407_v6  ;;  %v280_v17 = vmul.f32 %v624_v0, %v209_v3  ;;  %v281_v18 = vmul.f32 %v624_v0, %v210_v4  ;;  %v222_v60 = vld [vmem:[%s629_s20 + $0x180] sm:$0xff] }
  0x29   : > { %472 = vst [vmem:[%s657_s25 + $0xe0] sm:$0xff] %v408_v7  ;;  %473 = vst [vmem:[%s657_s25 + $0xe8] sm:$0xff] %v409_v8  ;;  %v411_v16 = vmax.f32 %v347_v9, 0.0  ;;  %v282_v19 = vmul.f32 %v624_v0, %v211_v5  ;;  %v348_v20 = vadd.f32 %v634_v1, %v277_v12  ;;  %v349_v21 = vadd.f32 %v634_v1, %v278_v13  ;;  %v225_v5 = vld [vmem:[%s629_s20 + $0x198] sm:$0xff]  ;;  %v226_v6 = vld [vmem:[%s629_s20 + $0x1a0] sm:$0xff] }
  0x2a   : > { %474 = vst [vmem:[%s657_s25 + $0xf0] sm:$0xff] %v410_v11  ;;  %v350_v22 = vadd.f32 %v634_v1, %v279_v14  ;;  %v283_v23 = vmul.f32 %v624_v0, %v212_v10  ;;  %v351_v24 = vadd.f32 %v634_v1, %v280_v17  ;;  %v352_v25 = vadd.f32 %v634_v1, %v281_v18  ;;  %v227_v7 = vld [vmem:[%s629_s20 + $0x1a8] sm:$0xff]  ;;  %v228_v12 = vld [vmem:[%s629_s20 + $0x1b0] sm:$0xff]  ;;  %v229_v17 = vld [vmem:[%s629_s20 + $0x1b8] sm:$0xff] }
  0x2b   : > { %475 = vst [vmem:[%s657_s25 + $0xf8] sm:$0xff] %v411_v16  ;;  %v353_v26 = vadd.f32 %v634_v1, %v282_v19  ;;  %v284_v27 = vmul.f32 %v624_v0, %v213_v15  ;;  %v412_v31 = vmax.f32 %v348_v20, 0.0  ;;  %v413_v32 = vmax.f32 %v349_v21, 0.0 }
  0x2c   : > { %v414_v33 = vmax.f32 %v350_v22, 0.0  ;;  %v354_v34 = vadd.f32 %v634_v1, %v283_v23  ;;  %v415_v38 = vmax.f32 %v351_v24, 0.0  ;;  %v416_v39 = vmax.f32 %v352_v25, 0.0 }
  0x2d   : > { %v417_v40 = vmax.f32 %v353_v26, 0.0  ;;  %v355_v41 = vadd.f32 %v634_v1, %v284_v27  ;;  %476 = vst [vmem:[%s657_s25 + $0x100] sm:$0xff] %v412_v31  ;;  %477 = vst [vmem:[%s657_s25 + $0x108] sm:$0xff] %v413_v32  ;;  %v285_v44 = vmul.f32 %v624_v0, %v214_v28  ;;  %v286_v45 = vmul.f32 %v624_v0, %v215_v29  ;;  %v231_v31 = vld [vmem:[%s629_s20 + $0x1c8] sm:$0xff]  ;;  %v232_v32 = vld [vmem:[%s629_s20 + $0x1d0] sm:$0xff] }
  0x2e   : > { %478 = vst [vmem:[%s657_s25 + $0x110] sm:$0xff] %v414_v33  ;;  %v418_v43 = vmax.f32 %v354_v34, 0.0  ;;  %v287_v46 = vmul.f32 %v624_v0, %v216_v30  ;;  %479 = vst [vmem:[%s657_s25 + $0x118] sm:$0xff] %v415_v38  ;;  %v288_v49 = vmul.f32 %v624_v0, %v217_v35  ;;  %v289_v50 = vmul.f32 %v624_v0, %v218_v36  ;;  %v230_v30 = vld [vmem:[%s629_s20 + $0x1c0] sm:$0xff] }
  0x2f   : > { %480 = vst [vmem:[%s657_s25 + $0x120] sm:$0xff] %v416_v39  ;;  %481 = vst [vmem:[%s657_s25 + $0x128] sm:$0xff] %v417_v40  ;;  %v419_v48 = vmax.f32 %v355_v41, 0.0  ;;  %v290_v51 = vmul.f32 %v624_v0, %v219_v37  ;;  %v356_v52 = vadd.f32 %v634_v1, %v285_v44  ;;  %v357_v53 = vadd.f32 %v634_v1, %v286_v45  ;;  %v233_v37 = vld [vmem:[%s629_s20 + $0x1d8] sm:$0xff]  ;;  %v234_v38 = vld [vmem:[%s629_s20 + $0x1e0] sm:$0xff] }
  0x30   : > { %482 = vst [vmem:[%s657_s25 + $0x130] sm:$0xff] %v418_v43  ;;  %v358_v54 = vadd.f32 %v634_v1, %v287_v46  ;;  %v291_v55 = vmul.f32 %v624_v0, %v220_v42  ;;  %v359_v56 = vadd.f32 %v634_v1, %v288_v49  ;;  %v360_v57 = vadd.f32 %v634_v1, %v289_v50  ;;  %v235_v39 = vld [vmem:[%s629_s20 + $0x1e8] sm:$0xff]  ;;  %v236_v44 = vld [vmem:[%s629_s20 + $0x1f0] sm:$0xff]  ;;  %v237_v49 = vld [vmem:[%s629_s20 + $0x1f8] sm:$0xff] }
  0x31   : > { %483 = vst [vmem:[%s657_s25 + $0x138] sm:$0xff] %v419_v48  ;;  %v361_v58 = vadd.f32 %v634_v1, %v290_v51  ;;  %v292_v59 = vmul.f32 %v624_v0, %v221_v47  ;;  %v420_v63 = vmax.f32 %v356_v52, 0.0  ;;  %v421_v2 = vmax.f32 %v357_v53, 0.0 }
  0x32   : > { %v422_v3 = vmax.f32 %v358_v54, 0.0  ;;  %v362_v4 = vadd.f32 %v634_v1, %v291_v55  ;;  %v423_v8 = vmax.f32 %v359_v56, 0.0  ;;  %v424_v9 = vmax.f32 %v360_v57, 0.0 }
  0x33   : > { %v425_v10 = vmax.f32 %v361_v58, 0.0  ;;  %v363_v11 = vadd.f32 %v634_v1, %v292_v59  ;;  %484 = vst [vmem:[%s657_s25 + $0x140] sm:$0xff] %v420_v63  ;;  %485 = vst [vmem:[%s657_s25 + $0x148] sm:$0xff] %v421_v2  ;;  %v293_v14 = vmul.f32 %v624_v0, %v222_v60  ;;  %v294_v15 = vmul.f32 %v624_v0, %v223_v61 }
  0x34   : > { %486 = vst [vmem:[%s657_s25 + $0x150] sm:$0xff] %v422_v3  ;;  %v426_v13 = vmax.f32 %v362_v4, 0.0  ;;  %v295_v16 = vmul.f32 %v624_v0, %v224_v62  ;;  %487 = vst [vmem:[%s657_s25 + $0x158] sm:$0xff] %v423_v8  ;;  %v296_v19 = vmul.f32 %v624_v0, %v225_v5  ;;  %v297_v20 = vmul.f32 %v624_v0, %v226_v6 }
  0x35   : > { %488 = vst [vmem:[%s657_s25 + $0x160] sm:$0xff] %v424_v9  ;;  %489 = vst [vmem:[%s657_s25 + $0x168] sm:$0xff] %v425_v10  ;;  %v427_v18 = vmax.f32 %v363_v11, 0.0  ;;  %v298_v21 = vmul.f32 %v624_v0, %v227_v7  ;;  %v364_v22 = vadd.f32 %v634_v1, %v293_v14  ;;  %v365_v23 = vadd.f32 %v634_v1, %v294_v15 }
  0x36   : > { %490 = vst [vmem:[%s657_s25 + $0x170] sm:$0xff] %v426_v13  ;;  %v366_v24 = vadd.f32 %v634_v1, %v295_v16  ;;  %v299_v25 = vmul.f32 %v624_v0, %v228_v12  ;;  %v367_v26 = vadd.f32 %v634_v1, %v296_v19  ;;  %v368_v27 = vadd.f32 %v634_v1, %v297_v20 }
  0x37   : > { %491 = vst [vmem:[%s657_s25 + $0x178] sm:$0xff] %v427_v18  ;;  %v369_v28 = vadd.f32 %v634_v1, %v298_v21  ;;  %v300_v29 = vmul.f32 %v624_v0, %v229_v17  ;;  %v428_v33 = vmax.f32 %v364_v22, 0.0  ;;  %v429_v34 = vmax.f32 %v365_v23, 0.0 }
  0x38   : > { %v430_v35 = vmax.f32 %v366_v24, 0.0  ;;  %v370_v36 = vadd.f32 %v634_v1, %v299_v25  ;;  %v431_v40 = vmax.f32 %v367_v26, 0.0  ;;  %v432_v41 = vmax.f32 %v368_v27, 0.0 }
  0x39   : > { %v433_v42 = vmax.f32 %v369_v28, 0.0  ;;  %v371_v43 = vadd.f32 %v634_v1, %v300_v29  ;;  %492 = vst [vmem:[%s657_s25 + $0x180] sm:$0xff] %v428_v33  ;;  %493 = vst [vmem:[%s657_s25 + $0x188] sm:$0xff] %v429_v34  ;;  %v301_v46 = vmul.f32 %v624_v0, %v230_v30  ;;  %v302_v47 = vmul.f32 %v624_v0, %v231_v31 }
  0x3a   : > { %494 = vst [vmem:[%s657_s25 + $0x190] sm:$0xff] %v430_v35  ;;  %v434_v45 = vmax.f32 %v370_v36, 0.0  ;;  %v303_v48 = vmul.f32 %v624_v0, %v232_v32  ;;  %495 = vst [vmem:[%s657_s25 + $0x198] sm:$0xff] %v431_v40  ;;  %v304_v51 = vmul.f32 %v624_v0, %v233_v37  ;;  %v305_v52 = vmul.f32 %v624_v0, %v234_v38 }
  0x3b   : > { %496 = vst [vmem:[%s657_s25 + $0x1a0] sm:$0xff] %v432_v41  ;;  %497 = vst [vmem:[%s657_s25 + $0x1a8] sm:$0xff] %v433_v42  ;;  %v435_v50 = vmax.f32 %v371_v43, 0.0  ;;  %v306_v53 = vmul.f32 %v624_v0, %v235_v39  ;;  %v372_v54 = vadd.f32 %v634_v1, %v301_v46  ;;  %v373_v55 = vadd.f32 %v634_v1, %v302_v47 }
  0x3c   : > { %498 = vst [vmem:[%s657_s25 + $0x1b0] sm:$0xff] %v434_v45  ;;  %v374_v56 = vadd.f32 %v634_v1, %v303_v48  ;;  %v307_v57 = vmul.f32 %v624_v0, %v236_v44  ;;  %v375_v58 = vadd.f32 %v634_v1, %v304_v51  ;;  %v376_v59 = vadd.f32 %v634_v1, %v305_v52 }
  0x3d   : > { %499 = vst [vmem:[%s657_s25 + $0x1b8] sm:$0xff] %v435_v50  ;;  %v377_v60 = vadd.f32 %v634_v1, %v306_v53  ;;  %v308_v61 = vmul.f32 %v624_v0, %v237_v49  ;;  %v436_v62 = vmax.f32 %v372_v54, 0.0  ;;  %v437_v63 = vmax.f32 %v373_v55, 0.0 }
  0x3e   : > { %v438_v2 = vmax.f32 %v374_v56, 0.0  ;;  %v378_v3 = vadd.f32 %v634_v1, %v307_v57  ;;  %v439_v4 = vmax.f32 %v375_v58, 0.0  ;;  %v440_v5 = vmax.f32 %v376_v59, 0.0 }
  0x3f   : > { %v441_v6 = vmax.f32 %v377_v60, 0.0  ;;  %v379_v7 = vadd.f32 %v634_v1, %v308_v61  ;;  %500 = vst [vmem:[%s657_s25 + $0x1c0] sm:$0xff] %v436_v62  ;;  %501 = vst [vmem:[%s657_s25 + $0x1c8] sm:$0xff] %v437_v63 }
  0x40   : > { %502 = vst [vmem:[%s657_s25 + $0x1d0] sm:$0xff] %v438_v2  ;;  %v442_v8 = vmax.f32 %v378_v3, 0.0  ;;  %503 = vst [vmem:[%s657_s25 + $0x1d8] sm:$0xff] %v439_v4 }
  0x41   : > { %504 = vst [vmem:[%s657_s25 + $0x1e0] sm:$0xff] %v440_v5  ;;  %505 = vst [vmem:[%s657_s25 + $0x1e8] sm:$0xff] %v441_v6  ;;  %v443_v0 = vmax.f32 %v379_v7, 0.0 }
  0x42   : > { %506 = vst [vmem:[%s657_s25 + $0x1f0] sm:$0xff] %v442_v8 }
  0x43   : > { %507 = vst [vmem:[%s657_s25 + $0x1f8] sm:$0xff] %v443_v0 }
  0x44 PF: > { %s13_s12 = sadd.s32 1, %s591_s12  }
  0x45   : > { %p10_p4 = scmp.ge.s32.totalorder %s13_s12, 18  }
  0x47   :  { %12 = sbr.rel (!%p10_p4) target bundleno = 1 (0x1), region = 62 }

// kernel: decoder_forward.11
= control target key start
LH: loop header
LB: loop body
LE: loop exit
PB: predicated region body
PF: predicated region fallthrough
CT: control target
= control target key end

     0   :  { %s1477_s15 = smov 0   ;;  %s2051_s0 = inlined_call_operand.vmem [shape: bf16[8192,72], index: 0, kind: input, shape index: {}]   ;;  %s2052_s1 = inlined_call_operand.vmem [shape: bf16[72,128], index: 1, kind: input, shape index: {}]   ;;  %s2053_s2 = inlined_call_operand.vmem [shape: f32[8192,128], index: 2, kind: output, shape index: {0}]   ;;  %s2054_s3 = inlined_call_operand.vmem [shape: f32[1,128], index: 3, kind: output, shape index: {1}]   ;;  %s2055_s4 = inlined_call_operand.vmem [shape: f32[1,128], index: 4, kind: output, shape index: {2}]  }
   0x1 LB: > { %s1193_s16 = sadd.s32 4294967295, %s1449_s15   ;;  %p1197_p0 = scmp.ge.s32.totalorder %s1449_s15, 1  ;;  %s1449_s15 = sphi %s1477_s15, %s15_s15  }
   0x2   : > { %p158_p1 = scmp.lt.s32.totalorder %s1449_s15, 17 }
   0x4   : > { %p159_p2 = pnand %p1197_p0, %p158_p1 }
   0x6   : > { %162 = sbr.rel (%p159_p2) target bundleno = 444 (0x1bc), region = 28 }
   0xb   : > { %v1406_v0 = vld [vmem:[%s2052_s1 + $0x20] ss:$0 sps:$4 sm:$0xff]   ;;  %vm554_vm0 = vcmask 1043456   ;;  %v1407_v1 = vld [vmem:[%s2052_s1 + $0x18] sm:$0xff]   ;;  %s1198_s21 = sshll.u32 %s1193_s16, 6  ;;  %v1408_v3 = vld [vmem:[%s2052_s1 + $0x10] sm:$0xff]  }
   0xc   : > { %1395 = vmatprep.subr.msk.bf16.mxu0 %vm554_vm0, %v1406_v0  ;;  %1396 = vmatprep.subr.msk.bf16.mxu1 %vm554_vm0, %v1406_v0  ;;  %v556_v2 = vsel %vm554_vm0, %v1406_v0, 0  ;;  %p185_p3 = scmp.lt.s32.totalorder %s1198_s21, 1023  ;;  %v1409_v4 = vld [vmem:[%s2052_s1 + $0x8] sm:$0xff]   ;;  %vm457_vm1 = vcmask 588800   ;;  %v1410_v7 = vld [vmem:[%s2052_s1] sm:$0xff]   ;;  %p1271_p4 = scmp.ne.s32.totalorder %s1193_s16, 0 }
   0xd   : > { %1312 = vmatpush3.bf16.msra.mxu0 %v556_v2  ;;  %1390 = vmatpush3.bf16.msra.mxu1 %v556_v2 }
   0xe   : > { %1313 = vmatprep.subr.bf16.mxu0 %v1407_v1  ;;  %1386 = vmatprep.subr.bf16.mxu1 %v1407_v1  ;;  %s2105_s21 = smov (!%p185_p3, %s1198_s21), 1023 }
   0xf   : > { %s1199_s26 = sshll.u32 %s2105_s21, 2  ;;  %s1201_s6 = sshll.u32 %s2105_s21, 3 }
  0x10   : > { %s1505_s29 = scalar_lea.vmem %s2051_s0, %s1199_s26  ;;  %s1578_s9 = scalar_lea.vmem %s2053_s2, %s1201_s6 }
  0x11   : > { %1314 = vmatpush3.bf16.msra.mxu0 %v1407_v1  ;;  %1391 = vmatpush3.bf16.msra.mxu1 %v1407_v1  ;;  %v1411_v5 = vld [vmem:[%s1505_s29] sm:$0xff]   ;;  %v1413_v8 = vld [vmem:[%s1505_s29 + $0x8] sm:$0xff]   ;;  %v1415_v10 = vld [vmem:[%s1505_s29 + $0x10] sm:$0xff]  }
  0x12   : > { %1315 = vmatprep.subr.bf16.mxu0 %v1408_v3  ;;  %1387 = vmatprep.subr.bf16.mxu1 %v1408_v3  ;;  %v1412_v6 = vld [vmem:[%s1505_s29 + $0x80] sm:$0xff]   ;;  %v1414_v9 = vld [vmem:[%s1505_s29 + $0x88] sm:$0xff]   ;;  %v1416_v11 = vld [vmem:[%s1505_s29 + $0x90] sm:$0xff]  }
  0x13   : > { %1321 = vmatprep.mubr.msk.bf16.mxu0 %vm457_vm1, %v1411_v5  ;;  %1353 = vmatprep.mubr.msk.bf16.mxu1 %vm457_vm1, %v1412_v6  ;;  %v1417_v12 = vld [vmem:[%s1505_s29 + $0x18] sm:$0xff]   ;;  %v1419_v14 = vld [vmem:[%s1505_s29 + $0x20] sm:$0xff]   ;;  %v1421_v16 = vld [vmem:[%s1505_s29 + $0x28] sm:$0xff]  }
  0x14   : > { %v1418_v13 = vld [vmem:[%s1505_s29 + $0x98] sm:$0xff]   ;;  %v1420_v15 = vld [vmem:[%s1505_s29 + $0xa0] sm:$0xff]   ;;  %v1422_v17 = vld [vmem:[%s1505_s29 + $0xa8] sm:$0xff]  }
  0x15   : > { %1316 = vmatpush3.bf16.msra.mxu0 %v1408_v3  ;;  %1392 = vmatpush3.bf16.msra.mxu1 %v1408_v3  ;;  %v1423_v18 = vld [vmem:[%s1505_s29 + $0x30] sm:$0xff]   ;;  %v1425_v20 = vld [vmem:[%s1505_s29 + $0x38] sm:$0xff]   ;;  %v1427_v22 = vld [vmem:[%s1505_s29 + $0x40] sm:$0xff]  }
  0x16   : > { %1317 = vmatprep.subr.bf16.mxu0 %v1409_v4  ;;  %1388 = vmatprep.subr.bf16.mxu1 %v1409_v4  ;;  %v1424_v19 = vld [vmem:[%s1505_s29 + $0xb0] sm:$0xff]   ;;  %v1426_v21 = vld [vmem:[%s1505_s29 + $0xb8] sm:$0xff]   ;;  %v1428_v23 = vld [vmem:[%s1505_s29 + $0xc0] sm:$0xff]  }
  0x17   : > { %v1429_v24 = vld [vmem:[%s1505_s29 + $0x48] sm:$0xff]   ;;  %v1431_v26 = vld [vmem:[%s1505_s29 + $0x50] sm:$0xff]   ;;  %v1433_v28 = vld [vmem:[%s1505_s29 + $0x58] sm:$0xff]  }
  0x18   : > { %v1430_v25 = vld [vmem:[%s1505_s29 + $0xc8] sm:$0xff]   ;;  %v1432_v27 = vld [vmem:[%s1505_s29 + $0xd0] sm:$0xff]   ;;  %v1434_v29 = vld [vmem:[%s1505_s29 + $0xd8] sm:$0xff]  }
  0x19   : > { %1318 = vmatpush3.bf16.msra.mxu0 %v1409_v4  ;;  %1393 = vmatpush3.bf16.msra.mxu1 %v1409_v4  ;;  %v1435_v30 = vld [vmem:[%s1505_s29 + $0x60] sm:$0xff]   ;;  %v1437_v32 = vld [vmem:[%s1505_s29 + $0x68] sm:$0xff]   ;;  %v1439_v34 = vld [vmem:[%s1505_s29 + $0x70] sm:$0xff]  }
  0x1a   : > { %1319 = vmatprep.subr.bf16.mxu0 %v1410_v7  ;;  %1389 = vmatprep.subr.bf16.mxu1 %v1410_v7  ;;  %v1436_v31 = vld [vmem:[%s1505_s29 + $0xe0] sm:$0xff]   ;;  %v1438_v33 = vld [vmem:[%s1505_s29 + $0xe8] sm:$0xff]   ;;  %v1440_v35 = vld [vmem:[%s1505_s29 + $0xf0] sm:$0xff]  }
  0x1b   : > { %v1441_v36 = vld [vmem:[%s1505_s29 + $0x78] sm:$0xff]  }
  0x1c   : > { %v1442_v37 = vld [vmem:[%s1505_s29 + $0xf8] sm:$0xff]  }
  0x1d   : > { %1320 = vmatpush3.bf16.msra.mxu0 %v1410_v7  ;;  %1394 = vmatpush3.bf16.msra.mxu1 %v1410_v7 }
  0x20   : > { %1322 = vmatmul.mubr.msk.bf16.vlgmr.msra.gmra.mxu0 %vm457_vm1, %v1413_v8  ;;  %1354 = vmatmul.mubr.msk.bf16.vlgmr.msra.gmra.mxu1 %vm457_vm1, %v1414_v9 }
  0x21   : > { %1325 = vmatprep.mubr.msk.bf16.mxu0 %vm457_vm1, %v1415_v10  ;;  %1357 = vmatprep.mubr.msk.bf16.mxu1 %vm457_vm1, %v1416_v11 }
  0x28   : > { %1326 = vmatmul.mubr.msk.bf16.gmra.mxu0 %vm457_vm1, %v1417_v12  ;;  %1358 = vmatmul.mubr.msk.bf16.gmra.mxu1 %vm457_vm1, %v1418_v13 }
  0x29   : > { %1329 = vmatprep.mubr.msk.bf16.mxu0 %vm457_vm1, %v1419_v14  ;;  %1361 = vmatprep.mubr.msk.bf16.mxu1 %vm457_vm1, %v1420_v15 }
  0x30   : > { %1330 = vmatmul.mubr.msk.bf16.gmra.mxu0 %vm457_vm1, %v1421_v16  ;;  %1362 = vmatmul.mubr.msk.bf16.gmra.mxu1 %vm457_vm1, %v1422_v17 }
  0x31   : > { %1333 = vmatprep.mubr.msk.bf16.mxu0 %vm457_vm1, %v1423_v18  ;;  %1365 = vmatprep.mubr.msk.bf16.mxu1 %vm457_vm1, %v1424_v19 }
  0x38   : > { %1334 = vmatmul.mubr.msk.bf16.gmra.mxu0 %vm457_vm1, %v1425_v20  ;;  %1366 = vmatmul.mubr.msk.bf16.gmra.mxu1 %vm457_vm1, %v1426_v21 }
  0x39   : > { %1337 = vmatprep.mubr.msk.bf16.mxu0 %vm457_vm1, %v1427_v22  ;;  %1369 = vmatprep.mubr.msk.bf16.mxu1 %vm457_vm1, %v1428_v23 }
  0x40   : > { %1338 = vmatmul.mubr.msk.bf16.gmra.mxu0 %vm457_vm1, %v1429_v24  ;;  %1370 = vmatmul.mubr.msk.bf16.gmra.mxu1 %vm457_vm1, %v1430_v25 }
  0x41   : > { %1341 = vmatprep.mubr.msk.bf16.mxu0 %vm457_vm1, %v1431_v26  ;;  %1373 = vmatprep.mubr.msk.bf16.mxu1 %vm457_vm1, %v1432_v27 }
  0x48   : > { %1342 = vmatmul.mubr.msk.bf16.gmra.mxu0 %vm457_vm1, %v1433_v28  ;;  %1374 = vmatmul.mubr.msk.bf16.gmra.mxu1 %vm457_vm1, %v1434_v29 }
  0x49   : > { %1345 = vmatprep.mubr.msk.bf16.mxu0 %vm457_vm1, %v1435_v30  ;;  %1377 = vmatprep.mubr.msk.bf16.mxu1 %vm457_vm1, %v1436_v31 }
  0x50   : > { %1346 = vmatmul.mubr.msk.bf16.gmra.mxu0 %vm457_vm1, %v1437_v32  ;;  %1378 = vmatmul.mubr.msk.bf16.gmra.mxu1 %vm457_vm1, %v1438_v33 }
  0x51   : > { %1349 = vmatprep.mubr.msk.bf16.mxu0 %vm457_vm1, %v1439_v34  ;;  %1381 = vmatprep.mubr.msk.bf16.mxu1 %vm457_vm1, %v1440_v35 }
  0x58   : > { %1350 = vmatmul.mubr.msk.bf16.gmra.mxu0 %vm457_vm1, %v1441_v36  ;;  %1382 = vmatmul.mubr.msk.bf16.gmra.mxu1 %vm457_vm1, %v1442_v37 }
  0xe0   : > { %v1580_v38 = vpop.f32.mrf.mxu0  ;;  %v1582_v39 = vpop.f32.mrf.mxu1 }
  0xe1   : > { %849 = vst [vmem:[%s1578_s9 + $0x10] sm:$0xff] %v1580_v38  ;;  %881 = vst [vmem:[%s1578_s9 + $0x110] sm:$0xff] %v1582_v39 }
  0xe2   : > { %v1588_v40 = vpop.f32.mrf.mxu0  ;;  %v1590_v41 = vpop.f32.mrf.mxu1 }
  0xe3   : > { %847 = vst [vmem:[%s1578_s9] sm:$0xff] %v1588_v40  ;;  %879 = vst [vmem:[%s1578_s9 + $0x100] sm:$0xff] %v1590_v41 }
  0xe4   : > { %v1596_v42 = vpop.f32.mrf.mxu0  ;;  %v1598_v43 = vpop.f32.mrf.mxu1 }
  0xe5   : > { %850 = vst [vmem:[%s1578_s9 + $0x18] sm:$0xff] %v1596_v42  ;;  %882 = vst [vmem:[%s1578_s9 + $0x118] sm:$0xff] %v1598_v43 }
  0xe6   : > { %v1604_v44 = vpop.f32.mrf.mxu0  ;;  %v1606_v45 = vpop.f32.mrf.mxu1 }
  0xe7   : > { %848 = vst [vmem:[%s1578_s9 + $0x8] sm:$0xff] %v1604_v44  ;;  %880 = vst [vmem:[%s1578_s9 + $0x108] sm:$0xff] %v1606_v45 }
  0xe8   : > { %v1612_v46 = vpop.f32.mrf.mxu0  ;;  %v1614_v47 = vpop.f32.mrf.mxu1 }
  0xe9   : > { %853 = vst [vmem:[%s1578_s9 + $0x30] sm:$0xff] %v1612_v46  ;;  %885 = vst [vmem:[%s1578_s9 + $0x130] sm:$0xff] %v1614_v47 }
  0xea   : > { %v1620_v48 = vpop.f32.mrf.mxu0  ;;  %v1622_v49 = vpop.f32.mrf.mxu1 }
  0xeb   : > { %851 = vst [vmem:[%s1578_s9 + $0x20] sm:$0xff] %v1620_v48  ;;  %883 = vst [vmem:[%s1578_s9 + $0x120] sm:$0xff] %v1622_v49 }
  0xec   : > { %v1628_v50 = vpop.f32.mrf.mxu0  ;;  %v1630_v51 = vpop.f32.mrf.mxu1 }
  0xed   : > { %854 = vst [vmem:[%s1578_s9 + $0x38] sm:$0xff] %v1628_v50  ;;  %886 = vst [vmem:[%s1578_s9 + $0x138] sm:$0xff] %v1630_v51 }
  0xee   : > { %v1636_v52 = vpop.f32.mrf.mxu0  ;;  %v1638_v53 = vpop.f32.mrf.mxu1 }
  0xef   : > { %852 = vst [vmem:[%s1578_s9 + $0x28] sm:$0xff] %v1636_v52  ;;  %884 = vst [vmem:[%s1578_s9 + $0x128] sm:$0xff] %v1638_v53 }
  0xf0   : > { %v1644_v54 = vpop.f32.mrf.mxu0  ;;  %v1646_v55 = vpop.f32.mrf.mxu1 }
  0xf1   : > { %857 = vst [vmem:[%s1578_s9 + $0x50] sm:$0xff] %v1644_v54  ;;  %889 = vst [vmem:[%s1578_s9 + $0x150] sm:$0xff] %v1646_v55 }
  0xf2   : > { %v1652_v56 = vpop.f32.mrf.mxu0  ;;  %v1654_v57 = vpop.f32.mrf.mxu1 }
  0xf3   : > { %855 = vst [vmem:[%s1578_s9 + $0x40] sm:$0xff] %v1652_v56  ;;  %887 = vst [vmem:[%s1578_s9 + $0x140] sm:$0xff] %v1654_v57 }
  0xf4   : > { %v1660_v58 = vpop.f32.mrf.mxu0  ;;  %v1662_v59 = vpop.f32.mrf.mxu1 }
  0xf5   : > { %858 = vst [vmem:[%s1578_s9 + $0x58] sm:$0xff] %v1660_v58  ;;  %890 = vst [vmem:[%s1578_s9 + $0x158] sm:$0xff] %v1662_v59 }
  0xf6   : > { %v1668_v60 = vpop.f32.mrf.mxu0  ;;  %v1670_v61 = vpop.f32.mrf.mxu1 }
  0xf7   : > { %856 = vst [vmem:[%s1578_s9 + $0x48] sm:$0xff] %v1668_v60  ;;  %888 = vst [vmem:[%s1578_s9 + $0x148] sm:$0xff] %v1670_v61 }
  0xf8   : > { %v1676_v62 = vpop.f32.mrf.mxu0  ;;  %v1678_v63 = vpop.f32.mrf.mxu1 }
  0xf9   : > { %861 = vst [vmem:[%s1578_s9 + $0x70] sm:$0xff] %v1676_v62  ;;  %893 = vst [vmem:[%s1578_s9 + $0x170] sm:$0xff] %v1678_v63 }
  0xfa   : > { %v1684_v0 = vpop.f32.mrf.mxu0  ;;  %v1686_v1 = vpop.f32.mrf.mxu1 }
  0xfb   : > { %859 = vst [vmem:[%s1578_s9 + $0x60] sm:$0xff] %v1684_v0  ;;  %891 = vst [vmem:[%s1578_s9 + $0x160] sm:$0xff] %v1686_v1 }
  0xfc   : > { %v1692_v2 = vpop.f32.mrf.mxu0  ;;  %v1694_v3 = vpop.f32.mrf.mxu1 }
  0xfd   : > { %862 = vst [vmem:[%s1578_s9 + $0x78] sm:$0xff] %v1692_v2  ;;  %894 = vst [vmem:[%s1578_s9 + $0x178] sm:$0xff] %v1694_v3 }
  0xfe   : > { %v1700_v4 = vpop.f32.mrf.mxu0  ;;  %v1702_v5 = vpop.f32.mrf.mxu1 }
  0xff   : > { %860 = vst [vmem:[%s1578_s9 + $0x68] sm:$0xff] %v1700_v4  ;;  %892 = vst [vmem:[%s1578_s9 + $0x168] sm:$0xff] %v1702_v5 }
 0x100   : > { %v1708_v6 = vpop.f32.mrf.mxu0  ;;  %v1710_v7 = vpop.f32.mrf.mxu1 }
 0x101   : > { %865 = vst [vmem:[%s1578_s9 + $0x90] sm:$0xff] %v1708_v6  ;;  %897 = vst [vmem:[%s1578_s9 + $0x190] sm:$0xff] %v1710_v7 }
 0x102   : > { %v1716_v8 = vpop.f32.mrf.mxu0  ;;  %v1718_v9 = vpop.f32.mrf.mxu1 }
 0x103   : > { %863 = vst [vmem:[%s1578_s9 + $0x80] sm:$0xff] %v1716_v8  ;;  %895 = vst [vmem:[%s1578_s9 + $0x180] sm:$0xff] %v1718_v9 }
 0x104   : > { %v1724_v10 = vpop.f32.mrf.mxu0  ;;  %v1726_v11 = vpop.f32.mrf.mxu1 }
 0x105   : > { %866 = vst [vmem:[%s1578_s9 + $0x98] sm:$0xff] %v1724_v10  ;;  %898 = vst [vmem:[%s1578_s9 + $0x198] sm:$0xff] %v1726_v11 }
 0x106   : > { %v1732_v12 = vpop.f32.mrf.mxu0  ;;  %v1734_v13 = vpop.f32.mrf.mxu1 }
 0x107   : > { %864 = vst [vmem:[%s1578_s9 + $0x88] sm:$0xff] %v1732_v12  ;;  %896 = vst [vmem:[%s1578_s9 + $0x188] sm:$0xff] %v1734_v13 }
 0x108   : > { %v1740_v14 = vpop.f32.mrf.mxu0  ;;  %v1742_v15 = vpop.f32.mrf.mxu1 }
 0x109   : > { %2080 = vst [vmem:[#allocation2_spill] sm:$0xff] %v1742_v15  ;;  %869 = vst [vmem:[%s1578_s9 + $0xb0] sm:$0xff] %v1740_v14 }
 0x10a   : > { %901 = vst [vmem:[%s1578_s9 + $0x1b0] sm:$0xff] %v1742_v15  ;;  %v1748_v16 = vpop.f32.mrf.mxu0  ;;  %v1750_v17 = vpop.f32.mrf.mxu1 }
 0x10b   : > { %2081 = vst [vmem:[#allocation3_spill] sm:$0xff] %v1750_v17  ;;  %867 = vst [vmem:[%s1578_s9 + $0xa0] sm:$0xff] %v1748_v16 }
 0x10c   : > { %899 = vst [vmem:[%s1578_s9 + $0x1a0] sm:$0xff] %v1750_v17  ;;  %v1756_v18 = vpop.f32.mrf.mxu0  ;;  %v1758_v19 = vpop.f32.mrf.mxu1 }
 0x10d   : > { %2082 = vst [vmem:[#allocation4_spill] sm:$0xff] %v1758_v19  ;;  %870 = vst [vmem:[%s1578_s9 + $0xb8] sm:$0xff] %v1756_v18 }
 0x10e   : > { %902 = vst [vmem:[%s1578_s9 + $0x1b8] sm:$0xff] %v1758_v19  ;;  %v1764_v20 = vpop.f32.mrf.mxu0  ;;  %v1766_v21 = vpop.f32.mrf.mxu1 }
 0x10f   : > { %2083 = vst [vmem:[#allocation5_spill] sm:$0xff] %v1766_v21  ;;  %868 = vst [vmem:[%s1578_s9 + $0xa8] sm:$0xff] %v1764_v20 }
 0x110   : > { %900 = vst [vmem:[%s1578_s9 + $0x1a8] sm:$0xff] %v1766_v21  ;;  %v1772_v22 = vpop.f32.mrf.mxu0  ;;  %v1774_v23 = vpop.f32.mrf.mxu1 }
 0x111   : > { %2084 = vst [vmem:[#allocation6_spill] sm:$0xff] %v1774_v23  ;;  %873 = vst [vmem:[%s1578_s9 + $0xd0] sm:$0xff] %v1772_v22 }
 0x112   : > { %905 = vst [vmem:[%s1578_s9 + $0x1d0] sm:$0xff] %v1774_v23  ;;  %v1780_v24 = vpop.f32.mrf.mxu0  ;;  %v1782_v25 = vpop.f32.mrf.mxu1 }
 0x113   : > { %2085 = vst [vmem:[#allocation7_spill] sm:$0xff] %v1782_v25  ;;  %871 = vst [vmem:[%s1578_s9 + $0xc0] sm:$0xff] %v1780_v24 }
 0x114   : > { %903 = vst [vmem:[%s1578_s9 + $0x1c0] sm:$0xff] %v1782_v25  ;;  %v1788_v26 = vpop.f32.mrf.mxu0  ;;  %v1790_v27 = vpop.f32.mrf.mxu1 }
 0x115   : > { %2086 = vst [vmem:[#allocation8_spill] sm:$0xff] %v1790_v27  ;;  %874 = vst [vmem:[%s1578_s9 + $0xd8] sm:$0xff] %v1788_v26 }
 0x116   : > { %906 = vst [vmem:[%s1578_s9 + $0x1d8] sm:$0xff] %v1790_v27  ;;  %v1796_v28 = vpop.f32.mrf.mxu0  ;;  %v1798_v29 = vpop.f32.mrf.mxu1 }
 0x117   : > { %2087 = vst [vmem:[#allocation9_spill] sm:$0xff] %v1798_v29  ;;  %872 = vst [vmem:[%s1578_s9 + $0xc8] sm:$0xff] %v1796_v28 }
 0x118   : > { %904 = vst [vmem:[%s1578_s9 + $0x1c8] sm:$0xff] %v1798_v29  ;;  %v1804_v30 = vpop.f32.mrf.mxu0  ;;  %v1806_v31 = vpop.f32.mrf.mxu1 }
 0x119   : > { %2088 = vst [vmem:[#allocation10_spill] sm:$0xff] %v1806_v31  ;;  %877 = vst [vmem:[%s1578_s9 + $0xf0] sm:$0xff] %v1804_v30 }
 0x11a   : > { %909 = vst [vmem:[%s1578_s9 + $0x1f0] sm:$0xff] %v1806_v31  ;;  %v1812_v32 = vpop.f32.mrf.mxu0  ;;  %v1814_v33 = vpop.f32.mrf.mxu1 }
 0x11b   : > { %2089 = vst [vmem:[#allocation11_spill] sm:$0xff] %v1814_v33  ;;  %875 = vst [vmem:[%s1578_s9 + $0xe0] sm:$0xff] %v1812_v32 }
 0x11c   : > { %907 = vst [vmem:[%s1578_s9 + $0x1e0] sm:$0xff] %v1814_v33  ;;  %v1820_v34 = vpop.f32.mrf.mxu0  ;;  %v1822_v35 = vpop.f32.mrf.mxu1  ;;  %914 = sbr.rel (%p1271_p4) target bundleno = 291 (0x123), region = 32 }
 0x11d   : > { %2090 = vst [vmem:[#allocation12_spill] sm:$0xff] %v1822_v35  ;;  %878 = vst [vmem:[%s1578_s9 + $0xf8] sm:$0xff] %v1820_v34 }
 0x11e   : > { %910 = vst [vmem:[%s1578_s9 + $0x1f8] sm:$0xff] %v1822_v35  ;;  %v1828_v36 = vpop.f32.mrf.mxu0  ;;  %v1830_v37 = vpop.f32.mrf.mxu1 }
 0x11f   : > { %2091 = vst [vmem:[#allocation13_spill] sm:$0xff] %v1830_v37  ;;  %876 = vst [vmem:[%s1578_s9 + $0xe8] sm:$0xff] %v1828_v36 }
 0x120   : > { %908 = vst [vmem:[%s1578_s9 + $0x1e8] sm:$0xff] %v1830_v37 }
 0x121   : > { %v1451_v31 = vmov 0.0  }
 0x122   : > { %915 = vst [vmem:[%s2054_s3] sm:$0x1] %v1451_v31  ;;  %916 = vst [vmem:[%s2055_s4] sm:$0x1] %v1451_v31 }
 0x123 PF: > { %v918_v35 = vadd.f32 %v1604_v44, %v1588_v40  ;;  %v990_v31 = vmul.f32 %v1588_v40, %v1588_v40  ;;  %v991_v15 = vmul.f32 %v1604_v44, %v1604_v44  ;;  %v995_v44 = vmul.f32 %v1636_v52, %v1636_v52 }
 0x125   : > { %v919_v33 = vadd.f32 %v1580_v38, %v918_v35 }
 0x127   : > { %v920_v37 = vadd.f32 %v1596_v42, %v919_v33  ;;  %v992_v33 = vmul.f32 %v1580_v38, %v1580_v38 }
 0x129   : > { %v921_v27 = vadd.f32 %v920_v37, %v1620_v48 }
 0x12b   : > { %v922_v23 = vadd.f32 %v921_v27, %v1636_v52  ;;  %v1054_v27 = vadd.f32 %v991_v15, %v990_v31  ;;  %v997_v15 = vmul.f32 %v1628_v50, %v1628_v50 }
 0x12d   : > { %v923_v29 = vadd.f32 %v1612_v46, %v922_v23  ;;  %v993_v23 = vmul.f32 %v1596_v42, %v1596_v42  ;;  %v1055_v40 = vadd.f32 %v1054_v27, %v992_v33  ;;  %v998_v33 = vmul.f32 %v1652_v56, %v1652_v56 }
 0x12e   : > { %v1000_v27 = vmul.f32 %v1644_v54, %v1644_v54 }
 0x12f   : > { %v924_v25 = vadd.f32 %v1628_v50, %v923_v29 }
 0x131   : > { %v925_v19 = vadd.f32 %v924_v25, %v1652_v56  ;;  %v994_v25 = vmul.f32 %v1620_v48, %v1620_v48 }
 0x133   : > { %v926_v35 = vadd.f32 %v925_v19, %v1668_v60  ;;  %v1056_v19 = vadd.f32 %v1055_v40, %v993_v23  ;;  %v1002_v40 = vmul.f32 %v1684_v0, %v1684_v0 }
 0x135   : > { %v927_v37 = vadd.f32 %v1644_v54, %v926_v35  ;;  %v996_v35 = vmul.f32 %v1612_v46, %v1612_v46  ;;  %v1057_v17 = vadd.f32 %v1056_v19, %v994_v25  ;;  %v1003_v19 = vmul.f32 %v1700_v4, %v1700_v4 }
 0x137   : > { %v928_v29 = vadd.f32 %v1660_v58, %v927_v37  ;;  %v1058_v31 = vadd.f32 %v1057_v17, %v995_v44  ;;  %v1001_v17 = vmul.f32 %v1660_v58, %v1660_v58 }
 0x139   : > { %v929_v21 = vadd.f32 %v928_v29, %v1684_v0  ;;  %v1059_v37 = vadd.f32 %v1058_v31, %v996_v35  ;;  %v1004_v35 = vmul.f32 %v1676_v62, %v1676_v62 }
 0x13b   : > { %v930_v38 = vadd.f32 %v929_v21, %v1700_v4  ;;  %v999_v21 = vmul.f32 %v1668_v60, %v1668_v60  ;;  %v1060_v23 = vadd.f32 %v1059_v37, %v997_v15  ;;  %v1005_v15 = vmul.f32 %v1692_v2, %v1692_v2 }
 0x13c   : > { %v1007_v37 = vmul.f32 %v1732_v12, %v1732_v12 }
 0x13d   : > { %v931_v42 = vadd.f32 %v1676_v62, %v930_v38  ;;  %v1061_v29 = vadd.f32 %v1060_v23, %v998_v33 }
 0x13f   : > { %v932_v48 = vadd.f32 %v1692_v2, %v931_v42  ;;  %v1062_v25 = vadd.f32 %v1061_v29, %v999_v21  ;;  %v1008_v21 = vmul.f32 %v1708_v6, %v1708_v6  ;;  %v1010_v29 = vmul.f32 %v1748_v16, %v1748_v16 }
 0x141   : > { %v933_v52 = vadd.f32 %v932_v48, %v1716_v8  ;;  %v1063_v44 = vadd.f32 %v1062_v25, %v1000_v27  ;;  %v1006_v48 = vmul.f32 %v1716_v8, %v1716_v8 }
 0x143   : > { %v934_v46 = vadd.f32 %v933_v52, %v1732_v12  ;;  %v1064_v38 = vadd.f32 %v1063_v44, %v1001_v17  ;;  %v1011_v17 = vmul.f32 %v1764_v20, %v1764_v20  ;;  %v1013_v44 = vmul.f32 %v1756_v18, %v1756_v18 }
 0x145   : > { %v935_v50 = vadd.f32 %v1708_v6, %v934_v46  ;;  %v1065_v42 = vadd.f32 %v1064_v38, %v1002_v40  ;;  %v1009_v46 = vmul.f32 %v1724_v10, %v1724_v10 }
 0x147   : > { %v936_v56 = vadd.f32 %v1724_v10, %v935_v50  ;;  %v1066_v31 = vadd.f32 %v1065_v42, %v1003_v19  ;;  %v1014_v19 = vmul.f32 %v1780_v24, %v1780_v24  ;;  %v1016_v42 = vmul.f32 %v1772_v22, %v1772_v22 }
 0x149   : > { %v937_v60 = vadd.f32 %v936_v56, %v1748_v16  ;;  %v1067_v33 = vadd.f32 %v1066_v31, %v1004_v35  ;;  %v1012_v56 = vmul.f32 %v1740_v14, %v1740_v14 }
 0x14b   : > { %v938_v54 = vadd.f32 %v937_v60, %v1764_v20  ;;  %v1068_v52 = vadd.f32 %v1067_v33, %v1005_v15  ;;  %v1017_v15 = vmul.f32 %v1788_v26, %v1788_v26  ;;  %v1019_v33 = vmul.f32 %v1828_v36, %v1828_v36 }
 0x14d   : > { %v939_v58 = vadd.f32 %v1740_v14, %v938_v54  ;;  %v1069_v23 = vadd.f32 %v1068_v52, %v1006_v48  ;;  %v1015_v54 = vmul.f32 %v1796_v28, %v1796_v28 }
 0x14f   : > { %v940_v0 = vadd.f32 %v1756_v18, %v939_v58  ;;  %v1070_v27 = vadd.f32 %v1069_v23, %v1007_v37  ;;  %v1020_v37 = vmul.f32 %v1804_v30, %v1804_v30  ;;  %v1022_v23 = vmul.f32 %v1590_v41, %v1590_v41 }
 0x151   : > { %v941_v4 = vadd.f32 %v940_v0, %v1780_v24  ;;  %v1071_v50 = vadd.f32 %v1070_v27, %v1008_v21  ;;  %v1018_v0 = vmul.f32 %v1812_v32, %v1812_v32 }
 0x153   : > { %v942_v62 = vadd.f32 %v941_v4, %v1796_v28  ;;  %v1072_v25 = vadd.f32 %v1071_v50, %v1009_v46  ;;  %v1023_v46 = vmul.f32 %v1606_v45, %v1606_v45  ;;  %v1025_v50 = vmul.f32 %v1598_v43, %v1598_v43 }
 0x155   : > { %v943_v2 = vadd.f32 %v1772_v22, %v942_v62  ;;  %v1073_v40 = vadd.f32 %v1072_v25, %v1010_v29  ;;  %v1021_v62 = vmul.f32 %v1820_v34, %v1820_v34 }
 0x157   : > { %v944_v8 = vadd.f32 %v1788_v26, %v943_v2  ;;  %v1074_v60 = vadd.f32 %v1073_v40, %v1011_v17  ;;  %v1026_v17 = vmul.f32 %v1622_v49, %v1622_v49  ;;  %v1028_v40 = vmul.f32 %v1614_v47, %v1614_v47 }
 0x159   : > { %v945_v12 = vadd.f32 %v944_v8, %v1812_v32  ;;  %v1075_v38 = vadd.f32 %v1074_v60, %v1012_v56  ;;  %v1024_v8 = vmul.f32 %v1582_v39, %v1582_v39 }
 0x15b   : > { %v946_v6 = vadd.f32 %v945_v12, %v1828_v36  ;;  %v1076_v35 = vadd.f32 %v1075_v38, %v1013_v44  ;;  %v1029_v44 = vmul.f32 %v1630_v51, %v1630_v51  ;;  %v1031_v38 = vmul.f32 %v1670_v61, %v1670_v61 }
 0x15d   : > { %v947_v10 = vadd.f32 %v1804_v30, %v946_v6  ;;  %v1077_v58 = vadd.f32 %v1076_v35, %v1014_v19  ;;  %v1027_v6 = vmul.f32 %v1638_v53, %v1638_v53 }
 0x15f   : > { %v948_v16 = vadd.f32 %v1820_v34, %v947_v10  ;;  %v1078_v31 = vadd.f32 %v1077_v58, %v1015_v54  ;;  %v1032_v54 = vmul.f32 %v1646_v55, %v1646_v55  ;;  %v1034_v58 = vmul.f32 %v1686_v1, %v1686_v1 }
 0x161   : > { %v949_v20 = vadd.f32 %v948_v16, %v1590_v41  ;;  %v1079_v48 = vadd.f32 %v1078_v31, %v1016_v42  ;;  %v1030_v16 = vmul.f32 %v1654_v57, %v1654_v57  ;;  %v1035_v31 = vmul.f32 %v1702_v5, %v1702_v5 }
 0x163   : > { %v950_v14 = vadd.f32 %v949_v20, %v1606_v45  ;;  %v1080_v4 = vadd.f32 %v1079_v48, %v1017_v15  ;;  %v1036_v48 = vmul.f32 %v1678_v63, %v1678_v63 }
 0x165   : > { %v951_v18 = vadd.f32 %v1582_v39, %v950_v14  ;;  %v1081_v52 = vadd.f32 %v1080_v4, %v1018_v0  ;;  %v1033_v14 = vmul.f32 %v1662_v59, %v1662_v59  ;;  %v1037_v4 = vmul.f32 %v1694_v3, %v1694_v3 }
 0x167   : > { %v952_v24 = vadd.f32 %v1598_v43, %v951_v18  ;;  %v1082_v21 = vadd.f32 %v1081_v52, %v1019_v33  ;;  %v1038_v52 = vmul.f32 %v1718_v9, %v1718_v9 }
 0x169   : > { %v953_v28 = vadd.f32 %v952_v24, %v1622_v49  ;;  %v1083_v2 = vadd.f32 %v1082_v21, %v1020_v37  ;;  %v1039_v21 = vmul.f32 %v1734_v13, %v1734_v13 }
 0x16b   : > { %v954_v22 = vadd.f32 %v953_v28, %v1638_v53  ;;  %v1084_v27 = vadd.f32 %v1083_v2, %v1021_v62  ;;  %v1040_v2 = vmul.f32 %v1710_v7, %v1710_v7 }
 0x16d   : > { %v955_v26 = vadd.f32 %v1614_v47, %v954_v22  ;;  %v1085_v29 = vadd.f32 %v1084_v27, %v1022_v23  ;;  %v1041_v27 = vmul.f32 %v1726_v11, %v1726_v11 }
 0x16f   : > { %v956_v32 = vadd.f32 %v1630_v51, %v955_v26  ;;  %v1086_v12 = vadd.f32 %v1085_v29, %v1023_v46 }
 0x171   : > { %v957_v36 = vadd.f32 %v956_v32, %v1654_v57  ;;  %v1087_v25 = vadd.f32 %v1086_v12, %v1024_v8 }
 0x173   : > { %v958_v30 = vadd.f32 %v957_v36, %v1670_v61  ;;  %v1088_v56 = vadd.f32 %v1087_v25, %v1025_v50  ;;  %v2092_v61 = vld [vmem:[#allocation3_spill] sm:$0xff] }
 0x174   : > { %v1042_v29 = vmul.f32 %v2092_v61, %v2092_v61 }
 0x175   : > { %v959_v34 = vadd.f32 %v1646_v55, %v958_v30  ;;  %v1089_v10 = vadd.f32 %v1088_v56, %v1026_v17  ;;  %v2093_v55 = vld [vmem:[#allocation5_spill] sm:$0xff] }
 0x176   : > { %v1043_v12 = vmul.f32 %v2093_v55, %v2093_v55 }
 0x177   : > { %v960_v41 = vadd.f32 %v1662_v59, %v959_v34  ;;  %v1090_v60 = vadd.f32 %v1089_v10, %v1027_v6  ;;  %v2094_v59 = vld [vmem:[#allocation2_spill] sm:$0xff] }
 0x178   : > { %v1044_v25 = vmul.f32 %v2094_v59, %v2094_v59 }
 0x179   : > { %v961_v45 = vadd.f32 %v960_v41, %v1686_v1  ;;  %v1091_v19 = vadd.f32 %v1090_v60, %v1028_v40  ;;  %v2095_v1 = vld [vmem:[#allocation4_spill] sm:$0xff] }
 0x17a   : > { %v1045_v56 = vmul.f32 %v2095_v1, %v2095_v1  ;;  %v2103_v40 = vld [vmem:[#allocation12_spill] sm:$0xff] }
 0x17b   : > { %v962_v39 = vadd.f32 %v961_v45, %v1702_v5  ;;  %v1092_v20 = vadd.f32 %v1091_v19, %v1029_v44  ;;  %v2096_v5 = vld [vmem:[#allocation7_spill] sm:$0xff] }
 0x17d   : > { %v963_v43 = vadd.f32 %v1678_v63, %v962_v39  ;;  %v1093_v35 = vadd.f32 %v1092_v20, %v1030_v16  ;;  %v2097_v63 = vld [vmem:[#allocation9_spill] sm:$0xff] }
 0x17f   : > { %v964_v49 = vadd.f32 %v1694_v3, %v963_v43  ;;  %v1094_v42 = vadd.f32 %v1093_v35, %v1031_v38  ;;  %v2098_v3 = vld [vmem:[#allocation6_spill] sm:$0xff]  ;;  %v1046_v43 = vmul.f32 %v2096_v5, %v2096_v5 }
 0x181   : > { %v965_v53 = vadd.f32 %v964_v49, %v1718_v9  ;;  %v1095_v18 = vadd.f32 %v1094_v42, %v1032_v54  ;;  %v2099_v9 = vld [vmem:[#allocation8_spill] sm:$0xff]  ;;  %v1047_v49 = vmul.f32 %v2097_v63, %v2097_v63 }
 0x183   : > { %v966_v47 = vadd.f32 %v965_v53, %v1734_v13  ;;  %v1096_v24 = vadd.f32 %v1095_v18, %v1033_v14  ;;  %v2100_v13 = vld [vmem:[#allocation11_spill] sm:$0xff]  ;;  %v1048_v53 = vmul.f32 %v2098_v3, %v2098_v3  ;;  %v917_v18 = vld [vmem:[%s2054_s3] sm:$0x1] }
 0x185   : > { %v967_v51 = vadd.f32 %v1710_v7, %v966_v47  ;;  %v1097_v28 = vadd.f32 %v1096_v24, %v1034_v58  ;;  %v2101_v7 = vld [vmem:[#allocation13_spill] sm:$0xff]  ;;  %v1049_v47 = vmul.f32 %v2099_v9, %v2099_v9 }
 0x187   : > { %v968_v57 = vadd.f32 %v1726_v11, %v967_v51  ;;  %v1098_v22 = vadd.f32 %v1097_v28, %v1035_v31  ;;  %v2102_v11 = vld [vmem:[#allocation10_spill] sm:$0xff]  ;;  %v1050_v51 = vmul.f32 %v2100_v13, %v2100_v13 }
 0x189   : > { %v969_v15 = vadd.f32 %v968_v57, %v2092_v61  ;;  %v1099_v26 = vadd.f32 %v1098_v22, %v1036_v48  ;;  %v1051_v57 = vmul.f32 %v2101_v7, %v2101_v7 }
 0x18b   : > { %v970_v0 = vadd.f32 %v969_v15, %v2093_v55  ;;  %v1100_v32 = vadd.f32 %v1099_v26, %v1037_v4  ;;  %v1052_v15 = vmul.f32 %v2102_v11, %v2102_v11  ;;  %v1053_v55 = vmul.f32 %v2103_v40, %v2103_v40 }
 0x18d   : > { %v971_v33 = vadd.f32 %v2094_v59, %v970_v0  ;;  %v1101_v36 = vadd.f32 %v1100_v32, %v1038_v52 }
 0x18f   : > { %v972_v37 = vadd.f32 %v2095_v1, %v971_v33  ;;  %v1102_v30 = vadd.f32 %v1101_v36, %v1039_v21 }
 0x191   : > { %v973_v62 = vadd.f32 %v972_v37, %v2096_v5  ;;  %v1103_v34 = vadd.f32 %v1102_v30, %v1040_v2  ;;  %v989_v37 = vld [vmem:[%s2055_s4] sm:$0x1] }
 0x193   : > { %v974_v23 = vadd.f32 %v973_v62, %v2097_v63  ;;  %v1104_v41 = vadd.f32 %v1103_v34, %v1041_v27 }
 0x195   : > { %v975_v46 = vadd.f32 %v2098_v3, %v974_v23  ;;  %v1105_v45 = vadd.f32 %v1104_v41, %v1042_v29 }
 0x197   : > { %v976_v8 = vadd.f32 %v2099_v9, %v975_v46  ;;  %v1106_v39 = vadd.f32 %v1105_v45, %v1043_v12 }
 0x199   : > { %v977_v50 = vadd.f32 %v976_v8, %v2100_v13  ;;  %v1107_v44 = vadd.f32 %v1106_v39, %v1044_v25 }
 0x19b   : > { %v978_v17 = vadd.f32 %v977_v50, %v2101_v7  ;;  %v1108_v16 = vadd.f32 %v1107_v44, %v1045_v56 }
 0x19d   : > { %v979_v6 = vadd.f32 %v2102_v11, %v978_v17  ;;  %v1109_v38 = vadd.f32 %v1108_v16, %v1046_v43 }
 0x19f   : > { %v980_v10 = vadd.f32 %v2103_v40, %v979_v6  ;;  %v1110_v54 = vadd.f32 %v1109_v38, %v1047_v49 }
 0x1a1   : > { %v981_v60 = vrot.slane %v980_v10, 4  ;;  %v1111_v14 = vadd.f32 %v1110_v54, %v1048_v53 }
 0x1a3   : > { %v982_v19 = vadd.f32 %v981_v60, %v980_v10  ;;  %v1112_v58 = vadd.f32 %v1111_v14, %v1049_v47 }
 0x1a5   : > { %v983_v20 = vrot.slane %v982_v19, 2  ;;  %v1113_v31 = vadd.f32 %v1112_v58, %v1050_v51 }
 0x1a7   : > { %v984_v35 = vadd.f32 %v983_v20, %v982_v19  ;;  %v1114_v0 = vadd.f32 %v1113_v31, %v1051_v57 }
 0x1a9   : > { %v985_v42 = vrot.slane %v984_v35, 1  ;;  %v1115_v48 = vadd.f32 %v1114_v0, %v1052_v15 }
 0x1ab   : > { %v986_v61 = vadd.f32 %v985_v42, %v984_v35  ;;  %v1116_v28 = vadd.f32 %v1115_v48, %v1053_v55 }
 0x1ad   : > { %v987_v24 = vadd.f32 %v986_v61, %v917_v18  ;;  %v1117_v59 = vrot.slane %v1116_v28, 4 }
 0x1af   : > { %988 = vst [vmem:[%s2054_s3] sm:$0x1] %v987_v24  ;;  %v1118_v33 = vadd.f32 %v1117_v59, %v1116_v28 }
 0x1b1   : > { %v1119_v4 = vrot.slane %v1118_v33, 2 }
 0x1b3   : > { %v1120_v22 = vadd.f32 %v1119_v4, %v1118_v33 }
 0x1b5   : > { %v1121_v1 = vrot.slane %v1120_v22, 1 }
 0x1b7   : > { %v1122_v52 = vadd.f32 %v1121_v1, %v1120_v22 }
 0x1b9   : > { %v1123_v26 = vadd.f32 %v1122_v52, %v989_v37 }
 0x1bb   : > { %1124 = vst [vmem:[%s2055_s4] sm:$0x1] %v1123_v26 }
 0x1bc PF: > { %s15_s15 = sadd.s32 1, %s1449_s15  }
 0x1bd   : > { %p12_p5 = scmp.ge.s32.totalorder %s15_s15, 18  }
 0x1bf   :  { %14 = sbr.rel (!%p12_p5) target bundleno = 1 (0x1), region = 78 }

// kernel: decoder_forward.13
= control target key start
LH: loop header
LB: loop body
LE: loop exit
PB: predicated region body
PF: predicated region fallthrough
CT: control target
= control target key end

     0   :  { %s1519_s12 = smov 0   ;;  %s1750_s0 = inlined_call_operand.vmem [shape: bf16[8192,36], index: 0, kind: input, shape index: {}]   ;;  %s1751_s1 = inlined_call_operand.vmem [shape: bf16[36,128], index: 1, kind: input, shape index: {}]   ;;  %s1752_s2 = inlined_call_operand.vmem [shape: f32[1,128], index: 2, kind: input, shape index: {}]   ;;  %s1753_s3 = inlined_call_operand.vmem [shape: f32[8192,128], index: 3, kind: output, shape index: {}]  }
   0x1 LB: > { %s1128_s13 = sadd.s32 4294967295, %s1497_s12   ;;  %p1132_p0 = scmp.ge.s32.totalorder %s1497_s12, 1  ;;  %s1497_s12 = sphi %s1519_s12, %s13_s12  }
   0x2   : > { %p138_p1 = scmp.lt.s32.totalorder %s1497_s12, 17 }
   0x4   : > { %p139_p2 = pnand %p1132_p0, %p138_p1 }
   0x5   : > { %s1133_s18 = sshll.u32 (!%p139_p2), %s1128_s13, 6 }
   0x6   : > { %142 = sbr.rel (%p139_p2) target bundleno = 301 (0x12d), region = 32  ;;  %p163_p3 = scmp.lt.s32.totalorder (!%p139_p2), %s1133_s18, 1023 }
   0xb   : > { %v1328_v0 = vld [vmem:[%s1751_s1 + $0x10] ss:$0 sps:$4 sm:$0x33]   ;;  %vm523_vm0 = vcmask 1041408   ;;  %v1329_v1 = vld [vmem:[%s1751_s1 + $0x8] sm:$0xff]   ;;  %v1330_v3 = vld [vmem:[%s1751_s1] sm:$0xff]  }
   0xc   : > { %1318 = vmatprep.subr.msk.bf16.mxu0 %vm523_vm0, %v1328_v0  ;;  %1319 = vmatprep.subr.msk.bf16.mxu1 %vm523_vm0, %v1328_v0  ;;  %v525_v2 = vsel %vm523_vm0, %v1328_v0, 0  ;;  %s1755_s18 = smov (!%p163_p3, %s1133_s18), 1023  ;;  %vm426_vm1 = vcmask 293888   ;;  %v1611_v36 = vld [vmem:[%s1752_s2] ss:$0 sm:$0xff] }
   0xd   : > { %1243 = vmatpush3.bf16.msra.mxu0 %v525_v2  ;;  %1315 = vmatpush3.bf16.msra.mxu1 %v525_v2  ;;  %s1134_s21 = sshll.u32 %s1755_s18, 2  ;;  %s1136_s27 = sshll.u32 %s1755_s18, 3 }
   0xe   : > { %1244 = vmatprep.subr.bf16.mxu0 %v1329_v1  ;;  %1313 = vmatprep.subr.bf16.mxu1 %v1329_v1  ;;  %s1542_s24 = scalar_lea.vmem %s1750_s0, %s1134_s21  ;;  %s1635_s30 = scalar_lea.vmem %s1753_s3, %s1136_s27 }
   0xf   : > { %v1331_v4 = vld [vmem:[%s1542_s24] sm:$0xff]   ;;  %v1333_v6 = vld [vmem:[%s1542_s24 + $0x8] sm:$0xff]   ;;  %v1335_v8 = vld [vmem:[%s1542_s24 + $0x10] sm:$0xff]  }
  0x10   : > { %v1332_v5 = vld [vmem:[%s1542_s24 + $0x80] sm:$0xff]   ;;  %1248 = vmatprep.mubr.msk.bf16.mxu0 %vm426_vm1, %v1331_v4  ;;  %v1334_v7 = vld [vmem:[%s1542_s24 + $0x88] sm:$0xff]   ;;  %v1336_v9 = vld [vmem:[%s1542_s24 + $0x90] sm:$0xff]  }
  0x11   : > { %1245 = vmatpush3.bf16.msra.mxu0 %v1329_v1  ;;  %1316 = vmatpush3.bf16.msra.mxu1 %v1329_v1  ;;  %v1337_v10 = vld [vmem:[%s1542_s24 + $0x18] sm:$0xff]   ;;  %v1339_v12 = vld [vmem:[%s1542_s24 + $0x20] sm:$0xff]   ;;  %v1341_v14 = vld [vmem:[%s1542_s24 + $0x28] sm:$0xff]  }
  0x12   : > { %1246 = vmatprep.subr.bf16.mxu0 %v1330_v3  ;;  %1314 = vmatprep.subr.bf16.mxu1 %v1330_v3  ;;  %v1338_v11 = vld [vmem:[%s1542_s24 + $0x98] sm:$0xff]   ;;  %v1340_v13 = vld [vmem:[%s1542_s24 + $0xa0] sm:$0xff]   ;;  %v1342_v15 = vld [vmem:[%s1542_s24 + $0xa8] sm:$0xff]  }
  0x13   : > { %1280 = vmatprep.mubr.msk.bf16.mxu1 %vm426_vm1, %v1332_v5  ;;  %v1343_v16 = vld [vmem:[%s1542_s24 + $0x30] sm:$0xff]   ;;  %v1345_v18 = vld [vmem:[%s1542_s24 + $0x38] sm:$0xff]   ;;  %v1347_v20 = vld [vmem:[%s1542_s24 + $0x40] sm:$0xff]  }
  0x14   : > { %v1344_v17 = vld [vmem:[%s1542_s24 + $0xb0] sm:$0xff]   ;;  %v1346_v19 = vld [vmem:[%s1542_s24 + $0xb8] sm:$0xff]   ;;  %v1348_v21 = vld [vmem:[%s1542_s24 + $0xc0] sm:$0xff]  }
  0x15   : > { %1247 = vmatpush3.bf16.msra.mxu0 %v1330_v3  ;;  %1317 = vmatpush3.bf16.msra.mxu1 %v1330_v3  ;;  %v1349_v22 = vld [vmem:[%s1542_s24 + $0x48] sm:$0xff]   ;;  %v1351_v24 = vld [vmem:[%s1542_s24 + $0x50] sm:$0xff]   ;;  %v1353_v26 = vld [vmem:[%s1542_s24 + $0x58] sm:$0xff]  }
  0x16   : > { %v1350_v23 = vld [vmem:[%s1542_s24 + $0xc8] sm:$0xff]   ;;  %v1352_v25 = vld [vmem:[%s1542_s24 + $0xd0] sm:$0xff]   ;;  %v1354_v27 = vld [vmem:[%s1542_s24 + $0xd8] sm:$0xff]  }
  0x17   : > { %v1355_v28 = vld [vmem:[%s1542_s24 + $0x60] sm:$0xff]   ;;  %v1357_v30 = vld [vmem:[%s1542_s24 + $0x68] sm:$0xff]   ;;  %v1359_v32 = vld [vmem:[%s1542_s24 + $0x70] sm:$0xff]  }
  0x18   : > { %1249 = vmatmul.mubr.msk.bf16.vlgmr.msra.gmra.mxu0 %vm426_vm1, %v1333_v6  ;;  %1281 = vmatmul.mubr.msk.bf16.vlgmr.msra.gmra.mxu1 %vm426_vm1, %v1334_v7  ;;  %v1356_v29 = vld [vmem:[%s1542_s24 + $0xe0] sm:$0xff]   ;;  %v1358_v31 = vld [vmem:[%s1542_s24 + $0xe8] sm:$0xff]   ;;  %v1360_v33 = vld [vmem:[%s1542_s24 + $0xf0] sm:$0xff]  }
  0x19   : > { %1252 = vmatprep.mubr.msk.bf16.mxu0 %vm426_vm1, %v1335_v8  ;;  %1284 = vmatprep.mubr.msk.bf16.mxu1 %vm426_vm1, %v1336_v9  ;;  %v1361_v34 = vld [vmem:[%s1542_s24 + $0x78] sm:$0xff]  }
  0x1a   : > { %v1362_v35 = vld [vmem:[%s1542_s24 + $0xf8] sm:$0xff]  }
  0x20   : > { %1253 = vmatmul.mubr.msk.bf16.gmra.mxu0 %vm426_vm1, %v1337_v10  ;;  %1285 = vmatmul.mubr.msk.bf16.gmra.mxu1 %vm426_vm1, %v1338_v11 }
  0x21   : > { %1256 = vmatprep.mubr.msk.bf16.mxu0 %vm426_vm1, %v1339_v12  ;;  %1288 = vmatprep.mubr.msk.bf16.mxu1 %vm426_vm1, %v1340_v13 }
  0x28   : > { %1257 = vmatmul.mubr.msk.bf16.gmra.mxu0 %vm426_vm1, %v1341_v14  ;;  %1289 = vmatmul.mubr.msk.bf16.gmra.mxu1 %vm426_vm1, %v1342_v15 }
  0x29   : > { %1260 = vmatprep.mubr.msk.bf16.mxu0 %vm426_vm1, %v1343_v16  ;;  %1292 = vmatprep.mubr.msk.bf16.mxu1 %vm426_vm1, %v1344_v17 }
  0x30   : > { %1261 = vmatmul.mubr.msk.bf16.gmra.mxu0 %vm426_vm1, %v1345_v18  ;;  %1293 = vmatmul.mubr.msk.bf16.gmra.mxu1 %vm426_vm1, %v1346_v19 }
  0x31   : > { %1264 = vmatprep.mubr.msk.bf16.mxu0 %vm426_vm1, %v1347_v20  ;;  %1296 = vmatprep.mubr.msk.bf16.mxu1 %vm426_vm1, %v1348_v21 }
  0x38   : > { %1265 = vmatmul.mubr.msk.bf16.gmra.mxu0 %vm426_vm1, %v1349_v22  ;;  %1297 = vmatmul.mubr.msk.bf16.gmra.mxu1 %vm426_vm1, %v1350_v23 }
  0x39   : > { %1268 = vmatprep.mubr.msk.bf16.mxu0 %vm426_vm1, %v1351_v24  ;;  %1300 = vmatprep.mubr.msk.bf16.mxu1 %vm426_vm1, %v1352_v25 }
  0x40   : > { %1269 = vmatmul.mubr.msk.bf16.gmra.mxu0 %vm426_vm1, %v1353_v26  ;;  %1301 = vmatmul.mubr.msk.bf16.gmra.mxu1 %vm426_vm1, %v1354_v27 }
  0x41   : > { %1272 = vmatprep.mubr.msk.bf16.mxu0 %vm426_vm1, %v1355_v28  ;;  %1304 = vmatprep.mubr.msk.bf16.mxu1 %vm426_vm1, %v1356_v29 }
  0x48   : > { %1273 = vmatmul.mubr.msk.bf16.gmra.mxu0 %vm426_vm1, %v1357_v30  ;;  %1305 = vmatmul.mubr.msk.bf16.gmra.mxu1 %vm426_vm1, %v1358_v31 }
  0x49   : > { %1276 = vmatprep.mubr.msk.bf16.mxu0 %vm426_vm1, %v1359_v32  ;;  %1308 = vmatprep.mubr.msk.bf16.mxu1 %vm426_vm1, %v1360_v33 }
  0x50   : > { %1277 = vmatmul.mubr.msk.bf16.gmra.mxu0 %vm426_vm1, %v1361_v34  ;;  %1309 = vmatmul.mubr.msk.bf16.gmra.mxu1 %vm426_vm1, %v1362_v35 }
  0xd8   : > { %v1250_v37 = vpop.f32.mrf.mxu0  ;;  %v1282_v38 = vpop.f32.mrf.mxu1 }
  0xd9   : > { %v570_v39 = vadd.f32 %v1250_v37, %v1611_v36  ;;  %v698_v40 = vadd.f32 %v1282_v38, %v1611_v36 }
  0xda   : > { %v561_v41 = vpop.f32.mrf.mxu0  ;;  %v689_v42 = vpop.f32.mrf.mxu1 }
  0xdb   : > { %1363 = vtanh.f32 %v570_v39  ;;  %v562_v43 = vadd.f32 %v1611_v36, %v561_v41  ;;  %v690_v44 = vadd.f32 %v1611_v36, %v689_v42 }
  0xdc   : > { %1365 = vtanh.f32 %v698_v40  ;;  %v1251_v45 = vpop.f32.mrf.mxu0  ;;  %v1283_v46 = vpop.f32.mrf.mxu1 }
  0xdd   : > { %1367 = vtanh.f32 %v562_v43  ;;  %v573_v47 = vadd.f32 %v1251_v45, %v1611_v36  ;;  %v701_v48 = vadd.f32 %v1283_v46, %v1611_v36 }
  0xde   : > { %1369 = vtanh.f32 %v690_v44  ;;  %v564_v49 = vpop.f32.mrf.mxu0  ;;  %v692_v50 = vpop.f32.mrf.mxu1 }
  0xdf   : > { %1371 = vtanh.f32 %v573_v47  ;;  %v565_v51 = vadd.f32 %v1611_v36, %v564_v49  ;;  %v693_v52 = vadd.f32 %v1611_v36, %v692_v50 }
  0xe0   : > { %1373 = vtanh.f32 %v701_v48  ;;  %v1254_v53 = vpop.f32.mrf.mxu0  ;;  %v1286_v54 = vpop.f32.mrf.mxu1 }
  0xe1   : > { %1375 = vtanh.f32 %v565_v51  ;;  %v586_v55 = vadd.f32 %v1254_v53, %v1611_v36  ;;  %v714_v56 = vadd.f32 %v1286_v54, %v1611_v36 }
  0xe2   : > { %1377 = vtanh.f32 %v693_v52  ;;  %v577_v57 = vpop.f32.mrf.mxu0  ;;  %v705_v58 = vpop.f32.mrf.mxu1 }
  0xe3   : > { %1379 = vtanh.f32 %v586_v55  ;;  %v578_v59 = vadd.f32 %v1611_v36, %v577_v57  ;;  %v706_v60 = vadd.f32 %v1611_v36, %v705_v58 }
  0xe4   : > { %1381 = vtanh.f32 %v714_v56  ;;  %v1255_v61 = vpop.f32.mrf.mxu0  ;;  %v1287_v62 = vpop.f32.mrf.mxu1 }
  0xe5   : > { %1383 = vtanh.f32 %v578_v59  ;;  %v589_v63 = vadd.f32 %v1255_v61, %v1611_v36  ;;  %v717_v0 = vadd.f32 %v1287_v62, %v1611_v36 }
  0xe6   : > { %1385 = vtanh.f32 %v706_v60  ;;  %v580_v1 = vpop.f32.mrf.mxu0  ;;  %v708_v2 = vpop.f32.mrf.mxu1 }
  0xe7   : > { %1387 = vtanh.f32 %v589_v63  ;;  %v581_v3 = vadd.f32 %v1611_v36, %v580_v1  ;;  %v709_v4 = vadd.f32 %v1611_v36, %v708_v2 }
  0xe8   : > { %v1364_v5 = vpop.eup %1363  ;;  %1389 = vtanh.f32 %v717_v0  ;;  %v1258_v6 = vpop.f32.mrf.mxu0 }
  0xe9   : > { %v1290_v7 = vpop.f32.mrf.mxu1  ;;  %v1366_v8 = vpop.eup %1365  ;;  %v882_v9 = vadd.f32 1.0, %v1364_v5  ;;  %1391 = vtanh.f32 %v581_v3  ;;  %v602_v10 = vadd.f32 %v1258_v6, %v1611_v36 }
  0xea   : > { %v730_v11 = vadd.f32 %v1290_v7, %v1611_v36  ;;  %v1368_v12 = vpop.eup %1367  ;;  %v914_v13 = vadd.f32 1.0, %v1366_v8  ;;  %1393 = vtanh.f32 %v709_v4  ;;  %v593_v14 = vpop.f32.mrf.mxu0 }
  0xeb   : > { %v721_v15 = vpop.f32.mrf.mxu1  ;;  %v1370_v16 = vpop.eup %1369  ;;  %v946_v17 = vmul.f32 0.5, %v882_v9  ;;  %v880_v18 = vadd.f32 1.0, %v1368_v12  ;;  %1395 = vtanh.f32 %v602_v10  ;;  %v594_v19 = vadd.f32 %v1611_v36, %v593_v14 }
  0xec   : > { %v1372_v20 = vpop.eup %1371  ;;  %v978_v21 = vmul.f32 0.5, %v914_v13  ;;  %v912_v22 = vadd.f32 1.0, %v1370_v16  ;;  %1397 = vtanh.f32 %v730_v11  ;;  %v722_v23 = vadd.f32 %v1611_v36, %v721_v15  ;;  %v1259_v24 = vpop.f32.mrf.mxu0 }
  0xed   : > { %v1291_v25 = vpop.f32.mrf.mxu1  ;;  %v1374_v26 = vpop.eup %1373  ;;  %1010 = vst [vmem:[%s1635_s30 + $0x10] sm:$0xff] %v946_v17  ;;  %v944_v27 = vmul.f32 0.5, %v880_v18  ;;  %v883_v28 = vadd.f32 1.0, %v1372_v20  ;;  %1399 = vtanh.f32 %v594_v19  ;;  %v605_v29 = vadd.f32 %v1259_v24, %v1611_v36 }
  0xee   : > { %v1376_v30 = vpop.eup %1375  ;;  %1042 = vst [vmem:[%s1635_s30 + $0x110] sm:$0xff] %v978_v21  ;;  %v976_v31 = vmul.f32 0.5, %v912_v22  ;;  %v915_v32 = vadd.f32 1.0, %v1374_v26  ;;  %1401 = vtanh.f32 %v722_v23  ;;  %v733_v33 = vadd.f32 %v1291_v25, %v1611_v36  ;;  %v596_v34 = vpop.f32.mrf.mxu0 }
  0xef   : > { %v724_v35 = vpop.f32.mrf.mxu1  ;;  %v1378_v37 = vpop.eup %1377  ;;  %1008 = vst [vmem:[%s1635_s30] sm:$0xff] %v944_v27  ;;  %v947_v38 = vmul.f32 0.5, %v883_v28  ;;  %v881_v39 = vadd.f32 1.0, %v1376_v30  ;;  %1403 = vtanh.f32 %v605_v29  ;;  %v597_v40 = vadd.f32 %v1611_v36, %v596_v34 }
  0xf0   : > { %v1380_v41 = vpop.eup %1379  ;;  %1040 = vst [vmem:[%s1635_s30 + $0x100] sm:$0xff] %v976_v31  ;;  %v979_v42 = vmul.f32 0.5, %v915_v32  ;;  %v913_v43 = vadd.f32 1.0, %v1378_v37  ;;  %1405 = vtanh.f32 %v733_v33  ;;  %v725_v44 = vadd.f32 %v1611_v36, %v724_v35  ;;  %v1262_v45 = vpop.f32.mrf.mxu0 }
  0xf1   : > { %v1294_v46 = vpop.f32.mrf.mxu1  ;;  %v1382_v47 = vpop.eup %1381  ;;  %1011 = vst [vmem:[%s1635_s30 + $0x18] sm:$0xff] %v947_v38  ;;  %v945_v48 = vmul.f32 0.5, %v881_v39  ;;  %v886_v49 = vadd.f32 1.0, %v1380_v41  ;;  %1407 = vtanh.f32 %v597_v40  ;;  %v618_v50 = vadd.f32 %v1262_v45, %v1611_v36 }
  0xf2   : > { %v1384_v51 = vpop.eup %1383  ;;  %1043 = vst [vmem:[%s1635_s30 + $0x118] sm:$0xff] %v979_v42  ;;  %v977_v52 = vmul.f32 0.5, %v913_v43  ;;  %v918_v53 = vadd.f32 1.0, %v1382_v47  ;;  %1409 = vtanh.f32 %v725_v44  ;;  %v746_v54 = vadd.f32 %v1294_v46, %v1611_v36  ;;  %v609_v55 = vpop.f32.mrf.mxu0 }
  0xf3   : > { %v737_v56 = vpop.f32.mrf.mxu1  ;;  %v1386_v57 = vpop.eup %1385  ;;  %1009 = vst [vmem:[%s1635_s30 + $0x8] sm:$0xff] %v945_v48  ;;  %v950_v58 = vmul.f32 0.5, %v886_v49  ;;  %v884_v59 = vadd.f32 1.0, %v1384_v51  ;;  %1411 = vtanh.f32 %v618_v50  ;;  %v610_v60 = vadd.f32 %v1611_v36, %v609_v55 }
  0xf4   : > { %v1388_v61 = vpop.eup %1387  ;;  %1041 = vst [vmem:[%s1635_s30 + $0x108] sm:$0xff] %v977_v52  ;;  %v982_v62 = vmul.f32 0.5, %v918_v53  ;;  %v916_v63 = vadd.f32 1.0, %v1386_v57  ;;  %1413 = vtanh.f32 %v746_v54  ;;  %v738_v0 = vadd.f32 %v1611_v36, %v737_v56  ;;  %v1263_v1 = vpop.f32.mrf.mxu0 }
  0xf5   : > { %v1295_v2 = vpop.f32.mrf.mxu1  ;;  %v1390_v3 = vpop.eup %1389  ;;  %1014 = vst [vmem:[%s1635_s30 + $0x30] sm:$0xff] %v950_v58  ;;  %v948_v4 = vmul.f32 0.5, %v884_v59  ;;  %v887_v5 = vadd.f32 1.0, %v1388_v61  ;;  %1415 = vtanh.f32 %v610_v60  ;;  %v621_v6 = vadd.f32 %v1263_v1, %v1611_v36 }
  0xf6   : > { %v1392_v7 = vpop.eup %1391  ;;  %1046 = vst [vmem:[%s1635_s30 + $0x130] sm:$0xff] %v982_v62  ;;  %v980_v8 = vmul.f32 0.5, %v916_v63  ;;  %v919_v9 = vadd.f32 1.0, %v1390_v3  ;;  %1417 = vtanh.f32 %v738_v0  ;;  %v749_v10 = vadd.f32 %v1295_v2, %v1611_v36  ;;  %v612_v11 = vpop.f32.mrf.mxu0 }
  0xf7   : > { %v740_v12 = vpop.f32.mrf.mxu1  ;;  %v1394_v13 = vpop.eup %1393  ;;  %1012 = vst [vmem:[%s1635_s30 + $0x20] sm:$0xff] %v948_v4  ;;  %v951_v14 = vmul.f32 0.5, %v887_v5  ;;  %v885_v15 = vadd.f32 1.0, %v1392_v7  ;;  %1419 = vtanh.f32 %v621_v6  ;;  %v613_v16 = vadd.f32 %v1611_v36, %v612_v11 }
  0xf8   : > { %v1396_v17 = vpop.eup %1395  ;;  %1044 = vst [vmem:[%s1635_s30 + $0x120] sm:$0xff] %v980_v8  ;;  %v983_v18 = vmul.f32 0.5, %v919_v9  ;;  %v917_v19 = vadd.f32 1.0, %v1394_v13  ;;  %1421 = vtanh.f32 %v749_v10  ;;  %v741_v20 = vadd.f32 %v1611_v36, %v740_v12  ;;  %v1266_v21 = vpop.f32.mrf.mxu0 }
  0xf9   : > { %v1298_v22 = vpop.f32.mrf.mxu1  ;;  %v1398_v23 = vpop.eup %1397  ;;  %1015 = vst [vmem:[%s1635_s30 + $0x38] sm:$0xff] %v951_v14  ;;  %v949_v24 = vmul.f32 0.5, %v885_v15  ;;  %v890_v25 = vadd.f32 1.0, %v1396_v17  ;;  %1423 = vtanh.f32 %v613_v16  ;;  %v634_v26 = vadd.f32 %v1266_v21, %v1611_v36 }
  0xfa   : > { %v1400_v27 = vpop.eup %1399  ;;  %1047 = vst [vmem:[%s1635_s30 + $0x138] sm:$0xff] %v983_v18  ;;  %v981_v28 = vmul.f32 0.5, %v917_v19  ;;  %v922_v29 = vadd.f32 1.0, %v1398_v23  ;;  %1425 = vtanh.f32 %v741_v20  ;;  %v762_v30 = vadd.f32 %v1298_v22, %v1611_v36  ;;  %v625_v31 = vpop.f32.mrf.mxu0 }
  0xfb   : > { %v753_v32 = vpop.f32.mrf.mxu1  ;;  %v1402_v33 = vpop.eup %1401  ;;  %1013 = vst [vmem:[%s1635_s30 + $0x28] sm:$0xff] %v949_v24  ;;  %v954_v34 = vmul.f32 0.5, %v890_v25  ;;  %v888_v35 = vadd.f32 1.0, %v1400_v27  ;;  %1427 = vtanh.f32 %v634_v26  ;;  %v626_v37 = vadd.f32 %v1611_v36, %v625_v31 }
  0xfc   : > { %v1404_v38 = vpop.eup %1403  ;;  %1045 = vst [vmem:[%s1635_s30 + $0x128] sm:$0xff] %v981_v28  ;;  %v986_v39 = vmul.f32 0.5, %v922_v29  ;;  %v920_v40 = vadd.f32 1.0, %v1402_v33  ;;  %1429 = vtanh.f32 %v762_v30  ;;  %v754_v41 = vadd.f32 %v1611_v36, %v753_v32  ;;  %v1267_v42 = vpop.f32.mrf.mxu0 }
  0xfd   : > { %v1299_v43 = vpop.f32.mrf.mxu1  ;;  %v1406_v44 = vpop.eup %1405  ;;  %1018 = vst [vmem:[%s1635_s30 + $0x50] sm:$0xff] %v954_v34  ;;  %v952_v45 = vmul.f32 0.5, %v888_v35  ;;  %v891_v46 = vadd.f32 1.0, %v1404_v38  ;;  %1431 = vtanh.f32 %v626_v37  ;;  %v637_v47 = vadd.f32 %v1267_v42, %v1611_v36 }
  0xfe   : > { %v1408_v48 = vpop.eup %1407  ;;  %1050 = vst [vmem:[%s1635_s30 + $0x150] sm:$0xff] %v986_v39  ;;  %v984_v49 = vmul.f32 0.5, %v920_v40  ;;  %v923_v50 = vadd.f32 1.0, %v1406_v44  ;;  %1433 = vtanh.f32 %v754_v41  ;;  %v765_v51 = vadd.f32 %v1299_v43, %v1611_v36  ;;  %v628_v52 = vpop.f32.mrf.mxu0 }
  0xff   : > { %v756_v53 = vpop.f32.mrf.mxu1  ;;  %v1410_v54 = vpop.eup %1409  ;;  %1016 = vst [vmem:[%s1635_s30 + $0x40] sm:$0xff] %v952_v45  ;;  %v955_v55 = vmul.f32 0.5, %v891_v46  ;;  %v889_v56 = vadd.f32 1.0, %v1408_v48  ;;  %1435 = vtanh.f32 %v637_v47  ;;  %v629_v57 = vadd.f32 %v1611_v36, %v628_v52 }
 0x100   : > { %v1412_v58 = vpop.eup %1411  ;;  %1048 = vst [vmem:[%s1635_s30 + $0x140] sm:$0xff] %v984_v49  ;;  %v987_v59 = vmul.f32 0.5, %v923_v50  ;;  %v921_v60 = vadd.f32 1.0, %v1410_v54  ;;  %1437 = vtanh.f32 %v765_v51  ;;  %v757_v61 = vadd.f32 %v1611_v36, %v756_v53  ;;  %v1270_v62 = vpop.f32.mrf.mxu0 }
 0x101   : > { %v1302_v63 = vpop.f32.mrf.mxu1  ;;  %v1414_v0 = vpop.eup %1413  ;;  %1019 = vst [vmem:[%s1635_s30 + $0x58] sm:$0xff] %v955_v55  ;;  %v953_v1 = vmul.f32 0.5, %v889_v56  ;;  %v894_v2 = vadd.f32 1.0, %v1412_v58  ;;  %1439 = vtanh.f32 %v629_v57  ;;  %v650_v3 = vadd.f32 %v1270_v62, %v1611_v36 }
 0x102   : > { %v1416_v4 = vpop.eup %1415  ;;  %1051 = vst [vmem:[%s1635_s30 + $0x158] sm:$0xff] %v987_v59  ;;  %v985_v5 = vmul.f32 0.5, %v921_v60  ;;  %v926_v6 = vadd.f32 1.0, %v1414_v0  ;;  %1441 = vtanh.f32 %v757_v61  ;;  %v778_v7 = vadd.f32 %v1302_v63, %v1611_v36  ;;  %v641_v8 = vpop.f32.mrf.mxu0 }
 0x103   : > { %v769_v9 = vpop.f32.mrf.mxu1  ;;  %v1418_v10 = vpop.eup %1417  ;;  %1017 = vst [vmem:[%s1635_s30 + $0x48] sm:$0xff] %v953_v1  ;;  %v958_v11 = vmul.f32 0.5, %v894_v2  ;;  %v892_v12 = vadd.f32 1.0, %v1416_v4  ;;  %1443 = vtanh.f32 %v650_v3  ;;  %v642_v13 = vadd.f32 %v1611_v36, %v641_v8 }
 0x104   : > { %v1420_v14 = vpop.eup %1419  ;;  %1049 = vst [vmem:[%s1635_s30 + $0x148] sm:$0xff] %v985_v5  ;;  %v990_v15 = vmul.f32 0.5, %v926_v6  ;;  %v924_v16 = vadd.f32 1.0, %v1418_v10  ;;  %1445 = vtanh.f32 %v778_v7  ;;  %v770_v17 = vadd.f32 %v1611_v36, %v769_v9  ;;  %v1271_v18 = vpop.f32.mrf.mxu0 }
 0x105   : > { %v1303_v19 = vpop.f32.mrf.mxu1  ;;  %v1422_v20 = vpop.eup %1421  ;;  %1022 = vst [vmem:[%s1635_s30 + $0x70] sm:$0xff] %v958_v11  ;;  %v956_v21 = vmul.f32 0.5, %v892_v12  ;;  %v895_v22 = vadd.f32 1.0, %v1420_v14  ;;  %1447 = vtanh.f32 %v642_v13  ;;  %v653_v23 = vadd.f32 %v1271_v18, %v1611_v36 }
 0x106   : > { %v1424_v24 = vpop.eup %1423  ;;  %1054 = vst [vmem:[%s1635_s30 + $0x170] sm:$0xff] %v990_v15  ;;  %v988_v25 = vmul.f32 0.5, %v924_v16  ;;  %v927_v26 = vadd.f32 1.0, %v1422_v20  ;;  %1449 = vtanh.f32 %v770_v17  ;;  %v781_v27 = vadd.f32 %v1303_v19, %v1611_v36  ;;  %v644_v28 = vpop.f32.mrf.mxu0 }
 0x107   : > { %v772_v29 = vpop.f32.mrf.mxu1  ;;  %v1426_v30 = vpop.eup %1425  ;;  %1020 = vst [vmem:[%s1635_s30 + $0x60] sm:$0xff] %v956_v21  ;;  %v959_v31 = vmul.f32 0.5, %v895_v22  ;;  %v893_v32 = vadd.f32 1.0, %v1424_v24  ;;  %1451 = vtanh.f32 %v653_v23  ;;  %v645_v33 = vadd.f32 %v1611_v36, %v644_v28 }
 0x108   : > { %v1428_v34 = vpop.eup %1427  ;;  %1052 = vst [vmem:[%s1635_s30 + $0x160] sm:$0xff] %v988_v25  ;;  %v991_v35 = vmul.f32 0.5, %v927_v26  ;;  %v925_v37 = vadd.f32 1.0, %v1426_v30  ;;  %1453 = vtanh.f32 %v781_v27  ;;  %v773_v38 = vadd.f32 %v1611_v36, %v772_v29  ;;  %v1274_v39 = vpop.f32.mrf.mxu0 }
 0x109   : > { %v1306_v40 = vpop.f32.mrf.mxu1  ;;  %v1430_v41 = vpop.eup %1429  ;;  %1023 = vst [vmem:[%s1635_s30 + $0x78] sm:$0xff] %v959_v31  ;;  %v957_v42 = vmul.f32 0.5, %v893_v32  ;;  %v898_v43 = vadd.f32 1.0, %v1428_v34  ;;  %1455 = vtanh.f32 %v645_v33  ;;  %v666_v44 = vadd.f32 %v1274_v39, %v1611_v36 }
 0x10a   : > { %v1432_v45 = vpop.eup %1431  ;;  %1055 = vst [vmem:[%s1635_s30 + $0x178] sm:$0xff] %v991_v35  ;;  %v989_v46 = vmul.f32 0.5, %v925_v37  ;;  %v930_v47 = vadd.f32 1.0, %v1430_v41  ;;  %1457 = vtanh.f32 %v773_v38  ;;  %v794_v48 = vadd.f32 %v1306_v40, %v1611_v36  ;;  %v657_v49 = vpop.f32.mrf.mxu0 }
 0x10b   : > { %v785_v50 = vpop.f32.mrf.mxu1  ;;  %v1434_v51 = vpop.eup %1433  ;;  %1021 = vst [vmem:[%s1635_s30 + $0x68] sm:$0xff] %v957_v42  ;;  %v962_v52 = vmul.f32 0.5, %v898_v43  ;;  %v896_v53 = vadd.f32 1.0, %v1432_v45  ;;  %1459 = vtanh.f32 %v666_v44  ;;  %v658_v54 = vadd.f32 %v1611_v36, %v657_v49 }
 0x10c   : > { %v1436_v55 = vpop.eup %1435  ;;  %1053 = vst [vmem:[%s1635_s30 + $0x168] sm:$0xff] %v989_v46  ;;  %v994_v56 = vmul.f32 0.5, %v930_v47  ;;  %v928_v57 = vadd.f32 1.0, %v1434_v51  ;;  %1461 = vtanh.f32 %v794_v48  ;;  %v786_v58 = vadd.f32 %v1611_v36, %v785_v50  ;;  %v1275_v59 = vpop.f32.mrf.mxu0 }
 0x10d   : > { %v1307_v60 = vpop.f32.mrf.mxu1  ;;  %v1438_v61 = vpop.eup %1437  ;;  %1026 = vst [vmem:[%s1635_s30 + $0x90] sm:$0xff] %v962_v52  ;;  %v960_v62 = vmul.f32 0.5, %v896_v53  ;;  %v899_v63 = vadd.f32 1.0, %v1436_v55  ;;  %1463 = vtanh.f32 %v658_v54  ;;  %v669_v0 = vadd.f32 %v1275_v59, %v1611_v36 }
 0x10e   : > { %v1440_v1 = vpop.eup %1439  ;;  %1058 = vst [vmem:[%s1635_s30 + $0x190] sm:$0xff] %v994_v56  ;;  %v992_v2 = vmul.f32 0.5, %v928_v57  ;;  %v931_v3 = vadd.f32 1.0, %v1438_v61  ;;  %1465 = vtanh.f32 %v786_v58  ;;  %v797_v4 = vadd.f32 %v1307_v60, %v1611_v36  ;;  %v660_v5 = vpop.f32.mrf.mxu0 }
 0x10f   : > { %v788_v6 = vpop.f32.mrf.mxu1  ;;  %v1442_v7 = vpop.eup %1441  ;;  %1024 = vst [vmem:[%s1635_s30 + $0x80] sm:$0xff] %v960_v62  ;;  %v963_v8 = vmul.f32 0.5, %v899_v63  ;;  %v897_v9 = vadd.f32 1.0, %v1440_v1  ;;  %1467 = vtanh.f32 %v669_v0  ;;  %v661_v10 = vadd.f32 %v1611_v36, %v660_v5 }
 0x110   : > { %v1444_v11 = vpop.eup %1443  ;;  %1056 = vst [vmem:[%s1635_s30 + $0x180] sm:$0xff] %v992_v2  ;;  %v995_v12 = vmul.f32 0.5, %v931_v3  ;;  %v929_v13 = vadd.f32 1.0, %v1442_v7  ;;  %1469 = vtanh.f32 %v797_v4  ;;  %v789_v14 = vadd.f32 %v1611_v36, %v788_v6  ;;  %v1278_v15 = vpop.f32.mrf.mxu0 }
 0x111   : > { %v1310_v16 = vpop.f32.mrf.mxu1  ;;  %v1446_v17 = vpop.eup %1445  ;;  %1027 = vst [vmem:[%s1635_s30 + $0x98] sm:$0xff] %v963_v8  ;;  %v961_v18 = vmul.f32 0.5, %v897_v9  ;;  %v902_v19 = vadd.f32 1.0, %v1444_v11  ;;  %1471 = vtanh.f32 %v661_v10  ;;  %v682_v20 = vadd.f32 %v1278_v15, %v1611_v36 }
 0x112   : > { %v1448_v21 = vpop.eup %1447  ;;  %1059 = vst [vmem:[%s1635_s30 + $0x198] sm:$0xff] %v995_v12  ;;  %v993_v22 = vmul.f32 0.5, %v929_v13  ;;  %v934_v23 = vadd.f32 1.0, %v1446_v17  ;;  %1473 = vtanh.f32 %v789_v14  ;;  %v810_v24 = vadd.f32 %v1310_v16, %v1611_v36  ;;  %v673_v25 = vpop.f32.mrf.mxu0 }
 0x113   : > { %v801_v26 = vpop.f32.mrf.mxu1  ;;  %v1450_v27 = vpop.eup %1449  ;;  %1025 = vst [vmem:[%s1635_s30 + $0x88] sm:$0xff] %v961_v18  ;;  %v966_v28 = vmul.f32 0.5, %v902_v19  ;;  %v900_v29 = vadd.f32 1.0, %v1448_v21  ;;  %1475 = vtanh.f32 %v682_v20  ;;  %v674_v30 = vadd.f32 %v1611_v36, %v673_v25 }
 0x114   : > { %v1452_v31 = vpop.eup %1451  ;;  %1057 = vst [vmem:[%s1635_s30 + $0x188] sm:$0xff] %v993_v22  ;;  %v998_v32 = vmul.f32 0.5, %v934_v23  ;;  %v932_v33 = vadd.f32 1.0, %v1450_v27  ;;  %1477 = vtanh.f32 %v810_v24  ;;  %v802_v34 = vadd.f32 %v1611_v36, %v801_v26  ;;  %v1279_v35 = vpop.f32.mrf.mxu0 }
 0x115   : > { %v1311_v37 = vpop.f32.mrf.mxu1  ;;  %v1454_v38 = vpop.eup %1453  ;;  %1030 = vst [vmem:[%s1635_s30 + $0xb0] sm:$0xff] %v966_v28  ;;  %v964_v39 = vmul.f32 0.5, %v900_v29  ;;  %v903_v40 = vadd.f32 1.0, %v1452_v31  ;;  %1479 = vtanh.f32 %v674_v30  ;;  %v685_v41 = vadd.f32 %v1279_v35, %v1611_v36 }
 0x116   : > { %v1456_v42 = vpop.eup %1455  ;;  %1062 = vst [vmem:[%s1635_s30 + $0x1b0] sm:$0xff] %v998_v32  ;;  %v996_v43 = vmul.f32 0.5, %v932_v33  ;;  %v935_v44 = vadd.f32 1.0, %v1454_v38  ;;  %1481 = vtanh.f32 %v802_v34  ;;  %v813_v45 = vadd.f32 %v1311_v37, %v1611_v36  ;;  %v676_v46 = vpop.f32.mrf.mxu0 }
 0x117   : > { %v804_v47 = vpop.f32.mrf.mxu1  ;;  %v1458_v48 = vpop.eup %1457  ;;  %1028 = vst [vmem:[%s1635_s30 + $0xa0] sm:$0xff] %v964_v39  ;;  %v967_v49 = vmul.f32 0.5, %v903_v40  ;;  %v901_v50 = vadd.f32 1.0, %v1456_v42  ;;  %1483 = vtanh.f32 %v685_v41  ;;  %v677_v51 = vadd.f32 %v1611_v36, %v676_v46 }
 0x118   : > { %v1460_v52 = vpop.eup %1459  ;;  %1060 = vst [vmem:[%s1635_s30 + $0x1a0] sm:$0xff] %v996_v43  ;;  %v999_v53 = vmul.f32 0.5, %v935_v44  ;;  %v933_v54 = vadd.f32 1.0, %v1458_v48  ;;  %1485 = vtanh.f32 %v813_v45  ;;  %v805_v55 = vadd.f32 %v1611_v36, %v804_v47 }
 0x119   : > { %v1462_v56 = vpop.eup %1461  ;;  %1031 = vst [vmem:[%s1635_s30 + $0xb8] sm:$0xff] %v967_v49  ;;  %v965_v57 = vmul.f32 0.5, %v901_v50  ;;  %v906_v58 = vadd.f32 1.0, %v1460_v52  ;;  %1487 = vtanh.f32 %v677_v51 }
 0x11a   : > { %v1464_v59 = vpop.eup %1463  ;;  %1063 = vst [vmem:[%s1635_s30 + $0x1b8] sm:$0xff] %v999_v53  ;;  %v997_v60 = vmul.f32 0.5, %v933_v54  ;;  %v938_v61 = vadd.f32 1.0, %v1462_v56  ;;  %1489 = vtanh.f32 %v805_v55 }
 0x11b   : > { %v1466_v62 = vpop.eup %1465  ;;  %1029 = vst [vmem:[%s1635_s30 + $0xa8] sm:$0xff] %v965_v57  ;;  %v970_v63 = vmul.f32 0.5, %v906_v58  ;;  %v904_v0 = vadd.f32 1.0, %v1464_v59 }
 0x11c   : > { %v1468_v1 = vpop.eup %1467  ;;  %1061 = vst [vmem:[%s1635_s30 + $0x1a8] sm:$0xff] %v997_v60  ;;  %v1002_v36 = vmul.f32 0.5, %v938_v61  ;;  %v936_v2 = vadd.f32 1.0, %v1466_v62 }
 0x11d   : > { %v1470_v3 = vpop.eup %1469  ;;  %1034 = vst [vmem:[%s1635_s30 + $0xd0] sm:$0xff] %v970_v63  ;;  %v968_v4 = vmul.f32 0.5, %v904_v0  ;;  %v907_v5 = vadd.f32 1.0, %v1468_v1 }
 0x11e   : > { %v1472_v6 = vpop.eup %1471  ;;  %1066 = vst [vmem:[%s1635_s30 + $0x1d0] sm:$0xff] %v1002_v36  ;;  %v1000_v7 = vmul.f32 0.5, %v936_v2  ;;  %v939_v8 = vadd.f32 1.0, %v1470_v3 }
 0x11f   : > { %v1474_v9 = vpop.eup %1473  ;;  %1032 = vst [vmem:[%s1635_s30 + $0xc0] sm:$0xff] %v968_v4  ;;  %v971_v10 = vmul.f32 0.5, %v907_v5  ;;  %v905_v11 = vadd.f32 1.0, %v1472_v6 }
 0x120   : > { %v1476_v12 = vpop.eup %1475  ;;  %1064 = vst [vmem:[%s1635_s30 + $0x1c0] sm:$0xff] %v1000_v7  ;;  %v1003_v13 = vmul.f32 0.5, %v939_v8  ;;  %v937_v14 = vadd.f32 1.0, %v1474_v9 }
 0x121   : > { %v1478_v15 = vpop.eup %1477  ;;  %1035 = vst [vmem:[%s1635_s30 + $0xd8] sm:$0xff] %v971_v10  ;;  %v969_v16 = vmul.f32 0.5, %v905_v11  ;;  %v910_v17 = vadd.f32 1.0, %v1476_v12 }
 0x122   : > { %v1480_v18 = vpop.eup %1479  ;;  %1067 = vst [vmem:[%s1635_s30 + $0x1d8] sm:$0xff] %v1003_v13  ;;  %v1001_v19 = vmul.f32 0.5, %v937_v14  ;;  %v942_v20 = vadd.f32 1.0, %v1478_v15 }
 0x123   : > { %v1482_v21 = vpop.eup %1481  ;;  %1033 = vst [vmem:[%s1635_s30 + $0xc8] sm:$0xff] %v969_v16  ;;  %v974_v22 = vmul.f32 0.5, %v910_v17  ;;  %v908_v23 = vadd.f32 1.0, %v1480_v18 }
 0x124   : > { %v1484_v24 = vpop.eup %1483  ;;  %1065 = vst [vmem:[%s1635_s30 + $0x1c8] sm:$0xff] %v1001_v19  ;;  %v1006_v25 = vmul.f32 0.5, %v942_v20  ;;  %v940_v26 = vadd.f32 1.0, %v1482_v21 }
 0x125   : > { %v1486_v27 = vpop.eup %1485  ;;  %1038 = vst [vmem:[%s1635_s30 + $0xf0] sm:$0xff] %v974_v22  ;;  %v972_v28 = vmul.f32 0.5, %v908_v23  ;;  %v911_v29 = vadd.f32 1.0, %v1484_v24 }
 0x126   : > { %v1488_v30 = vpop.eup %1487  ;;  %1070 = vst [vmem:[%s1635_s30 + $0x1f0] sm:$0xff] %v1006_v25  ;;  %v1004_v31 = vmul.f32 0.5, %v940_v26  ;;  %v943_v32 = vadd.f32 1.0, %v1486_v27 }
 0x127   : > { %v1490_v33 = vpop.eup %1489  ;;  %1036 = vst [vmem:[%s1635_s30 + $0xe0] sm:$0xff] %v972_v28  ;;  %v975_v34 = vmul.f32 0.5, %v911_v29  ;;  %v909_v35 = vadd.f32 1.0, %v1488_v30 }
 0x128   : > { %1068 = vst [vmem:[%s1635_s30 + $0x1e0] sm:$0xff] %v1004_v31  ;;  %v1007_v37 = vmul.f32 0.5, %v943_v32  ;;  %v941_v38 = vadd.f32 1.0, %v1490_v33 }
 0x129   : > { %1039 = vst [vmem:[%s1635_s30 + $0xf8] sm:$0xff] %v975_v34  ;;  %v973_v39 = vmul.f32 0.5, %v909_v35 }
 0x12a   : > { %1071 = vst [vmem:[%s1635_s30 + $0x1f8] sm:$0xff] %v1007_v37  ;;  %v1005_v40 = vmul.f32 0.5, %v941_v38 }
 0x12b   : > { %1037 = vst [vmem:[%s1635_s30 + $0xe8] sm:$0xff] %v973_v39 }
 0x12c   : > { %1069 = vst [vmem:[%s1635_s30 + $0x1e8] sm:$0xff] %v1005_v40 }
 0x12d PF: > { %s13_s12 = sadd.s32 1, %s1497_s12  }
 0x12e   : > { %p10_p4 = scmp.ge.s32.totalorder %s13_s12, 18  }
 0x130   :  { %12 = sbr.rel (!%p10_p4) target bundleno = 1 (0x1), region = 62 }

</bundles_post_ra>
